<compile_context>
chip_gen: v6e
topology: v6e:2x2x1
jax: 0.10.0
libtpu: 0.0.40
codegen_flags: <defaults>
</compile_context>

<pallas_src>
import math

import jax
import jax.numpy as jnp
from jax.experimental import pallas as pl
from jax.experimental.pallas import tpu as pltpu  # noqa: F401

# ---------------- model dimensions (small, TPU-friendly) ----------------
N = 256          # number of input points
D_IN = 2         # raw coordinate dimension (e.g. (x, t))
F = 16           # number of Fourier frequencies -> mapped input = 2*F = 32
TWO_F = 2 * F
H = 32           # hidden_width
O = 2            # output_size
K_AUG = TWO_F + 1   # 33: [sin; cos] features + constant-ones row (folded biases)

# The fused-slab packing relies on mapped-input width == hidden width
# (true for this configuration: 2F == H == 32).
assert TWO_F == H

_HIGHEST = jax.lax.Precision.HIGHEST


def inr_kernel(x_ref, fb_ref, ph_ref, wuvw_ref, w_ref, b_ref, out_ref):
    # x_ref   : (D_IN, N)      coordinates, points on the lane axis
    # fb_ref  : (2F+1, D_IN)   [2*pi*B; 2*pi*B; 0]
    # ph_ref  : (2F+1, N)      phase, lane-replicated: [0 ; pi/2 ; pi/2]
    # wuvw_ref: (3H, 2F+1)     fused U|V|W0 weights, bias folded as last column
    # w_ref   : (2H+O, H)      W1 | W2 | Wo stacked (PyTorch (out, in) layout)
    # b_ref   : (2H+O, N)      b1 | b2 | bo, pre-broadcast over lanes
    # out_ref : (O, N)         lane-dense output
    xin = x_ref[...]                                     # (D_IN, N)
    fb = fb_ref[...]                                     # (2F+1, D_IN)

    # --- fourier_map + ones row in ONE sin over one buffer ---
    # rows 0:F  -> sin(2*pi*B@x), rows F:2F -> cos(2*pi*B@x), row 2F -> 1
    proj = fb[:, 0:1] * xin[0:1, :] + (fb[:, 1:2] * xin[1:2, :] + ph_ref[...])
    feat = jnp.sin(proj)                                 # (2F+1, N)

    # --- fused U | V | layer-0: one MXU push (biases folded via ones row) ---
    uvw = jnp.tanh(
        jnp.dot(wuvw_ref[...], feat,
                preferred_element_type=jnp.float32, precision=_HIGHEST))  # (3H, N)
    ux = uvw[0:H, :]
    vx = uvw[H:2 * H, :]
    y = uvw[2 * H:3 * H, :]                              # layer-0 activation

    duv = ux - vx                                        # hoisted gate difference
    x = vx + duv * y                                     # == ux*y + vx*(1-y)

    # --- layer i = 1 (odd -> skip connection) ---
    y = jnp.tanh(
        jnp.dot(w_ref[0:H, :], x,
                preferred_element_type=jnp.float32, precision=_HIGHEST)
        + b_ref[0:H, :]) + x
    x = vx + duv * y

    # --- layer i = 2 ---
    y = jnp.tanh(
        jnp.dot(w_ref[H:2 * H, :], x,
                preferred_element_type=jnp.float32, precision=_HIGHEST)
        + b_ref[H:2 * H, :])
    x = vx + duv * y

    # --- layer i = 3 == hidden_nlayers (final linear, no gating) ---
    out = (jnp.dot(w_ref[2 * H:2 * H + O, :], x,
                   preferred_element_type=jnp.float32, precision=_HIGHEST)
           + b_ref[2 * H:2 * H + O, :])                  # (O, N)

    # final_act = tanh (normalise_targets=True)
    out_ref[...] = jnp.tanh(out)


def pack_params(params, n_pts):
    """One-time packing at parameter-load time (hoisted out of the call path)."""
    f32 = lambda a: jnp.asarray(a, jnp.float32)

    # Augmented Fourier matrix + phase: one sin produces [sin; cos; ones].
    two_pi_b = (2.0 * math.pi) * f32(params["B"])                       # (F, D_IN)
    fb_aug = jnp.concatenate(
        [two_pi_b, two_pi_b, jnp.zeros((1, D_IN), jnp.float32)], axis=0)  # (2F+1, D_IN)
    phase = jnp.concatenate(
        [jnp.zeros((F, 1), jnp.float32),
         jnp.full((F + 1, 1), 0.5 * math.pi, jnp.float32)], axis=0)      # (2F+1, 1)
    ph_bcast = jnp.tile(phase, (1, n_pts))                               # (2F+1, N)

    def wb(w, b):   # fold bias as an extra input column -> (out, in+1)
        return jnp.concatenate([f32(w), f32(b).reshape(-1, 1)], axis=1)

    w_uvw = jnp.concatenate(
        [wb(params["Uw"], params["Ub"]),
         wb(params["Vw"], params["Vb"]),
         wb(params["W0"], params["b0"])], axis=0)                        # (3H, 2F+1)

    w_tail = jnp.concatenate(
        [f32(params["W1"]), f32(params["W2"]), f32(params["Wo"])], axis=0)  # (2H+O, H)
    b_tail = jnp.tile(
        jnp.concatenate([f32(params["b1"]), f32(params["b2"]),
                         f32(params["bo"])]).reshape(-1, 1),
        (1, n_pts))                                                      # (2H+O, N)
    return fb_aug, ph_bcast, w_uvw, w_tail, b_tail


def inr_forward(xin, fb_aug, ph_bcast, w_uvw, w_tail, b_tail):
    """xin: (N, D_IN) float32. Returns (N, O), matching the PyTorch module."""
    xin_t = jnp.asarray(xin, jnp.float32).T              # (D_IN, N): points on lanes
    n_pts = xin_t.shape[1]
    out_t = pl.pallas_call(
        inr_kernel,
        out_shape=jax.ShapeDtypeStruct((O, n_pts), jnp.float32),
    )(xin_t, fb_aug, ph_bcast, w_uvw, w_tail, b_tail)
    # layout plumbing back to the module's (N, O) convention (tiny fused transpose)
    return out_t.T


inr_forward_jit = jax.jit(inr_forward)


def make_params(key):
    """Deterministic parameter init mimicking the PyTorch init shapes/scales."""
    keys = jax.random.split(key, 16)
    p = {}
    # Fourier matrix B: (F, D_IN), gaussian frequencies (typical RFF setup).
    p["B"] = jax.random.normal(keys[0], (F, D_IN), jnp.float32) * 2.0

    def he_uniform(k, out_f, in_f):
        bound = math.sqrt(1.0 / in_f)
        return jax.random.uniform(k, (out_f, in_f), jnp.float32, -bound, bound)

    def bias_uniform(k, out_f, in_f):
        bound = math.sqrt(1.0 / in_f)
        return jax.random.uniform(k, (out_f,), jnp.float32, -bound, bound)

    p["Uw"], p["Ub"] = he_uniform(keys[1], H, TWO_F), bias_uniform(keys[2], H, TWO_F)
    p["Vw"], p["Vb"] = he_uniform(keys[3], H, TWO_F), bias_uniform(keys[4], H, TWO_F)
    p["W0"], p["b0"] = he_uniform(keys[5], H, TWO_F), bias_uniform(keys[6], H, TWO_F)
    p["W1"], p["b1"] = he_uniform(keys[7], H, H), bias_uniform(keys[8], H, H)
    p["W2"], p["b2"] = he_uniform(keys[9], H, H), bias_uniform(keys[10], H, H)
    p["Wo"], p["bo"] = he_uniform(keys[11], O, H), bias_uniform(keys[12], O, H)
    return p


def inr_reference(xin, p):
    """Pure-JAX reference mirroring the PyTorch forward for validation."""
    lin = lambda x, w, b: jnp.dot(x, w.T, precision=_HIGHEST) + b
    proj = 2.0 * math.pi * jnp.dot(xin, p["B"].T, precision=_HIGHEST)
    x = jnp.concatenate([jnp.sin(proj), jnp.cos(proj)], axis=-1)
    ux = jnp.tanh(lin(x, p["Uw"], p["Ub"]))
    vx = jnp.tanh(lin(x, p["Vw"], p["Vb"]))
    y = jnp.tanh(lin(x, p["W0"], p["b0"]))
    x = ux * y + vx * (1.0 - y)
    y = jnp.tanh(lin(x, p["W1"], p["b1"])) + x
    x = ux * y + vx * (1.0 - y)
    y = jnp.tanh(lin(x, p["W2"], p["b2"]))
    x = ux * y + vx * (1.0 - y)
    return jnp.tanh(lin(x, p["Wo"], p["bo"]))


if __name__ == "__main__":
    key = jax.random.PRNGKey(0)
    k_param, k_x, k_t = jax.random.split(key, 3)
    params = make_params(k_param)

    # forward(*args) concatenates the coordinate args along axis=1 (glue).
    x_coord = jax.random.uniform(k_x, (N, 1), jnp.float32, -1.0, 1.0)
    t_coord = jax.random.uniform(k_t, (N, 1), jnp.float32, 0.0, 1.0)
    xin = jnp.concatenate([x_coord, t_coord], axis=1)    # (N, D_IN)

    # Pack once at parameter-load time; only the jitted forward runs per call.
    packed = pack_params(params, N)

    out = jax.block_until_ready(inr_forward_jit(xin, *packed))
    ref = inr_reference(xin, params)

    assert out.shape == (N, O)
    assert jnp.allclose(out, ref, atol=3e-5, rtol=3e-5), "mismatch vs reference"

    print("KERNEL_OK")
</pallas_src>

<mosaic_0001>
module attributes {stable_mosaic.version = 11 : i64} {
  func.func @inr_kernel(%arg0: memref<2x256xf32, #tpu.memory_space<vmem>>, %arg1: memref<33x2xf32, #tpu.memory_space<vmem>>, %arg2: memref<33x256xf32, #tpu.memory_space<vmem>>, %arg3: memref<96x33xf32, #tpu.memory_space<vmem>>, %arg4: memref<66x32xf32, #tpu.memory_space<vmem>>, %arg5: memref<66x256xf32, #tpu.memory_space<vmem>>, %arg6: memref<2x256xf32, #tpu.memory_space<vmem>>) attributes {dimension_semantics = [], scalar_prefetch = 0 : i64, scratch_operands = 0 : i64, tpu.core_type = #tpu.core_type<tc>} {
    %c0 = arith.constant 0 : index
    %c0_0 = arith.constant 0 : index
    %0 = vector.load %arg0[%c0, %c0_0] : memref<2x256xf32, #tpu.memory_space<vmem>>, vector<2x256xf32>
    %c0_1 = arith.constant 0 : index
    %c0_2 = arith.constant 0 : index
    %1 = vector.load %arg1[%c0_1, %c0_2] : memref<33x2xf32, #tpu.memory_space<vmem>>, vector<33x2xf32>
    %2 = vector.extract_strided_slice %1 {offsets = [0, 0], sizes = [33, 1], strides = [1, 1]} : vector<33x2xf32> to vector<33x1xf32>
    %3 = vector.extract_strided_slice %0 {offsets = [0, 0], sizes = [1, 256], strides = [1, 1]} : vector<2x256xf32> to vector<1x256xf32>
    %4 = vector.broadcast %2 : vector<33x1xf32> to vector<33x256xf32>
    %5 = vector.broadcast %3 : vector<1x256xf32> to vector<33x256xf32>
    %6 = arith.mulf %4, %5 : vector<33x256xf32>
    %7 = vector.extract_strided_slice %1 {offsets = [0, 1], sizes = [33, 1], strides = [1, 1]} : vector<33x2xf32> to vector<33x1xf32>
    %8 = vector.extract_strided_slice %0 {offsets = [1, 0], sizes = [1, 256], strides = [1, 1]} : vector<2x256xf32> to vector<1x256xf32>
    %9 = vector.broadcast %7 : vector<33x1xf32> to vector<33x256xf32>
    %10 = vector.broadcast %8 : vector<1x256xf32> to vector<33x256xf32>
    %11 = arith.mulf %9, %10 : vector<33x256xf32>
    %c0_3 = arith.constant 0 : index
    %c0_4 = arith.constant 0 : index
    %12 = vector.load %arg2[%c0_3, %c0_4] : memref<33x256xf32, #tpu.memory_space<vmem>>, vector<33x256xf32>
    %13 = arith.addf %11, %12 : vector<33x256xf32>
    %14 = arith.addf %6, %13 : vector<33x256xf32>
    %15 = math.sin %14 : vector<33x256xf32>
    %c0_5 = arith.constant 0 : index
    %c0_6 = arith.constant 0 : index
    %16 = vector.load %arg3[%c0_5, %c0_6] : memref<96x33xf32, #tpu.memory_space<vmem>>, vector<96x33xf32>
    %cst = arith.constant dense<0.000000e+00> : vector<96x256xf32>
    %17 = tpu.matmul %16, %15, %cst {dimension_numbers = #tpu.dot_dimension_numbers<[1], [0], [0], [1], [0, 0, 1, 1], [], []>, precision = #tpu.contract_precision<fp32>} : vector<96x33xf32>, vector<33x256xf32>, vector<96x256xf32> -> vector<96x256xf32>
    %18 = math.tanh %17 : vector<96x256xf32>
    %19 = vector.extract_strided_slice %18 {offsets = [0, 0], sizes = [32, 256], strides = [1, 1]} : vector<96x256xf32> to vector<32x256xf32>
    %20 = vector.extract_strided_slice %18 {offsets = [32, 0], sizes = [32, 256], strides = [1, 1]} : vector<96x256xf32> to vector<32x256xf32>
    %21 = vector.extract_strided_slice %18 {offsets = [64, 0], sizes = [32, 256], strides = [1, 1]} : vector<96x256xf32> to vector<32x256xf32>
    %22 = arith.subf %19, %20 : vector<32x256xf32>
    %23 = arith.mulf %22, %21 : vector<32x256xf32>
    %24 = arith.addf %20, %23 : vector<32x256xf32>
    %c0_7 = arith.constant 0 : index
    %c0_8 = arith.constant 0 : index
    %25 = vector.load %arg4[%c0_7, %c0_8] : memref<66x32xf32, #tpu.memory_space<vmem>>, vector<32x32xf32>
    %cst_9 = arith.constant dense<0.000000e+00> : vector<32x256xf32>
    %26 = tpu.matmul %25, %24, %cst_9 {dimension_numbers = #tpu.dot_dimension_numbers<[1], [0], [0], [1], [0, 0, 1, 1], [], []>, precision = #tpu.contract_precision<fp32>} : vector<32x32xf32>, vector<32x256xf32>, vector<32x256xf32> -> vector<32x256xf32>
    %c0_10 = arith.constant 0 : index
    %c0_11 = arith.constant 0 : index
    %27 = vector.load %arg5[%c0_10, %c0_11] : memref<66x256xf32, #tpu.memory_space<vmem>>, vector<32x256xf32>
    %28 = arith.addf %26, %27 : vector<32x256xf32>
    %29 = math.tanh %28 : vector<32x256xf32>
    %30 = arith.addf %29, %24 : vector<32x256xf32>
    %31 = arith.mulf %22, %30 : vector<32x256xf32>
    %32 = arith.addf %20, %31 : vector<32x256xf32>
    %c32 = arith.constant 32 : index
    %c0_12 = arith.constant 0 : index
    %33 = vector.load %arg4[%c32, %c0_12] : memref<66x32xf32, #tpu.memory_space<vmem>>, vector<32x32xf32>
    %cst_13 = arith.constant dense<0.000000e+00> : vector<32x256xf32>
    %34 = tpu.matmul %33, %32, %cst_13 {dimension_numbers = #tpu.dot_dimension_numbers<[1], [0], [0], [1], [0, 0, 1, 1], [], []>, precision = #tpu.contract_precision<fp32>} : vector<32x32xf32>, vector<32x256xf32>, vector<32x256xf32> -> vector<32x256xf32>
    %c32_14 = arith.constant 32 : index
    %c0_15 = arith.constant 0 : index
    %35 = vector.load %arg5[%c32_14, %c0_15] : memref<66x256xf32, #tpu.memory_space<vmem>>, vector<32x256xf32>
    %36 = arith.addf %34, %35 : vector<32x256xf32>
    %37 = math.tanh %36 : vector<32x256xf32>
    %38 = arith.mulf %22, %37 : vector<32x256xf32>
    %39 = arith.addf %20, %38 : vector<32x256xf32>
    %c64 = arith.constant 64 : index
    %c0_16 = arith.constant 0 : index
    %40 = vector.load %arg4[%c64, %c0_16] : memref<66x32xf32, #tpu.memory_space<vmem>>, vector<2x32xf32>
    %cst_17 = arith.constant dense<0.000000e+00> : vector<2x256xf32>
    %41 = tpu.matmul %40, %39, %cst_17 {dimension_numbers = #tpu.dot_dimension_numbers<[1], [0], [0], [1], [0, 0, 1, 1], [], []>, precision = #tpu.contract_precision<fp32>} : vector<2x32xf32>, vector<32x256xf32>, vector<2x256xf32> -> vector<2x256xf32>
    %c64_18 = arith.constant 64 : index
    %c0_19 = arith.constant 0 : index
    %42 = vector.load %arg5[%c64_18, %c0_19] : memref<66x256xf32, #tpu.memory_space<vmem>>, vector<2x256xf32>
    %43 = arith.addf %41, %42 : vector<2x256xf32>
    %44 = math.tanh %43 : vector<2x256xf32>
    %c0_20 = arith.constant 0 : index
    %c0_21 = arith.constant 0 : index
    %45 = vector.load %arg6[%c0_20, %c0_21] : memref<2x256xf32, #tpu.memory_space<vmem>>, vector<2x256xf32>
    tpu.vector_store %arg6[%c0_20, %c0_21], %44 {strides = array<i32>} : memref<2x256xf32, #tpu.memory_space<vmem>>, vector<2x256xf32>,
    return
  }
}

</mosaic_0001>

<bundles_post_ra>
// kernel: inr_forward.1
= control target key start
LH: loop header
LB: loop body
LE: loop exit
PB: predicated region body
PF: predicated region fallthrough
CT: control target
= control target key end

     0   :  { %v4719_v2 = vmov 1   ;;  %s7102_s0 = inlined_call_operand.vmem [shape: f32[2,256], index: 0, kind: input, shape index: {}]   ;;  %s7103_s1 = inlined_call_operand.vmem [shape: f32[33,2], index: 1, kind: input, shape index: {}]   ;;  %s7104_s2 = inlined_call_operand.vmem [shape: f32[33,256], index: 2, kind: input, shape index: {}]   ;;  %s7105_s3 = inlined_call_operand.vmem [shape: f32[96,33], index: 3, kind: input, shape index: {}]   ;;  %s7106_s4 = inlined_call_operand.vmem [shape: f32[66,32], index: 4, kind: input, shape index: {}]   ;;  %s7107_s5 = inlined_call_operand.vmem [shape: f32[66,256], index: 5, kind: input, shape index: {}]   ;;  %s7108_s6 = inlined_call_operand.hbm [shape: f32[2,256], index: 6, kind: output, shape index: {}]  }
   0x1   :  { %v29_v0 = vld [vmem:[%s7103_s1 + $0x20] sm:$0x1]  ;;  %v28_v1 = vld [vmem:[%s7103_s1 + $0x18] sm:$0xff]  ;;  %4569 = vset.pattern.permute.xlu1 %v4719_v2  ;;  %4567 = vset.pattern.permute.xlu0 %v4719_v2 }
   0x2   :  { %101 = vperm.xlu0 %4567, %v29_v0   ;;  %97 = vperm.xlu1 %4569, %v28_v1  }
   0x3   :  { %11 = vsyncpa [#allocation3], 0  ;;  %v4720_v3 = vmov 0   ;;  %v27_v4 = vld [vmem:[%s7103_s1 + $0x10] sm:$0xff]  ;;  %v26_v5 = vld [vmem:[%s7103_s1 + $0x8] sm:$0xff]  ;;  %v56_v7 = vlaneseq }
   0x4   :  { %v25_v6 = vld [vmem:[%s7103_s1] sm:$0xff]  ;;  %v141_v23 = vld [vmem:[%s7104_s2 + $0x48] sm:$0x1]  ;;  %v138_v29 = vld [vmem:[%s7104_s2 + $0x30] sm:$0xff] }
   0x5   :  { %v57_v8 = vshrl.u32 %v56_v7, 7  ;;  %v24_v11 = vld [vmem:[%s7102_s0] sm:$0xf]  ;;  %v139_v39 = vld [vmem:[%s7104_s2 + $0x38] sm:$0xff] }
   0x6   :  { %4568 = vset.pattern.permute.xlu0 %v4720_v3  ;;  %4570 = vset.pattern.permute.xlu1 %v4720_v3  ;;  %v140_v22 = vld [vmem:[%s7104_s2 + $0x40] sm:$0x1] }
   0x7   :  { %52 = vperm.xlu0 %4568, %v29_v0   ;;  %47 = vperm.xlu1 %4570, %v28_v1   ;;  %v106_v9 = vsub.s32 1, %v57_v8  ;;  %v110_v10 = vsub.s32 3, %v57_v8  ;;  %v58_v13 = vsub.s32 0, %v57_v8  ;;  %v62_v14 = vsub.s32 2, %v57_v8 }
   0x9   :  { %v107_v12 = vrot.slane %v24_v11, %v106_v9  ;;  %v111_v15 = vrot.slane %v24_v11, %v110_v10  ;;  %v59_v17 = vrot.slane %v24_v11, %v58_v13  ;;  %v63_v18 = vrot.slane %v24_v11, %v62_v14 }
   0xa   :  { %v7127_v14 = vmov 683565275  }
   0xb   :  { %4571 = vset.pattern.permute.xlu1 %v4719_v2  ;;  %42 = vperm.xlu0 %4568, %v27_v4   ;;  %v4782_v16 = vrot.slane %v107_v12, %v106_v9  ;;  %v4784_v19 = vrot.slane %v111_v15, %v106_v9  ;;  %v4795_v27 = vrot.slane %v59_v17, %v58_v13  ;;  %v7117_v17 = vmov 2475754826  }
   0xc   :  { %93 = vperm.xlu1 %4571, %v27_v4   ;;  %v4797_v28 = vrot.slane %v63_v18, %v58_v13 }
   0xf   :  { %37 = vperm.xlu0 %4568, %v26_v5  }
  0x10   :  { %89 = vperm.xlu1 %4571, %v26_v5  }
  0x13   :  { %32 = vperm.xlu0 %4568, %v25_v6  }
  0x14   :  { %85 = vperm.xlu1 %4571, %v25_v6  }
  0x17   :  { %4572 = vset.pattern.permute.xlu0 %v4719_v2 }
  0x7d   :  { %v98_v20 = vpop.permute.xlu1 %97  ;;  %v102_v21 = vpop.permute.xlu0 %101 }
  0x7e   :  { %v130_v24 = vmul.f32 %v4782_v16, %v102_v21  ;;  %v131_v25 = vmul.f32 %v4784_v19, %v102_v21  ;;  %v128_v26 = vmul.f32 %v4782_v16, %v98_v20  ;;  %v129_v38 = vmul.f32 %v4784_v19, %v98_v20 }
  0x7f   :  { %v7115_v21 = vmov 2131351028  }
  0x80   :  { %v150_v30 = vadd.f32 %v140_v22, %v130_v24  ;;  %v151_v31 = vadd.f32 %v141_v23, %v131_v25  ;;  %v148_v34 = vadd.f32 %v138_v29, %v128_v26  ;;  %v149_v47 = vadd.f32 %v139_v39, %v129_v38 }
  0x81   :  { %v7111_v23 = vmov 2102212464   ;;  %v7131_v25 = vmov 920167782  }
  0x82   :  { %v53_v32 = vpop.permute.xlu0 %52  ;;  %v48_v33 = vpop.permute.xlu1 %47 }
  0x83   :  { %v82_v35 = vmul.f32 %v4795_v27, %v53_v32  ;;  %v83_v36 = vmul.f32 %v4797_v28, %v53_v32  ;;  %v80_v37 = vmul.f32 %v4795_v27, %v48_v33  ;;  %v81_v43 = vmul.f32 %v4797_v28, %v48_v33 }
  0x85   :  { %v4809_v40 = vadd.f32 %v150_v30, %v82_v35  ;;  %v4811_v41 = vadd.f32 %v151_v31, %v83_v36  ;;  %v4813_v42 = vadd.f32 %v148_v34, %v80_v37  ;;  %v4825_v54 = vadd.f32 %v149_v47, %v81_v43 }
  0x86   :  { %v7123_v34 = vmov 1326507024  }
  0x87   :  { %v994_v44 = vand.u32 2147483647, %v4809_v40  ;;  %v997_v45 = vand.u32 2139095040, %v4809_v40  ;;  %v1098_v46 = vand.u32 2147483647, %v4811_v41  ;;  %v1101_v48 = vand.u32 2139095040, %v4811_v41 }
  0x88   :  { %v789_v51 = vand.u32 2139095040, %v4813_v42  ;;  %v786_v55 = vand.u32 2147483647, %v4813_v42  ;;  %v893_v1 = vand.u32 2139095040, %v4825_v54 }
  0x89   :  { %v998_v49 = vshrl.u32 %v997_v45, 23  ;;  %v1001_v50 = vand.u32 8388607, %v994_v44  ;;  %v1102_v52 = vshrl.u32 %v1101_v48, 23  ;;  %v1105_v53 = vand.u32 8388607, %v1098_v46 }
  0x8a   :  { %v790_v57 = vshrl.u32 %v789_v51, 23  ;;  %v4830_v0 = vand.u32 8388607, %v786_v55  ;;  %v4840_v12 = vshrl.u32 %v893_v1, 23 }
  0x8b   :  { %v4508_v56 = vadd.s32 4294967169, %v998_v49  ;;  %v1002_v58 = vor.u32 8388608, %v1001_v50  ;;  %v4512_v59 = vadd.s32 4294967169, %v1102_v52  ;;  %v1106_v60 = vor.u32 8388608, %v1105_v53 }
  0x8c   :  { %v4500_v62 = vadd.s32 4294967169, %v790_v57  ;;  %v794_v11 = vor.u32 8388608, %v4830_v0 }
  0x8d   :  { %v1004_v61 = vadd.s32 1, %v4508_v56  ;;  %v1108_v63 = vadd.s32 1, %v4512_v59  ;;  %v4833_v4 = vshll.u32 %v1002_v58, 8  ;;  %v4835_v5 = vshll.u32 %v1106_v60, 8 }
  0x8e   :  { %v796_v2 = vadd.s32 1, %v4500_v62 }
  0x8f   :  { %vm1005_vm0 = vcmp.gt.s32.totalorder %v1004_v61, 0  ;;  %vm1109_vm1 = vcmp.gt.s32.totalorder %v1108_v63, 0 }
  0x90   :  { %v1006_v3 = vsel %vm1005_vm0, %v1004_v61, 0  ;;  %v1110_v8 = vsel %vm1109_vm1, %v1108_v63, 0  ;;  %vm797_vm2 = vcmp.gt.s32.totalorder %v796_v2, 0 }
  0x91   :  { %v1007_v6 = vshrl.u32 %v1006_v3, 5  ;;  %v1008_v7 = vand.u32 31, %v1006_v3  ;;  %v4837_v9 = vshrl.u32 %v1110_v8, 5  ;;  %v1112_v10 = vand.u32 31, %v1110_v8 }
  0x92   :  { %v4844_v20 = vsel %vm797_vm2, %v796_v2, 0 }
  0x93   :  { %v1009_v13 = vsub.s32 32, %v1008_v7  ;;  %v1011_v15 = vshll.u32 %v7127_v14, %v1008_v7  ;;  %v1014_v18 = vshll.u32 %v7117_v17, %v1008_v7  ;;  %v1017_v22 = vshll.u32 %v7115_v21, %v1008_v7 }
  0x94   :  { %v1020_v24 = vshll.u32 %v7111_v23, %v1008_v7  ;;  %v1023_v26 = vshll.u32 %v7131_v25, %v1008_v7  ;;  %vm1026_vm3 = vcmp.lt.s32.totalorder %v1007_v6, 1  ;;  %vm1027_vm4 = vcmp.lt.s32.totalorder %v1007_v6, 2 }
  0x95   :  { %v1012_v29 = vshrl.u32 %v7117_v17, %v1009_v13  ;;  %v1015_v30 = vshrl.u32 %v7115_v21, %v1009_v13  ;;  %v1018_v31 = vshrl.u32 %v7111_v23, %v1009_v13  ;;  %v1010_v32 = vshrl.u32 %v7127_v14, %v1009_v13 }
  0x96   :  { %v1021_v33 = vshrl.u32 %v7131_v25, %v1009_v13  ;;  %v1024_v35 = vshrl.u32 %v7123_v34, %v1009_v13  ;;  %vm1028_vm5 = vcmp.lt.s32.totalorder %v1007_v6, 3  ;;  %v1113_v39 = vsub.s32 32, %v1112_v10 }
  0x97   :  { %v1013_v36 = vor.u32 %v1012_v29, %v1011_v15  ;;  %v1016_v37 = vor.u32 %v1015_v30, %v1014_v18  ;;  %v1019_v38 = vor.u32 %v1018_v31, %v1017_v22  ;;  %vm1029_vm6 = vcmp.lt.s32.totalorder %v1007_v6, 4 }
  0x98   :  { %v1022_v43 = vor.u32 %v1021_v33, %v1020_v24  ;;  %v1025_v45 = vor.u32 %v1024_v35, %v1023_v26  ;;  %v1115_v47 = vshll.u32 %v7127_v14, %v1112_v10  ;;  %v1118_v57 = vshll.u32 %v7117_v17, %v1112_v10 }
  0x99   :  { %v1030_v48 = vsel %vm1026_vm3, %v1010_v32, %v1013_v36  ;;  %v1031_v49 = vsel %vm1029_vm6, %v1019_v38, 2102212464  ;;  %v1034_v50 = vsel %vm1026_vm3, %v1013_v36, %v1016_v37  ;;  %v1038_v51 = vsel %vm1026_vm3, %v1016_v37, %v1019_v38 }
  0x9a   :  { %v1032_v52 = vsel %vm1028_vm5, %v1016_v37, %v1031_v49  ;;  %v1035_v53 = vsel %vm1029_vm6, %v1022_v43, 920167782  ;;  %v1039_v56 = vsel %vm1029_vm6, %v1025_v45, 1326507024  ;;  %v1114_v60 = vshrl.u32 %v7127_v14, %v1113_v39 }
  0x9b   :  { %v1036_v58 = vsel %vm1028_vm5, %v1019_v38, %v1035_v53  ;;  %v1040_v59 = vsel %vm1028_vm5, %v1022_v43, %v1039_v56  ;;  %v1116_v61 = vshrl.u32 %v7117_v17, %v1113_v39  ;;  %v1033_v62 = vsel %vm1027_vm4, %v1030_v48, %v1032_v52 }
  0x9c   :  { %v1037_v63 = vsel %vm1027_vm4, %v1034_v50, %v1036_v58  ;;  %v1041_v1 = vsel %vm1027_vm4, %v1038_v51, %v1040_v59  ;;  %v1119_v2 = vshrl.u32 %v7115_v21, %v1113_v39  ;;  %v1121_v22 = vshll.u32 %v7115_v21, %v1112_v10 }
  0x9d   :  { %v4870_v3 = vmul.u32.u64.low %v4833_v4, %v1041_v1  ;;  %v4871_v7 = vmul.u32.u64.high %v4833_v4, %v1041_v1, %v4870_v3  ;;  %v4874_v8 = vmul.u32.u64.low %v4833_v4, %v1037_v63  ;;  %v4875_v13 = vmul.u32.u64.high %v4833_v4, %v1037_v63, %v4874_v8 }
  0x9e   :  { %v1117_v15 = vor.u32 %v1116_v61, %v1115_v47  ;;  %v1120_v18 = vor.u32 %v1119_v2, %v1118_v57  ;;  %v1122_v24 = vshrl.u32 %v7111_v23, %v1113_v39  ;;  %v1049_v6 = vmul.u32 %v4833_v4, %v1033_v62 }
  0x9f   :  { %v1124_v26 = vshll.u32 %v7111_v23, %v1112_v10  ;;  %v1125_v29 = vshrl.u32 %v7131_v25, %v1113_v39  ;;  %v1128_v30 = vshrl.u32 %v7123_v34, %v1113_v39  ;;  %v1127_v32 = vshll.u32 %v7131_v25, %v1112_v10 }
  0xa0   :  { %v1123_v31 = vor.u32 %v1122_v24, %v1121_v22  ;;  %vm1130_vm7 = vcmp.lt.s32.totalorder %v4837_v9, 1  ;;  %vm1131_vm8 = vcmp.lt.s32.totalorder %v4837_v9, 2  ;;  %vm1051_vm9 = vc.u32 %v4871_v7, %v4874_v8 }
  0xa1   :  { %v1052_v33 = vadd.s32 1, %v4875_v13  ;;  %v1126_v35 = vor.u32 %v1125_v29, %v1124_v26  ;;  %vm1132_vm10 = vcmp.lt.s32.totalorder %v4837_v9, 3  ;;  %v1129_v4 = vor.u32 %v1128_v30, %v1127_v32 }
  0xa2   :  { %vm1133_vm11 = vcmp.lt.s32.totalorder %v4837_v9, 4  ;;  %v1134_v36 = vsel %vm1130_vm7, %v1114_v60, %v1117_v15  ;;  %v1138_v37 = vsel %vm1130_vm7, %v1117_v15, %v1120_v18  ;;  %v1142_v43 = vsel %vm1130_vm7, %v1120_v18, %v1123_v31 }
  0xa3   :  { %v1053_v38 = vsel %vm1051_vm9, %v1052_v33, %v4875_v13  ;;  %v1135_v10 = vsel %vm1133_vm11, %v1123_v31, 2102212464  ;;  %v1139_v39 = vsel %vm1133_vm11, %v1126_v35, 920167782  ;;  %v1143_v49 = vsel %vm1133_vm11, %v1129_v4, 1326507024 }
  0xa4   :  { %v1054_v45 = vadd.s32 %v1053_v38, %v1049_v6  ;;  %v1136_v47 = vsel %vm1132_vm10, %v1120_v18, %v1135_v10  ;;  %v1140_v48 = vsel %vm1132_vm10, %v1123_v31, %v1139_v39  ;;  %v1144_v52 = vsel %vm1132_vm10, %v1126_v35, %v1143_v49 }
  0xa5   :  { %v1137_v50 = vsel %vm1131_vm8, %v1134_v36, %v1136_v47  ;;  %v1141_v51 = vsel %vm1131_vm8, %v1138_v37, %v1140_v48  ;;  %v4898_v53 = vshrl.u32 %v4844_v20, 5  ;;  %v1145_v57 = vsel %vm1131_vm8, %v1142_v43, %v1144_v52 }
  0xa6   :  { %v1055_v56 = vadd.s32 536870912, %v1054_v45  ;;  %v4903_v58 = vmul.u32.u64.low %v4835_v5, %v1141_v51  ;;  %v4904_v59 = vmul.u32.u64.high %v4835_v5, %v1141_v51, %v4903_v58  ;;  %v800_v62 = vand.u32 31, %v4844_v20 }
  0xa7   :  { %v4908_v60 = vmul.u32.u64.low %v4835_v5, %v1145_v57  ;;  %v4909_v61 = vmul.u32.u64.high %v4835_v5, %v1145_v57, %v4908_v60  ;;  %v4916_v1 = vshll.u32 %v794_v11, 8  ;;  %v890_v9 = vand.u32 2147483647, %v4825_v54 }
  0xa8   :  { %v4912_v63 = vshrl.u32 %v1055_v56, 30  ;;  %v1153_v2 = vmul.u32 %v4835_v5, %v1137_v50  ;;  %v801_v3 = vsub.s32 32, %v800_v62  ;;  %vm818_vm12 = vcmp.lt.s32.totalorder %v4898_v53, 1 }
  0xa9   :  { %v4504_v13 = vadd.s32 4294967169, %v4840_v12  ;;  %v1156_v18 = vadd.s32 1, %v4904_v59  ;;  %v803_v20 = vshll.u32 %v7127_v14, %v800_v62  ;;  %vm819_vm13 = vcmp.lt.s32.totalorder %v4898_v53, 2 }
  0xaa   :  { %v1057_v15 = vshll.u32 %v4912_v63, 30  ;;  %vm1155_vm14 = vc.u32 %v4909_v61, %v4903_v58  ;;  %v804_v0 = vshrl.u32 %v7117_v17, %v801_v3  ;;  %v806_v5 = vshll.u32 %v7117_v17, %v800_v62 }
  0xab   :  { %v809_v11 = vshll.u32 %v7115_v21, %v800_v62  ;;  %v1157_v12 = vsel %vm1155_vm14, %v1156_v18, %v4904_v59  ;;  %v807_v24 = vshrl.u32 %v7115_v21, %v801_v3  ;;  %v812_v6 = vshll.u32 %v7111_v23, %v800_v62 }
  0xac   :  { %v4931_v22 = vsub.s32 %v1054_v45, %v1057_v15  ;;  %v1158_v26 = vadd.s32 %v1157_v12, %v1153_v2  ;;  %v805_v29 = vor.u32 %v804_v0, %v803_v20  ;;  %v810_v30 = vshrl.u32 %v7111_v23, %v801_v3 }
  0xad   :  { %v813_v31 = vshrl.u32 %v7131_v25, %v801_v3  ;;  %v808_v33 = vor.u32 %v807_v24, %v806_v5  ;;  %v815_v35 = vshll.u32 %v7131_v25, %v800_v62  ;;  %v816_v4 = vshrl.u32 %v7123_v34, %v801_v3 }
  0xae   :  { %v1060_v32 = vsub.s32 0, %v4931_v22  ;;  %v1159_v36 = vadd.s32 536870912, %v1158_v26  ;;  %v811_v37 = vor.u32 %v810_v30, %v809_v11  ;;  %vm820_vm15 = vcmp.lt.s32.totalorder %v4898_v53, 3 }
  0xaf   :  { %v814_v38 = vor.u32 %v813_v31, %v812_v6  ;;  %v817_v39 = vor.u32 %v816_v4, %v815_v35  ;;  %vm821_vm0 = vcmp.lt.s32.totalorder %v4898_v53, 4  ;;  %v826_v43 = vsel %vm818_vm12, %v805_v29, %v808_v33  ;;  %v4987_v53 = vpop.permute.xlu0 %42 }
  0xb0   :  { %v4509_v10 = vmin.u32 %v1060_v32, %v4931_v22  ;;  %v4946_v45 = vshrl.u32 %v1159_v36, 30  ;;  %v802_v47 = vshrl.u32 %v7127_v14, %v801_v3  ;;  %v823_v48 = vsel %vm821_vm0, %v811_v37, 2102212464 }
  0xb1   :  { %v827_v49 = vsel %vm821_vm0, %v814_v38, 920167782  ;;  %v830_v52 = vsel %vm818_vm12, %v808_v33, %v811_v37  ;;  %v831_v56 = vsel %vm821_vm0, %v817_v39, 1326507024  ;;  %v824_v60 = vsel %vm820_vm15, %v808_v33, %v823_v48 }
  0xb2   :  { %v1062_v50 = vclz %v4509_v10  ;;  %v828_v51 = vsel %vm820_vm15, %v811_v37, %v827_v49  ;;  %v1161_v57 = vshll.u32 %v4946_v45, 30  ;;  %v822_v59 = vsel %vm818_vm12, %v802_v47, %v805_v29 }
  0xb3   :  { %v829_v62 = vsel %vm819_vm13, %v826_v43, %v828_v51  ;;  %v832_v3 = vsel %vm820_vm15, %v814_v38, %v831_v56  ;;  %v897_v12 = vand.u32 8388607, %v890_v9  ;;  %v825_v29 = vsel %vm819_vm13, %v822_v59, %v824_v60 }
  0xb4   :  { %v4510_v2 = vadd.s32 4294967294, %v1062_v50  ;;  %v4963_v15 = vmul.u32.u64.low %v4916_v1, %v829_v62  ;;  %v4964_v18 = vmul.u32.u64.high %v4916_v1, %v829_v62, %v4963_v15  ;;  %v4967_v20 = vsub.s32 %v1158_v26, %v1161_v57 }
  0xb5   :  { %v833_v0 = vsel %vm819_vm13, %v830_v52, %v832_v3  ;;  %v900_v30 = vadd.s32 1, %v4504_v13  ;;  %v1050_v33 = vadd.s32 %v4874_v8, %v4871_v7  ;;  %v841_v36 = vmul.u32 %v4916_v1, %v825_v29  ;;  %v94_v7 = vpop.permute.xlu1 %93 }
  0xb6   :  { %vm4511_vm1 = vcmp.lt.s32.totalorder %v4510_v2, 0  ;;  %v4972_v5 = vmul.u32.u64.low %v4916_v1, %v833_v0  ;;  %v4973_v11 = vmul.u32.u64.high %v4916_v1, %v833_v0, %v4972_v5  ;;  %v1164_v6 = vsub.s32 0, %v4967_v20 }
  0xb7   :  { %v1065_v24 = vsel %vm4511_vm1, 0, %v4510_v2  ;;  %v844_v32 = vadd.s32 1, %v4964_v18  ;;  %vm901_vm2 = vcmp.gt.s32.totalorder %v900_v30, 0  ;;  %v898_v37 = vor.u32 8388608, %v897_v12 }
  0xb8   :  { %v1066_v26 = vsub.s32 32, %v1065_v24  ;;  %v1070_v31 = vsub.s32 4294967266, %v1065_v24  ;;  %v4513_v35 = vmin.u32 %v1164_v6, %v4967_v20  ;;  %vm843_vm3 = vc.u32 %v4973_v11, %v4963_v15 }
  0xb9   :  { %v845_v38 = vsel %vm843_vm3, %v844_v32, %v4964_v18  ;;  %v902_v10 = vsel %vm901_vm2, %v900_v30, 0  ;;  %v1154_v8 = vadd.s32 %v4903_v58, %v4909_v61  ;;  %v4994_v1 = vmul.f32 %v4795_v27, %v4987_v53 }
  0xba   :  { %v1071_v4 = vadd.s32 127, %v1070_v31  ;;  %v1166_v13 = vclz %v4513_v35  ;;  %v1068_v39 = vshrl.u32 %v1050_v33, %v1066_v26  ;;  %v846_v47 = vadd.s32 %v845_v38, %v841_v36  ;;  %v136_v36 = vld [vmem:[%s7104_s2 + $0x20] sm:$0xff] }
  0xbb   :  { %v904_v49 = vand.u32 31, %v902_v10  ;;  %v1067_v50 = vshll.u32 %v4931_v22, %v1065_v24  ;;  %v4997_v56 = vshll.u32 %v898_v37, 8  ;;  %v126_v59 = vmul.f32 %v4782_v16, %v94_v7 }
  0xbc   :  { %v1072_v43 = vshll.u32 %v1071_v4, 23  ;;  %v4514_v48 = vadd.s32 4294967294, %v1166_v13  ;;  %v847_v52 = vadd.s32 536870912, %v846_v47  ;;  %v127_v60 = vmul.f32 %v4784_v19, %v94_v7 }
  0xbd   :  { %v905_v57 = vsub.s32 32, %v904_v49  ;;  %v1069_v62 = vor.u32 %v1068_v39, %v1067_v50  ;;  %v5003_v2 = vshrl.u32 %v902_v10, 5  ;;  %v907_v22 = vshll.u32 %v7127_v14, %v904_v49  ;;  %v137_v10 = vld [vmem:[%s7104_s2 + $0x28] sm:$0xff] }
  0xbe   :  { %v1073_v51 = vor.u32 4788187, %v1072_v43  ;;  %vm4515_vm4 = vcmp.lt.s32.totalorder %v4514_v48, 0  ;;  %v5001_v61 = vshrl.u32 %v847_v52, 30  ;;  %v910_v0 = vshll.u32 %v7117_v17, %v904_v49 }
  0xbf   :  { %v1169_v58 = vsel %vm4515_vm4, 0, %v4514_v48  ;;  %v908_v24 = vshrl.u32 %v7117_v17, %v905_v57  ;;  %v911_v6 = vshrl.u32 %v7115_v21, %v905_v57  ;;  %v914_v31 = vshrl.u32 %v7111_v23, %v905_v57 }
  0xc0   :  { %v1170_v3 = vsub.s32 32, %v1169_v58  ;;  %v1174_v18 = vsub.s32 4294967266, %v1169_v58  ;;  %v1074_v5 = vand.u32 2147483647, %v1073_v51  ;;  %v849_v12 = vshll.u32 %v5001_v61, 30 }
  0xc1   :  { %v1171_v29 = vshll.u32 %v4967_v20, %v1169_v58  ;;  %v909_v33 = vor.u32 %v908_v24, %v907_v22  ;;  %v913_v35 = vshll.u32 %v7115_v21, %v904_v49  ;;  %v916_v4 = vshll.u32 %v7111_v23, %v904_v49 }
  0xc2   :  { %v1172_v30 = vshrl.u32 %v1154_v8, %v1170_v3  ;;  %v1175_v26 = vadd.s32 127, %v1174_v18  ;;  %v5012_v32 = vsub.s32 %v846_v47, %v849_v12  ;;  %v912_v38 = vor.u32 %v911_v6, %v910_v0 }
  0xc3   :  { %v917_v20 = vshrl.u32 %v7131_v25, %v905_v57  ;;  %v915_v43 = vor.u32 %v914_v31, %v913_v35  ;;  %v919_v47 = vshll.u32 %v7131_v25, %v904_v49  ;;  %v920_v7 = vshrl.u32 %v7123_v34, %v905_v57 }
  0xc4   :  { %v1173_v37 = vor.u32 %v1172_v30, %v1171_v29  ;;  %v1176_v13 = vshll.u32 %v1175_v26, 23  ;;  %v852_v39 = vsub.s32 0, %v5012_v32  ;;  %v1076_v8 = vcvt.s32.f32 %v1069_v62 }
  0xc5   :  { %v918_v50 = vor.u32 %v917_v20, %v916_v4  ;;  %v146_v51 = vadd.f32 %v136_v36, %v126_v59  ;;  %v921_v58 = vor.u32 %v920_v7, %v919_v47  ;;  %vm922_vm5 = vcmp.lt.s32.totalorder %v5003_v2, 1 }
  0xc6   :  { %v1177_v48 = vor.u32 4788187, %v1176_v13  ;;  %v4501_v52 = vmin.u32 %v852_v39, %v5012_v32  ;;  %v147_v3 = vadd.f32 %v137_v10, %v127_v60  ;;  %v1077_v18 = vmul.f32 %v1076_v8, %v1074_v5 }
  0xc7   :  { %v906_v0 = vshrl.u32 %v7127_v14, %v905_v57  ;;  %vm925_vm6 = vcmp.lt.s32.totalorder %v5003_v2, 4  ;;  %v1180_v12 = vcvt.s32.f32 %v1173_v37  ;;  %v930_v6 = vsel %vm922_vm5, %v909_v33, %v912_v38 }
  0xc8   :  { %v1178_v22 = vand.u32 2147483647, %v1177_v48  ;;  %v854_v49 = vclz %v4501_v52  ;;  %v927_v24 = vsel %vm925_vm6, %v915_v43, 2102212464  ;;  %vm923_vm7 = vcmp.lt.s32.totalorder %v5003_v2, 2 }
  0xc9   :  { %vm924_vm8 = vcmp.lt.s32.totalorder %v5003_v2, 3  ;;  %v931_v59 = vsel %vm925_vm6, %v918_v50, 920167782  ;;  %v934_v62 = vsel %vm922_vm5, %v912_v38, %v915_v43  ;;  %v926_v30 = vsel %vm922_vm5, %v906_v0, %v909_v33 }
  0xca   :  { %v4502_v29 = vadd.s32 4294967294, %v854_v49  ;;  %v932_v26 = vsel %vm924_vm8, %v915_v43, %v931_v59  ;;  %v935_v60 = vsel %vm925_vm6, %v921_v58, 1326507024  ;;  %v1181_v5 = vmul.f32 %v1180_v12, %v1178_v22 }
  0xcb   :  { %v928_v31 = vsel %vm924_vm8, %v912_v38, %v927_v24  ;;  %v933_v57 = vsel %vm923_vm7, %v930_v6, %v932_v26  ;;  %v936_v35 = vsel %vm924_vm8, %v918_v50, %v935_v60  ;;  %v1078_v13 = vxor.u32 2147483648, %v1077_v18 }
  0xcc   :  { %vm4503_vm9 = vcmp.lt.s32.totalorder %v4502_v29, 0  ;;  %v937_v4 = vsel %vm923_vm7, %v934_v62, %v936_v35  ;;  %v5037_v36 = vmul.u32.u64.low %v4997_v56, %v933_v57  ;;  %v5038_v37 = vmul.u32.u64.high %v4997_v56, %v933_v57, %v5037_v36  ;;  %v38_v57 = vpop.permute.xlu0 %37 }
  0xcd   :  { %v857_v20 = vsel %vm4503_vm9, 0, %v4502_v29  ;;  %v5041_v33 = vmul.u32.u64.low %v4997_v56, %v937_v4  ;;  %v5042_v10 = vmul.u32.u64.high %v4997_v56, %v937_v4, %v5041_v33  ;;  %vm996_vm10 = vcmp.lt.s32.totalorder %v4809_v40, 0 }
  0xce   :  { %v862_v38 = vsub.s32 4294967266, %v857_v20  ;;  %v929_v39 = vsel %vm923_vm7, %v926_v30, %v928_v31  ;;  %v79_v43 = vmul.f32 %v4797_v28, %v4987_v53  ;;  %vm1100_vm11 = vcmp.lt.s32.totalorder %v4811_v41, 0 }
  0xcf   :  { %v1182_v47 = vxor.u32 2147483648, %v1181_v5  ;;  %v858_v7 = vsub.s32 32, %v857_v20  ;;  %v5051_v8 = vadd.f32 %v146_v51, %v4994_v1  ;;  %v842_v48 = vadd.s32 %v4963_v15, %v4973_v11 }
  0xd0   :  { %v863_v50 = vadd.s32 127, %v862_v38  ;;  %v948_v52 = vadd.s32 1, %v5038_v37  ;;  %v5056_v58 = vadd.f32 %v147_v3, %v79_v43  ;;  %v1079_v2 = vsel %vm996_vm10, %v1078_v13, %v1077_v18 }
  0xd1   :  { %v945_v53 = vmul.u32 %v4997_v56, %v929_v39  ;;  %vm947_vm12 = vc.u32 %v5042_v10, %v5037_v36  ;;  %v7109_v22 = vand.u32 2147483647, %v5051_v8  ;;  %vm5065_vm13 = vcmp.le.f32.partialorder %v994_v44, 0.7853982 }
  0xd2   :  { %v864_v15 = vshll.u32 %v863_v50, 23  ;;  %v949_v11 = vsel %vm947_vm12, %v948_v52, %v5038_v37  ;;  %v581_v51 = vand.u32 2139095040, %v5051_v8  ;;  %v1080_v3 = vsub.s32 4, %v4912_v63 }
  0xd3   :  { %v1183_v56 = vsel %vm1100_vm11, %v1182_v47, %v1181_v5  ;;  %v860_v18 = vshrl.u32 %v842_v48, %v858_v7  ;;  %v950_v0 = vadd.s32 %v949_v11, %v945_v53  ;;  %v1082_v12 = vsel %vm5065_vm13, %v4809_v40, %v1079_v2 }
  0xd4   :  { %vm5079_vm14 = vcmp.le.f32.partialorder %v1098_v46, 0.7853982  ;;  %v582_v49 = vshrl.u32 %v581_v51, 23  ;;  %v685_v24 = vand.u32 2139095040, %v5056_v58  ;;  %v859_v6 = vshll.u32 %v5012_v32, %v857_v20 }
  0xd5   :  { %v951_v59 = vadd.s32 536870912, %v950_v0  ;;  %v585_v62 = vand.u32 8388607, %v7109_v22  ;;  %v7110_v29 = vand.u32 2147483647, %v5056_v58  ;;  %v5091_v30 = vsel %vm5079_vm14, %v4811_v41, %v1183_v56  ;;  %v135_v22 = vld [vmem:[%s7104_s2 + $0x18] sm:$0xff] }
  0xd6   :  { %v865_v46 = vor.u32 4788187, %v864_v15  ;;  %v4492_v26 = vadd.s32 4294967169, %v582_v49  ;;  %v686_v60 = vshrl.u32 %v685_v24, 23  ;;  %v5096_v5 = vsel %vm996_vm10, %v1080_v3, %v4912_v63  ;;  %v90_v63 = vpop.permute.xlu1 %89 }
  0xd7   :  { %4573 = vcosq.f32 %v1082_v12  ;;  %v861_v32 = vor.u32 %v860_v18, %v859_v6  ;;  %v5098_v31 = vshrl.u32 %v951_v59, 30  ;;  %v1184_v35 = vsub.s32 4, %v4946_v45 }
  0xd8   :  { %4575 = vsinq.f32 %v1082_v12  ;;  %v588_v4 = vadd.s32 1, %v4492_v26  ;;  %v4496_v37 = vadd.s32 4294967169, %v686_v60  ;;  %v586_v20 = vor.u32 8388608, %v585_v62 }
  0xd9   :  { %4577 = vcosq.f32 %v5091_v30  ;;  %v953_v13 = vshll.u32 %v5098_v31, 30  ;;  %v5105_v33 = vand.u32 8388607, %v7110_v29  ;;  %v866_v38 = vand.u32 2147483647, %v865_v46 }
  0xda   :  { %vm589_vm15 = vcmp.gt.s32.totalorder %v588_v4, 0  ;;  %v692_v39 = vadd.s32 1, %v4496_v37  ;;  %v5108_v43 = vmul.f32 %v4795_v27, %v38_v57  ;;  %v868_v47 = vcvt.s32.f32 %v861_v32 }
  0xdb   :  { %v946_v7 = vadd.s32 %v5037_v36, %v5042_v10  ;;  %v5111_v48 = vsub.s32 %v950_v0, %v953_v13  ;;  %v590_v50 = vsel %vm589_vm15, %v588_v4, 0  ;;  %v5114_v2 = vmul.f32 %v4797_v28, %v38_v57 }
  0xdc   :  { %v592_v52 = vand.u32 31, %v590_v50  ;;  %vm693_vm0 = vcmp.gt.s32.totalorder %v692_v39, 0  ;;  %v124_v53 = vmul.f32 %v4782_v16, %v90_v63  ;;  %v5118_v11 = vshll.u32 %v586_v20, 8 }
  0xdd   :  { %v956_v15 = vsub.s32 0, %v5111_v48  ;;  %v690_v51 = vor.u32 8388608, %v5105_v33  ;;  %v125_v3 = vmul.f32 %v4784_v19, %v90_v63  ;;  %v5122_v56 = vmul.f32 %v868_v47, %v866_v38 }
  0xde   :  { %v591_v36 = vshrl.u32 %v590_v50, 5  ;;  %v593_v10 = vsub.s32 32, %v592_v52  ;;  %v694_v18 = vsel %vm693_vm0, %v692_v39, 0  ;;  %v595_v12 = vshll.u32 %v7127_v14, %v592_v52 }
  0xdf   :  { %v4505_v0 = vmin.u32 %v956_v15, %v5111_v48  ;;  %v598_v49 = vshll.u32 %v7117_v17, %v592_v52  ;;  %v601_v24 = vshll.u32 %v7115_v21, %v592_v52  ;;  %v604_v46 = vshll.u32 %v7111_v23, %v592_v52 }
  0xe0   :  { %v596_v6 = vshrl.u32 %v7117_v17, %v593_v10  ;;  %v599_v59 = vshrl.u32 %v7115_v21, %v593_v10  ;;  %v602_v62 = vshrl.u32 %v7111_v23, %v593_v10  ;;  %v605_v60 = vshrl.u32 %v7131_v25, %v593_v10 }
  0xe1   :  { %v958_v26 = vclz %v4505_v0  ;;  %v607_v32 = vshll.u32 %v7131_v25, %v592_v52  ;;  %v608_v57 = vshrl.u32 %v7123_v34, %v593_v10  ;;  %v594_v4 = vshrl.u32 %v7127_v14, %v593_v10  ;;  %v134_v52 = vld [vmem:[%s7104_s2 + $0x10] sm:$0xff] }
  0xe2   :  { %v597_v37 = vor.u32 %v596_v6, %v595_v12  ;;  %v600_v13 = vor.u32 %v599_v59, %v598_v49  ;;  %v603_v20 = vor.u32 %v602_v62, %v601_v24  ;;  %v606_v63 = vor.u32 %v605_v60, %v604_v46 }
  0xe3   :  { %v4506_v33 = vadd.s32 4294967294, %v958_v26  ;;  %v609_v38 = vor.u32 %v608_v57, %v607_v32  ;;  %vm610_vm1 = vcmp.lt.s32.totalorder %v591_v36, 1  ;;  %vm612_vm2 = vcmp.lt.s32.totalorder %v591_v36, 3 }
  0xe4   :  { %v5136_v39 = vpop.eup %4573  ;;  %vm613_vm3 = vcmp.lt.s32.totalorder %v591_v36, 4  ;;  %v614_v47 = vsel %vm610_vm1, %v594_v4, %v597_v37  ;;  %v618_v50 = vsel %vm610_vm1, %v597_v37, %v600_v13  ;;  %v622_v12 = vsel %vm610_vm1, %v600_v13, %v603_v20 }
  0xe5   :  { %v5141_v15 = vpop.eup %4575  ;;  %vm4507_vm4 = vcmp.lt.s32.totalorder %v4506_v33, 0  ;;  %v615_v10 = vsel %vm613_vm3, %v603_v20, 2102212464  ;;  %v619_v0 = vsel %vm613_vm3, %v606_v63, 920167782  ;;  %vm611_vm5 = vcmp.lt.s32.totalorder %v591_v36, 2 }
  0xe6   :  { %v5143_v49 = vpop.eup %4577  ;;  %v961_v24 = vsel %vm4507_vm4, 0, %v4506_v33  ;;  %v616_v6 = vsel %vm612_vm2, %v600_v13, %v615_v10  ;;  %v620_v59 = vsel %vm612_vm2, %v603_v20, %v619_v0  ;;  %v623_v62 = vsel %vm613_vm3, %v609_v38, 1326507024 }
  0xe7   :  { %v962_v46 = vsub.s32 32, %v961_v24  ;;  %v966_v26 = vsub.s32 4294967266, %v961_v24  ;;  %v144_v60 = vadd.f32 %v134_v52, %v124_v53  ;;  %v963_v32 = vshll.u32 %v5111_v48, %v961_v24 }
  0xe8   :  { %v617_v57 = vsel %vm611_vm5, %v614_v47, %v616_v6  ;;  %v621_v4 = vsel %vm611_vm5, %v618_v50, %v620_v59  ;;  %v624_v37 = vsel %vm612_vm2, %v606_v63, %v623_v62  ;;  %v696_v10 = vand.u32 31, %v694_v18 }
  0xe9   :  { %v964_v33 = vshrl.u32 %v946_v7, %v962_v46  ;;  %v967_v29 = vadd.s32 127, %v966_v26  ;;  %v625_v13 = vsel %vm611_vm5, %v622_v12, %v624_v37  ;;  %v5161_v63 = vshll.u32 %v690_v51, 8 }
  0xea   :  { %v5153_v20 = vmul.u32.u64.low %v5118_v11, %v625_v13  ;;  %v5154_v38 = vmul.u32.u64.high %v5118_v11, %v625_v13, %v5153_v20  ;;  %v5157_v53 = vmul.u32.u64.low %v5118_v11, %v621_v4  ;;  %v5158_v52 = vmul.u32.u64.high %v5118_v11, %v621_v4, %v5157_v53 }
  0xeb   :  { %v968_v48 = vshll.u32 %v967_v29, 23  ;;  %v697_v36 = vsub.s32 32, %v696_v10  ;;  %v145_v47 = vadd.f32 %v135_v22, %v125_v3  ;;  %v965_v50 = vor.u32 %v964_v33, %v963_v32 }
  0xec   :  { %v633_v7 = vmul.u32 %v5118_v11, %v617_v57  ;;  %v695_v0 = vshrl.u32 %v694_v18, 5  ;;  %v5165_v12 = vadd.f32 %v144_v60, %v5108_v43  ;;  %v699_v24 = vshll.u32 %v7127_v14, %v696_v10 }
  0xed   :  { %v700_v6 = vshrl.u32 %v7117_v17, %v697_v36  ;;  %v702_v59 = vshll.u32 %v7117_v17, %v696_v10  ;;  %v705_v62 = vshll.u32 %v7115_v21, %v696_v10  ;;  %v969_v29 = vor.u32 4788187, %v968_v48 }
  0xee   :  { %vm635_vm6 = vc.u32 %v5154_v38, %v5157_v53  ;;  %v636_v22 = vadd.s32 1, %v5158_v52  ;;  %v703_v11 = vshrl.u32 %v7115_v21, %v697_v36  ;;  %v706_v51 = vshrl.u32 %v7111_v23, %v697_v36 }
  0xef   :  { %v708_v43 = vshll.u32 %v7111_v23, %v696_v10  ;;  %v709_v3 = vshrl.u32 %v7131_v25, %v697_v36  ;;  %v711_v18 = vshll.u32 %v7131_v25, %v696_v10  ;;  %v701_v26 = vor.u32 %v700_v6, %v699_v24 }
  0xf0   :  { %v637_v46 = vsel %vm635_vm6, %v636_v22, %v5158_v52  ;;  %v704_v60 = vor.u32 %v703_v11, %v702_v59  ;;  %v712_v32 = vshrl.u32 %v7123_v34, %v697_v36  ;;  %v972_v57 = vcvt.s32.f32 %v965_v50 }
  0xf1   :  { %v638_v4 = vadd.s32 %v637_v46, %v633_v7  ;;  %v707_v37 = vor.u32 %v706_v51, %v705_v62  ;;  %v710_v33 = vor.u32 %v709_v3, %v708_v43  ;;  %vm788_vm7 = vcmp.lt.s32.totalorder %v4813_v42, 0 }
  0xf2   :  { %v970_v13 = vand.u32 2147483647, %v969_v29  ;;  %v698_v20 = vshrl.u32 %v7127_v14, %v697_v36  ;;  %v713_v48 = vor.u32 %v712_v32, %v711_v18  ;;  %vm717_vm8 = vcmp.lt.s32.totalorder %v695_v0, 4 }
  0xf3   :  { %v639_v23 = vadd.s32 536870912, %v638_v4  ;;  %vm714_vm9 = vcmp.lt.s32.totalorder %v695_v0, 1  ;;  %vm715_vm10 = vcmp.lt.s32.totalorder %v695_v0, 2  ;;  %v719_v10 = vsel %vm717_vm8, %v707_v37, 2102212464 }
  0xf4   :  { %vm716_vm12 = vcmp.lt.s32.totalorder %v695_v0, 3  ;;  %v718_v52 = vsel %vm714_vm9, %v698_v20, %v701_v26  ;;  %v722_v24 = vsel %vm714_vm9, %v701_v26, %v704_v60  ;;  %v723_v50 = vsel %vm717_vm8, %v710_v33, 920167782 }
  0xf5   :  { %v5185_v7 = vshrl.u32 %v639_v23, 30  ;;  %v720_v6 = vsel %vm716_vm12, %v704_v60, %v719_v10  ;;  %v724_v59 = vsel %vm716_vm12, %v707_v37, %v723_v50  ;;  %v726_v62 = vsel %vm714_vm9, %v704_v60, %v707_v37 }
  0xf6   :  { %vm5191_vm15 = vcmp.le.f32.partialorder %v786_v55, 0.7853982  ;;  %v870_v29 = vxor.u32 2147483648, %v5122_v56  ;;  %v725_v22 = vsel %vm715_vm10, %v722_v24, %v724_v59  ;;  %v727_v11 = vsel %vm717_vm8, %v713_v48, 1326507024  ;;  %v33_v48 = vpop.permute.xlu0 %32 }
  0xf7   :  { %7175 = vst [vmem:[#allocation5_spill] sm:$0xff] %v5185_v7  ;;  %v5199_v23 = vadd.f32 %v145_v47, %v5114_v2  ;;  %vm892_vm0 = vcmp.lt.s32.totalorder %v4825_v54, 0  ;;  %v973_v51 = vmul.f32 %v972_v57, %v970_v13  ;;  %v641_v43 = vshll.u32 %v5185_v7, 30 }
  0xf8   :  { %v728_v3 = vsel %vm716_vm12, %v710_v33, %v727_v11  ;;  %v7113_v55 = vand.u32 2147483647, %v5165_v12  ;;  %v721_v18 = vsel %vm715_vm10, %v718_v52, %v720_v6  ;;  %v373_v57 = vand.u32 2139095040, %v5165_v12 }
  0xf9   :  { %v729_v46 = vsel %vm715_vm10, %v726_v62, %v728_v3  ;;  %v5208_v26 = vmul.u32.u64.low %v5161_v63, %v725_v22  ;;  %v5209_v60 = vmul.u32.u64.high %v5161_v63, %v725_v22, %v5208_v26  ;;  %v5211_v32 = vsub.s32 %v638_v4, %v641_v43 }
  0xfa   :  { %v5214_v2 = vmul.u32.u64.low %v5161_v63, %v729_v46  ;;  %v5215_v47 = vmul.u32.u64.high %v5161_v63, %v729_v46, %v5214_v2  ;;  %v5223_v37 = vsel %vm1100_vm11, %v1184_v35, %v4946_v45  ;;  %4579 = vsinq.f32 %v5091_v30  ;;  %v86_v30 = vpop.permute.xlu1 %85 }
  0xfb   :  { %v7114_v0 = vand.u32 2147483647, %v5199_v23  ;;  %v477_v4 = vand.u32 2139095040, %v5199_v23  ;;  %v871_v33 = vsel %vm788_vm7, %v870_v29, %v5122_v56  ;;  %vm5233_vm1 = vcmp.le.f32.partialorder %v890_v9, 0.7853982 }
  0xfc   :  { %v974_v20 = vxor.u32 2147483648, %v973_v51  ;;  %v644_v45 = vsub.s32 0, %v5211_v32  ;;  %v374_v35 = vshrl.u32 %v373_v57, 23  ;;  %v737_v10 = vmul.u32 %v5161_v63, %v721_v18  ;;  %v132_v18 = vld [vmem:[%s7104_s2] sm:$0xff] }
  0xfd   :  { %v740_v52 = vadd.s32 1, %v5209_v60  ;;  %v377_v24 = vand.u32 8388607, %v7113_v55  ;;  %v478_v56 = vshrl.u32 %v477_v4, 23  ;;  %vm739_vm11 = vc.u32 %v5215_v47, %v5208_v26 }
  0xfe   :  { %v4493_v50 = vmin.u32 %v644_v45, %v5211_v32  ;;  %v4484_v9 = vadd.s32 4294967169, %v374_v35  ;;  %v481_v6 = vand.u32 8388607, %v7114_v0  ;;  %v74_v29 = vmul.f32 %v4795_v27, %v33_v48  ;;  %v133_v35 = vld [vmem:[%s7104_s2 + $0x8] sm:$0xff] }
  0xff   :  { %v741_v59 = vsel %vm739_vm11, %v740_v52, %v5209_v60  ;;  %v4488_v62 = vadd.s32 4294967169, %v478_v56  ;;  %v122_v63 = vmul.f32 %v4782_v16, %v86_v30  ;;  %v5252_v22 = vsel %vm5191_vm15, %v4813_v42, %v871_v33 }
 0x100   :  { %v646_v11 = vclz %v4493_v50  ;;  %v742_v43 = vadd.s32 %v741_v59, %v737_v10  ;;  %v380_v3 = vadd.s32 1, %v4484_v9  ;;  %v975_v46 = vsel %vm892_vm0, %v974_v20, %v973_v51 }
 0x101   :  { %v378_v60 = vor.u32 8388608, %v377_v24  ;;  %v5260_v27 = vmul.f32 %v4797_v28, %v33_v48  ;;  %v123_v16 = vmul.f32 %v4784_v19, %v86_v30  ;;  %v482_v4 = vor.u32 8388608, %v481_v6 }
 0x102   :  { %v4494_v2 = vadd.s32 4294967294, %v646_v11  ;;  %v743_v57 = vadd.s32 536870912, %v742_v43  ;;  %vm381_vm2 = vcmp.gt.s32.totalorder %v380_v3, 0  ;;  %4581 = vcosq.f32 %v5252_v22 }
 0x103   :  { %v382_v33 = vsel %vm381_vm2, %v380_v3, 0  ;;  %v484_v45 = vadd.s32 1, %v4488_v62  ;;  %v142_v10 = vadd.f32 %v132_v18, %v122_v63  ;;  %v634_v51 = vadd.s32 %v5157_v53, %v5154_v38 }
 0x104   :  { %vm4495_vm3 = vcmp.lt.s32.totalorder %v4494_v2, 0  ;;  %v5269_v28 = vshrl.u32 %v743_v57, 30  ;;  %v384_v19 = vand.u32 31, %v382_v33  ;;  %v5274_v20 = vsel %vm5233_vm1, %v4825_v54, %v975_v46 }
 0x105   :  { %v649_v48 = vsel %vm4495_vm3, 0, %v4494_v2  ;;  %v5277_v30 = vadd.s32 %v5208_v26, %v5215_v47  ;;  %v5279_v52 = vshll.u32 %v378_v60, 8  ;;  %v5282_v50 = vshll.u32 %v482_v4, 8 }
 0x106   :  { %7180 = vst [vmem:[#allocation6_spill] sm:$0xff] %v5269_v28  ;;  %v654_v24 = vsub.s32 4294967266, %v649_v48  ;;  %v745_v56 = vshll.u32 %v5269_v28, 30  ;;  %v143_v38 = vadd.f32 %v133_v35, %v123_v16  ;;  %v650_v53 = vsub.s32 32, %v649_v48 }
 0x107   :  { %v385_v9 = vsub.s32 32, %v384_v19  ;;  %vm485_vm4 = vcmp.gt.s32.totalorder %v484_v45, 0  ;;  %v5284_v6 = vadd.f32 %v142_v10, %v74_v29  ;;  %v5286_v59 = vpop.eup %4579  ;;  %v387_v26 = vshll.u32 %v7127_v14, %v384_v19 }
 0x108   :  { %v5288_v62 = vsub.s32 %v742_v43, %v745_v56  ;;  %v390_v47 = vshll.u32 %v7117_v17, %v384_v19  ;;  %v393_v63 = vshll.u32 %v7115_v21, %v384_v19  ;;  %v655_v11 = vadd.s32 127, %v654_v24 }
 0x109   :  { %v388_v3 = vshrl.u32 %v7117_v17, %v385_v9  ;;  %v391_v18 = vshrl.u32 %v7115_v21, %v385_v9  ;;  %v7181_v46 = vmov 2102212464   ;;  %v383_v16 = vshrl.u32 %v382_v33, 5 }
 0x10a   :  { %v394_v60 = vshrl.u32 %v7181_v46, %v385_v9  ;;  %v748_v29 = vsub.s32 0, %v5288_v62  ;;  %v396_v2 = vshll.u32 %v7181_v46, %v384_v19  ;;  %v397_v43 = vshrl.u32 %v7131_v25, %v385_v9 }
 0x10b   :  { %v389_v57 = vor.u32 %v388_v3, %v387_v26  ;;  %v392_v4 = vor.u32 %v391_v18, %v390_v47  ;;  %v486_v10 = vsel %vm485_vm4, %v484_v45, 0  ;;  %v651_v24 = vshll.u32 %v5211_v32, %v649_v48 }
 0x10c   :  { %v395_v35 = vor.u32 %v394_v60, %v393_v63  ;;  %v652_v56 = vshrl.u32 %v634_v51, %v650_v53  ;;  %v4497_v55 = vmin.u32 %v748_v29, %v5288_v62  ;;  %v398_v0 = vor.u32 %v397_v43, %v396_v2 }
 0x10d   :  { %v656_v21 = vshll.u32 %v655_v11, 23  ;;  %v386_v17 = vshrl.u32 %v7127_v14, %v385_v9  ;;  %v399_v33 = vshll.u32 %v7131_v25, %v384_v19  ;;  %v400_v7 = vshrl.u32 %v7123_v34, %v385_v9 }
 0x10e   :  { %v750_v28 = vclz %v4497_v55  ;;  %vm402_vm5 = vcmp.lt.s32.totalorder %v383_v16, 1  ;;  %vm404_vm6 = vcmp.lt.s32.totalorder %v383_v16, 3  ;;  %vm405_vm8 = vcmp.lt.s32.totalorder %v383_v16, 4 }
 0x10f   :  { %v401_v26 = vor.u32 %v400_v7, %v399_v33  ;;  %v407_v47 = vsel %vm405_vm8, %v395_v35, 2102212464  ;;  %v410_v45 = vsel %vm402_vm5, %v389_v57, %v392_v4  ;;  %v411_v63 = vsel %vm405_vm8, %v398_v0, 920167782  ;;  %v5305_v32 = vpop.eup %4581 }
 0x110   :  { %v4498_v51 = vadd.s32 4294967294, %v750_v28  ;;  %vm403_vm9 = vcmp.lt.s32.totalorder %v383_v16, 2  ;;  %v406_v48 = vsel %vm402_vm5, %v386_v17, %v389_v57  ;;  %v412_v53 = vsel %vm404_vm6, %v395_v35, %v411_v63 }
 0x111   :  { %v408_v11 = vsel %vm404_vm6, %v392_v4, %v407_v47  ;;  %v413_v19 = vsel %vm403_vm9, %v410_v45, %v412_v53  ;;  %v414_v9 = vsel %vm402_vm5, %v392_v4, %v395_v35  ;;  %v415_v55 = vsel %vm405_vm8, %v401_v26, 1326507024 }
 0x112   :  { %v653_v3 = vor.u32 %v652_v56, %v651_v24  ;;  %v657_v18 = vor.u32 4788187, %v656_v21  ;;  %vm4499_vm10 = vcmp.lt.s32.totalorder %v4498_v51, 0  ;;  %v416_v7 = vsel %vm404_vm6, %v398_v0, %v415_v55 }
 0x113   :  { %v753_v60 = vsel %vm4499_vm10, 0, %v4498_v51  ;;  %v417_v29 = vsel %vm403_vm9, %v414_v9, %v416_v7  ;;  %v5313_v28 = vmul.u32.u64.low %v5279_v52, %v413_v19  ;;  %v5314_v2 = vmul.u32.u64.high %v5279_v52, %v413_v19, %v5313_v28 }
 0x114   :  { %v754_v17 = vsub.s32 32, %v753_v60  ;;  %v758_v43 = vsub.s32 4294967266, %v753_v60  ;;  %v409_v57 = vsel %vm403_vm9, %v406_v48, %v408_v11  ;;  %v5319_v4 = vadd.f32 %v143_v38, %v5260_v27 }
 0x115   :  { %v5322_v21 = vmul.u32.u64.low %v5279_v52, %v417_v29  ;;  %v5323_v35 = vmul.u32.u64.high %v5279_v52, %v417_v29, %v5322_v21  ;;  %v488_v0 = vand.u32 31, %v486_v10  ;;  %v7126_v24 = vand.u32 2147483647, %v5284_v6 }
 0x116   :  { %7182 = vst [vmem:[#allocation7_spill] sm:$0xff] %v5319_v4  ;;  %v658_v56 = vand.u32 2147483647, %v657_v18  ;;  %v660_v33 = vcvt.s32.f32 %v653_v3  ;;  %v756_v26 = vshrl.u32 %v5277_v30, %v754_v17  ;;  %v759_v47 = vadd.s32 127, %v758_v43 }
 0x117   :  { %v755_v45 = vshll.u32 %v5288_v62, %v753_v60  ;;  %v425_v16 = vmul.u32 %v5279_v52, %v409_v57  ;;  %v428_v63 = vadd.s32 1, %v5314_v2  ;;  %v489_v27 = vsub.s32 32, %v488_v0 }
 0x118   :  { %v760_v38 = vshll.u32 %v759_v47, 23  ;;  %v487_v51 = vshrl.u32 %v486_v10, 5  ;;  %v491_v48 = vshll.u32 %v7127_v14, %v488_v0  ;;  %v7183_v53 = vmov 2475754826  }
 0x119   :  { %v494_v11 = vshll.u32 %v7183_v53, %v488_v0  ;;  %v757_v19 = vor.u32 %v756_v26, %v755_v45  ;;  %vm427_vm12 = vc.u32 %v5323_v35, %v5313_v28  ;;  %v492_v30 = vshrl.u32 %v7183_v53, %v489_v27 }
 0x11a   :  { %v7184_v9 = vmov 2131351028   ;;  %v761_v62 = vor.u32 4788187, %v760_v38  ;;  %v429_v52 = vsel %vm427_vm12, %v428_v63, %v5314_v2  ;;  %v500_v18 = vshll.u32 %v7181_v46, %v488_v0 }
 0x11b   :  { %v497_v55 = vshll.u32 %v7184_v9, %v488_v0  ;;  %v495_v3 = vshrl.u32 %v7184_v9, %v489_v27  ;;  %v430_v10 = vadd.s32 %v429_v52, %v425_v16  ;;  %v493_v7 = vor.u32 %v492_v30, %v491_v48 }
 0x11c   :  { %v498_v60 = vshrl.u32 %v7181_v46, %v489_v27  ;;  %v501_v29 = vshrl.u32 %v7131_v25, %v489_v27  ;;  %v661_v17 = vmul.f32 %v660_v33, %v658_v56  ;;  %v503_v57 = vshll.u32 %v7131_v25, %v488_v0 }
 0x11d   :  { %v496_v43 = vor.u32 %v495_v3, %v494_v11  ;;  %v504_v21 = vshrl.u32 %v7123_v34, %v489_v27  ;;  %v431_v26 = vadd.s32 536870912, %v430_v10  ;;  %v165_v2 = vand.u32 2139095040, %v5284_v6 }
 0x11e   :  { %v499_v47 = vor.u32 %v498_v60, %v497_v55  ;;  %v502_v45 = vor.u32 %v501_v29, %v500_v18  ;;  %v764_v63 = vcvt.s32.f32 %v757_v19  ;;  %v490_v38 = vshrl.u32 %v7127_v14, %v489_v27 }
 0x11f   :  { %v505_v16 = vor.u32 %v504_v21, %v503_v57  ;;  %vm506_vm11 = vcmp.lt.s32.totalorder %v487_v51, 1  ;;  %v762_v48 = vand.u32 2147483647, %v761_v62  ;;  %v5345_v30 = vshrl.u32 %v431_v26, 30 }
 0x120   :  { %vm509_vm2 = vcmp.lt.s32.totalorder %v487_v51, 4  ;;  %v514_v56 = vsel %vm506_vm11, %v493_v7, %v496_v43  ;;  %vm508_vm3 = vcmp.lt.s32.totalorder %v487_v51, 3  ;;  %v518_v11 = vsel %vm506_vm11, %v496_v43, %v499_v47 }
 0x121   :  { %7185 = vst [vmem:[#allocation8_spill] sm:$0xff] %v5345_v30  ;;  %v511_v33 = vsel %vm509_vm2, %v499_v47, 2102212464  ;;  %v515_v0 = vsel %vm509_vm2, %v502_v45, 920167782  ;;  %vm580_vm4 = vcmp.lt.s32.totalorder %v5051_v8, 0  ;;  %v510_v3 = vsel %vm506_vm11, %v490_v38, %v493_v7 }
 0x122   :  { %v433_v55 = vshll.u32 %v5345_v30, 30  ;;  %vm507_vm5 = vcmp.lt.s32.totalorder %v487_v51, 2  ;;  %v516_v52 = vsel %vm508_vm3, %v499_v47, %v515_v0  ;;  %v519_v19 = vsel %vm509_vm2, %v505_v16, 1326507024 }
 0x123   :  { %v512_v27 = vsel %vm508_vm3, %v496_v43, %v511_v33  ;;  %v517_v18 = vsel %vm507_vm5, %v514_v56, %v516_v52  ;;  %v520_v62 = vsel %vm508_vm3, %v502_v45, %v519_v19  ;;  %vm684_vm6 = vcmp.lt.s32.totalorder %v5056_v58, 0 }
 0x124   :  { %v5351_v60 = vsub.s32 %v430_v10, %v433_v55  ;;  %v521_v29 = vsel %vm507_vm5, %v518_v11, %v520_v62  ;;  %v5355_v57 = vmul.u32.u64.low %v5282_v50, %v517_v18  ;;  %v5356_v21 = vmul.u32.u64.high %v5282_v50, %v517_v18, %v5355_v57 }
 0x125   :  { %v765_v26 = vmul.f32 %v764_v63, %v762_v48  ;;  %v5359_v34 = vmul.u32.u64.low %v5282_v50, %v521_v29  ;;  %v5360_v47 = vmul.u32.u64.high %v5282_v50, %v521_v29, %v5359_v34  ;;  %v166_v7 = vshrl.u32 %v165_v2, 23 }
 0x126   :  { %4583 = vsinq.f32 %v5252_v22  ;;  %v436_v43 = vsub.s32 0, %v5351_v60  ;;  %v513_v45 = vsel %vm507_vm5, %v510_v3, %v512_v27  ;;  %v169_v10 = vand.u32 8388607, %v7126_v24 }
 0x127   :  { %4585 = vcosq.f32 %v5274_v20  ;;  %v662_v38 = vxor.u32 2147483648, %v661_v17  ;;  %v4476_v16 = vadd.s32 4294967169, %v166_v7  ;;  %v269_v63 = vand.u32 2139095040, %v5319_v4 }
 0x128   :  { %v4485_v48 = vmin.u32 %v436_v43, %v5351_v60  ;;  %v532_v34 = vadd.s32 1, %v5356_v21  ;;  %v7125_v2 = vand.u32 2147483647, %v5319_v4  ;;  %v1187_v22 = vsel %vm5079_vm14, 0, %v5223_v37 }
 0x129   :  { %v766_v51 = vxor.u32 2147483648, %v765_v26  ;;  %v529_v56 = vmul.u32 %v5282_v50, %v513_v45  ;;  %vm531_vm8 = vc.u32 %v5360_v47, %v5355_v57  ;;  %v172_v33 = vadd.s32 1, %v4476_v16 }
 0x12a   :  { %4587 = vsinq.f32 %v5274_v20  ;;  %v438_v0 = vclz %v4485_v48  ;;  %v533_v11 = vsel %vm531_vm8, %v532_v34, %v5356_v21  ;;  %v170_v55 = vor.u32 8388608, %v169_v10 }
 0x12b   :  { %v5381_v52 = vsel %vm580_vm4, %v662_v38, %v661_v17  ;;  %v534_v19 = vadd.s32 %v533_v11, %v529_v56  ;;  %vm173_vm9 = vcmp.gt.s32.totalorder %v172_v33, 0  ;;  %v270_v44 = vshrl.u32 %v269_v63, 23 }
 0x12c   :  { %v4486_v37 = vadd.s32 4294967294, %v438_v0  ;;  %v174_v3 = vsel %vm173_vm9, %v172_v33, 0  ;;  %v5385_v50 = vand.u32 8388607, %v7125_v2  ;;  %v1191_v27 = vadd.s32 3, %v1187_v22 }
 0x12d   :  { %v5389_v20 = vsel %vm684_vm6, %v766_v51, %v765_v26  ;;  %v426_v18 = vadd.s32 %v5313_v28, %v5323_v35  ;;  %v535_v62 = vadd.s32 536870912, %v534_v19  ;;  %v176_v17 = vand.u32 31, %v174_v3 }
 0x12e   :  { %vm4487_vm14 = vcmp.lt.s32.totalorder %v4486_v37, 0  ;;  %v5394_v29 = vadd.s32 %v5355_v57, %v5360_v47  ;;  %v5396_v21 = vshll.u32 %v170_v55, 8  ;;  %v4480_v38 = vadd.s32 4294967169, %v270_v44 }
 0x12f   :  { %v441_v43 = vsel %vm4487_vm14, 0, %v4486_v37  ;;  %v5399_v45 = vshrl.u32 %v535_v62, 30  ;;  %v177_v10 = vsub.s32 32, %v176_v17  ;;  %v179_v16 = vshll.u32 %v7127_v14, %v176_v17 }
 0x130   :  { %v446_v26 = vsub.s32 4294967266, %v441_v43  ;;  %v274_v28 = vor.u32 8388608, %v5385_v50  ;;  %v5403_v35 = vand.u32 3, %v1191_v27  ;;  %v442_v63 = vsub.s32 32, %v441_v43 }
 0x131   :  { %7186 = vst [vmem:[#allocation9_spill] sm:$0xff] %v5399_v45  ;;  %v537_v57 = vshll.u32 %v5399_v45, 30  ;;  %v180_v47 = vshrl.u32 %v7183_v53, %v177_v10  ;;  %v183_v48 = vshrl.u32 %v7184_v9, %v177_v10  ;;  %v182_v22 = vshll.u32 %v7183_v53, %v176_v17 }
 0x132   :  { %v447_v34 = vadd.s32 127, %v446_v26  ;;  %v185_v51 = vshll.u32 %v7184_v9, %v176_v17  ;;  %v186_v56 = vshrl.u32 %v7181_v46, %v177_v10  ;;  %v175_v11 = vshrl.u32 %v174_v3, 5 }
 0x133   :  { %v5411_v33 = vpop.eup %4583  ;;  %v5413_v0 = vsub.s32 %v534_v19, %v537_v57  ;;  %v181_v55 = vor.u32 %v180_v47, %v179_v16  ;;  %v276_v44 = vadd.s32 1, %v4480_v38  ;;  %v184_v50 = vor.u32 %v183_v48, %v182_v22 }
 0x134   :  { %v5415_v37 = vpop.eup %4585  ;;  %v187_v27 = vor.u32 %v186_v56, %v185_v51  ;;  %v188_v62 = vshll.u32 %v7181_v46, %v176_v17  ;;  %v189_v26 = vshrl.u32 %v7131_v25, %v177_v10  ;;  %v443_v2 = vshll.u32 %v5351_v60, %v441_v43 }
 0x135   :  { %v540_v24 = vsub.s32 0, %v5413_v0  ;;  %v191_v7 = vshll.u32 %v7131_v25, %v176_v17  ;;  %v7187_v14 = vmov 1326507024   ;;  %v444_v57 = vshrl.u32 %v426_v18, %v442_v63 }
 0x136   :  { %v192_v19 = vshrl.u32 %v7187_v14, %v177_v10  ;;  %v448_v3 = vshll.u32 %v447_v34, 23  ;;  %v7188_v16 = vmov 683565275   ;;  %v190_v47 = vor.u32 %v189_v26, %v188_v62 }
 0x137   :  { %v178_v38 = vshrl.u32 %v7188_v16, %v177_v10  ;;  %v5424_v30 = vpop.eup %4587  ;;  %v4489_v48 = vmin.u32 %v540_v24, %v5413_v0  ;;  %vm194_vm10 = vcmp.lt.s32.totalorder %v175_v11, 1  ;;  %vm197_vm12 = vcmp.lt.s32.totalorder %v175_v11, 4 }
 0x138   :  { %v193_v22 = vor.u32 %v192_v19, %v191_v7  ;;  %vm196_vm11 = vcmp.lt.s32.totalorder %v175_v11, 3  ;;  %v199_v43 = vsel %vm197_vm12, %v187_v27, 2102212464  ;;  %v202_v51 = vsel %vm194_vm10, %v181_v55, %v184_v50 }
 0x139   :  { %v198_v60 = vsel %vm194_vm10, %v178_v38, %v181_v55  ;;  %v542_v56 = vclz %v4489_v48  ;;  %v200_v17 = vsel %vm196_vm11, %v184_v50, %v199_v43  ;;  %v203_v25 = vsel %vm197_vm12, %v190_v47, 920167782 }
 0x13a   :  { %v206_v4 = vsel %vm194_vm10, %v184_v50, %v187_v27  ;;  %v5427_v18 = vor.u32 %v444_v57, %v443_v2  ;;  %vm195_vm2 = vcmp.lt.s32.totalorder %v175_v11, 2  ;;  %v204_v10 = vsel %vm196_vm11, %v187_v27, %v203_v25 }
 0x13b   :  { %v207_v63 = vsel %vm197_vm12, %v193_v22, 1326507024  ;;  %v5429_v34 = vor.u32 4788187, %v448_v3  ;;  %v4490_v62 = vadd.s32 4294967294, %v542_v56  ;;  %v205_v24 = vsel %vm195_vm2, %v202_v51, %v204_v10 }
 0x13c   :  { %v208_v7 = vsel %vm196_vm11, %v190_v47, %v207_v63  ;;  %v201_v26 = vsel %vm195_vm2, %v198_v60, %v200_v17  ;;  %v5432_v38 = vmul.u32.u64.low %v5396_v21, %v205_v24  ;;  %v5433_v45 = vmul.u32.u64.high %v5396_v21, %v205_v24, %v5432_v38 }
 0x13d   :  { %v209_v19 = vsel %vm195_vm2, %v206_v4, %v208_v7  ;;  %vm4491_vm3 = vcmp.lt.s32.totalorder %v4490_v62, 0  ;;  %vm277_vm5 = vcmp.gt.s32.totalorder %v276_v44, 0  ;;  %v5439_v11 = vshll.u32 %v274_v28, 8 }
 0x13e   :  { %v5436_v55 = vmul.u32.u64.low %v5396_v21, %v209_v19  ;;  %v5437_v50 = vmul.u32.u64.high %v5396_v21, %v209_v19, %v5436_v55  ;;  %v545_v2 = vsel %vm4491_vm3, 0, %v4490_v62  ;;  %v278_v25 = vsel %vm277_vm5, %v276_v44, 0 }
 0x13f   :  { %v1198_v27 = vxor.u32 2147483648, %v5143_v49  ;;  %v452_v57 = vcvt.s32.f32 %v5427_v18  ;;  %v546_v3 = vsub.s32 32, %v545_v2  ;;  %v550_v4 = vsub.s32 4294967266, %v545_v2 }
 0x140   :  { %vm1194_vm8 = vcmp.eq.s32.totalorder %v5403_v35, 0  ;;  %v450_v47 = vand.u32 2147483647, %v5429_v34  ;;  %v217_v48 = vmul.u32 %v5396_v21, %v201_v26  ;;  %v220_v22 = vadd.s32 1, %v5433_v45 }
 0x141   :  { %v280_v60 = vand.u32 31, %v278_v25  ;;  %v551_v43 = vadd.s32 127, %v550_v4  ;;  %v5448_v44 = vadd.s32 %v5432_v38, %v5437_v50  ;;  %vm219_vm9 = vc.u32 %v5437_v50, %v5432_v38 }
 0x142   :  { %v7189_v28 = vxor.u32 2147483648, %v5286_v59  ;;  %v547_v56 = vshll.u32 %v5413_v0, %v545_v2  ;;  %v548_v17 = vshrl.u32 %v5394_v29, %v546_v3  ;;  %v221_v10 = vsel %vm219_vm9, %v220_v22, %v5433_v45 }
 0x143   :  { %v281_v21 = vsub.s32 32, %v280_v60  ;;  %v552_v63 = vshll.u32 %v551_v43, 23  ;;  %v222_v62 = vadd.s32 %v221_v10, %v217_v48  ;;  %v283_v24 = vshll.u32 %v7188_v16, %v280_v60 }
 0x144   :  { %v1196_v51 = vsel %vm1194_vm8, %v5143_v49, %v7189_v28  ;;  %v286_v7 = vshll.u32 %v7183_v53, %v280_v60  ;;  %v289_v38 = vshll.u32 %v7184_v9, %v280_v60  ;;  %v279_v50 = vshrl.u32 %v278_v25, 5 }
 0x145   :  { %v284_v26 = vshrl.u32 %v7183_v53, %v281_v21  ;;  %v287_v19 = vshrl.u32 %v7184_v9, %v281_v21  ;;  %v290_v55 = vshrl.u32 %v7181_v46, %v281_v21  ;;  %v223_v0 = vadd.s32 536870912, %v222_v62 }
 0x146   :  { %v292_v29 = vshll.u32 %v7181_v46, %v280_v60  ;;  %vm1197_vm14 = vcmp.eq.s32.totalorder %v5403_v35, 2  ;;  %v7190_v4 = vmov 920167782   ;;  %vm1193_vm10 = vcmp.lt.s32.totalorder %v5403_v35, 2 }
 0x147   :  { %v285_v45 = vor.u32 %v284_v26, %v283_v24  ;;  %v288_v2 = vor.u32 %v287_v19, %v286_v7  ;;  %v291_v3 = vor.u32 %v290_v55, %v289_v38  ;;  %v293_v48 = vshrl.u32 %v7190_v4, %v281_v21 }
 0x148   :  { %v549_v53 = vor.u32 %v548_v17, %v547_v56  ;;  %v5467_v22 = vshrl.u32 %v223_v0, 30  ;;  %v295_v9 = vshll.u32 %v7190_v4, %v280_v60  ;;  %v296_v43 = vshrl.u32 %v7187_v14, %v281_v21 }
 0x149   :  { %vm1190_vm12 = vweird.f32 %v4811_v41  ;;  %v553_v25 = vor.u32 4788187, %v552_v63  ;;  %v282_v46 = vshrl.u32 %v7188_v16, %v281_v21  ;;  %v294_v28 = vor.u32 %v293_v48, %v292_v29 }
 0x14a   :  { %vm1251_vm11 = vcmask 1040384   ;;  %v225_v10 = vshll.u32 %v5467_v22, 30  ;;  %v297_v24 = vor.u32 %v296_v43, %v295_v9  ;;  %vm298_vm2 = vcmp.lt.s32.totalorder %v279_v50, 1 }
 0x14b   :  { %vm301_vm3 = vcmp.lt.s32.totalorder %v279_v50, 4  ;;  %vm300_vm5 = vcmp.lt.s32.totalorder %v279_v50, 3  ;;  %v306_v17 = vsel %vm298_vm2, %v285_v45, %v288_v2  ;;  %v556_v26 = vcvt.s32.f32 %v549_v53 }
 0x14c   :  { %v303_v56 = vsel %vm301_vm3, %v291_v3, 2102212464  ;;  %v307_v7 = vsel %vm301_vm3, %v294_v28, 920167782  ;;  %v5474_v60 = vsub.s32 %v222_v62, %v225_v10  ;;  %vm299_vm8 = vcmp.lt.s32.totalorder %v279_v50, 2 }
 0x14d   :  { %v308_v14 = vsel %vm300_vm5, %v291_v3, %v307_v7  ;;  %v554_v19 = vand.u32 2147483647, %v553_v25  ;;  %v310_v16 = vsel %vm298_vm2, %v288_v2, %v291_v3  ;;  %v311_v21 = vsel %vm301_vm3, %v297_v24, 1326507024 }
 0x14e   :  { %v309_v63 = vsel %vm299_vm8, %v306_v17, %v308_v14  ;;  %v228_v38 = vsub.s32 0, %v5474_v60  ;;  %v302_v55 = vsel %vm298_vm2, %v282_v46, %v285_v45  ;;  %v304_v0 = vsel %vm300_vm5, %v288_v2, %v303_v56 }
 0x14f   :  { %v312_v29 = vsel %vm300_vm5, %v294_v28, %v311_v21  ;;  %v5480_v48 = vmul.u32.u64.low %v5439_v11, %v309_v63  ;;  %v5481_v9 = vmul.u32.u64.high %v5439_v11, %v309_v63, %v5480_v48  ;;  %v1199_v62 = vsel %vm1197_vm14, %v1198_v27, %v5286_v59 }
 0x150   :  { %v313_v4 = vsel %vm299_vm8, %v310_v16, %v312_v29  ;;  %v4477_v3 = vmin.u32 %v228_v38, %v5474_v60  ;;  %v1200_v2 = vsel %vm1193_vm10, %v1196_v51, %v1199_v62  ;;  %v5500_v43 = vmul.f32 %v452_v57, %v450_v47 }
 0x151   :  { %v5491_v53 = vmul.u32.u64.low %v5439_v11, %v313_v4  ;;  %v5492_v45 = vmul.u32.u64.high %v5439_v11, %v313_v4, %v5491_v53  ;;  %v305_v49 = vsel %vm299_vm8, %v302_v55, %v304_v0  ;;  %v1201_v59 = vsel %vm1190_vm12, nan, %v1200_v2 }
 0x152   :  { %v1083_v27 = vsel %vm5065_vm13, 0, %v5096_v5  ;;  %v5508_v25 = vmul.f32 %v556_v26, %v554_v19  ;;  %v230_v46 = vclz %v4477_v3  ;;  %v5511_v35 = vsel %vm1251_vm11, %v1201_v59, 0 }
 0x153   :  { %v1087_v34 = vadd.s32 3, %v1083_v27  ;;  %v324_v18 = vadd.s32 1, %v5481_v9  ;;  %v5515_v57 = vand.u32 4294901760, %v5511_v35  ;;  %v1091_v47 = vxor.u32 2147483648, %v5141_v15 }
 0x154   :  { %v976_v41 = vsub.s32 4, %v5098_v31  ;;  %v4478_v51 = vadd.s32 4294967294, %v230_v46  ;;  %v321_v1 = vmul.u32 %v5439_v11, %v305_v49  ;;  %vm323_vm13 = vc.u32 %v5492_v45, %v5480_v48 }
 0x155   :  { %v1088_v5 = vand.u32 3, %v1087_v34  ;;  %v325_v50 = vsel %vm323_vm13, %v324_v18, %v5481_v9  ;;  %1281 = vmatprep.subr.mxu0 %v5515_v57  ;;  %vm1086_vm9 = vweird.f32 %v4809_v40  ;;  %v1094_v28 = vxor.u32 2147483648, %v5136_v39  ;;  %v7205_v34 = vld [vmem:[#allocation9_spill] sm:$0xff] }
 0x156   :  { %v977_v10 = vsel %vm892_vm0, %v976_v41, %v5098_v31  ;;  %vm4479_vm14 = vcmp.lt.s32.totalorder %v4478_v51, 0  ;;  %v326_v24 = vadd.s32 %v325_v50, %v321_v1  ;;  %v987_v11 = vxor.u32 2147483648, %v5424_v30 }
 0x157   :  { %vm1090_vm10 = vcmp.eq.s32.totalorder %v1088_v5, 0  ;;  %v233_v56 = vsel %vm4479_vm14, 0, %v4478_v51  ;;  %vm1089_vm12 = vcmp.lt.s32.totalorder %v1088_v5, 2  ;;  %v979_v7 = vsel %vm5233_vm1, 0, %v977_v10  ;;  %v7194_v51 = vld [vmem:[#allocation6_spill] sm:$0xff] }
 0x158   :  { %v1092_v17 = vsel %vm1090_vm10, %v5136_v39, %v1091_v47  ;;  %v234_v26 = vsub.s32 32, %v233_v56  ;;  %v238_v14 = vsub.s32 4294967266, %v233_v56  ;;  %v327_v19 = vadd.s32 536870912, %v326_v24 }
 0x159   :  { %vm1093_vm2 = vcmp.eq.s32.totalorder %v1088_v5, 2  ;;  %vm982_vm3 = vweird.f32 %v4825_v54  ;;  %v235_v31 = vshll.u32 %v5474_v60, %v233_v56  ;;  %v983_v16 = vadd.s32 3, %v979_v7 }
 0x15a   :  { %v1095_v63 = vsel %vm1093_vm2, %v1094_v28, %v5141_v15  ;;  %v872_v21 = vsub.s32 4, %v5001_v61  ;;  %v236_v38 = vshrl.u32 %v5448_v44, %v234_v26  ;;  %v239_v55 = vadd.s32 127, %v238_v14 }
 0x15b   :  { %v5538_v39 = vshrl.u32 %v327_v19, 30  ;;  %v1096_v13 = vsel %vm1089_vm12, %v1092_v17, %v1095_v63  ;;  %v984_v29 = vand.u32 3, %v983_v16  ;;  %v990_v4 = vxor.u32 2147483648, %v5415_v37 }
 0x15c   :  { %v1097_v0 = vsel %vm1086_vm9, nan, %v1096_v13  ;;  %v873_v60 = vsel %vm788_vm7, %v872_v21, %v5001_v61  ;;  %v237_v15 = vor.u32 %v236_v38, %v235_v31  ;;  %v240_v9 = vshll.u32 %v239_v55, 23 }
 0x15d   :  { %v329_v62 = vshll.u32 %v5538_v39, 30  ;;  %v5548_v44 = vsel %vm1251_vm11, %v1097_v0, 0  ;;  %vm985_vm0 = vcmp.lt.s32.totalorder %v984_v29, 2  ;;  %vm986_vm1 = vcmp.eq.s32.totalorder %v984_v29, 0 }
 0x15e   :  { %v5551_v3 = vand.u32 4294901760, %v5548_v44  ;;  %v883_v40 = vxor.u32 2147483648, %v5411_v33  ;;  %v241_v53 = vor.u32 4788187, %v240_v9  ;;  %v988_v49 = vsel %vm986_vm1, %v5415_v37, %v987_v11 }
 0x15f   :  { %v5554_v2 = vsub.s32 %v326_v24, %v329_v62  ;;  %vm989_vm7 = vcmp.eq.s32.totalorder %v984_v29, 2  ;;  %vm164_vm5 = vcmp.lt.s32.totalorder %v5284_v6, 0  ;;  %v244_v61 = vcvt.s32.f32 %v237_v15 }
 0x160   :  { %1283 = vmatpush1.msra.mxu0 %v5551_v3  ;;  %v991_v59 = vsel %vm989_vm7, %v990_v4, %v5424_v30  ;;  %v875_v27 = vsel %vm5191_vm15, 0, %v873_v60  ;;  %v7191_v46 = vand.u32 2147483647, %v5056_v58  ;;  %vm372_vm8 = vcmp.lt.s32.totalorder %v5165_v12, 0 }
 0x161   :  { %v242_v37 = vand.u32 2147483647, %v241_v53  ;;  %v332_v18 = vsub.s32 0, %v5554_v2  ;;  %v992_v47 = vsel %vm985_vm0, %v988_v49, %v991_v59  ;;  %v879_v41 = vadd.s32 3, %v875_v27 }
 0x162   :  { %vm5564_vm11 = vcmp.le.f32.partialorder %v7191_v46, 0.7853982  ;;  %vm476_vm13 = vcmp.lt.s32.totalorder %v5199_v23, 0  ;;  %v5574_v36 = vsel %vm982_vm3, nan, %v992_v47  ;;  %v886_v30 = vxor.u32 2147483648, %v5305_v32 }
 0x163   :  { %v768_v1 = vsub.s32 4, %v7194_v51  ;;  %v770_v5 = vsel %vm5564_vm11, %v5056_v58, %v5389_v20  ;;  %v7195_v50 = vand.u32 2147483647, %v5284_v6  ;;  %v245_v10 = vmul.f32 %v244_v61, %v242_v37  ;;  %v7198_v20 = vld [vmem:[#allocation5_spill] sm:$0xff] }
 0x164   :  { %v4481_v54 = vmin.u32 %v332_v18, %v5554_v2  ;;  %v5590_v24 = vand.u32 4294901760, %v5574_v36  ;;  %v880_v11 = vand.u32 3, %v879_v41  ;;  %v454_v56 = vxor.u32 2147483648, %v5500_v43  ;;  %v7206_v41 = vld [vmem:[#allocation7_spill] sm:$0xff] }
 0x165   :  { %vm5584_vm15 = vcmp.le.f32.partialorder %v7195_v50, 0.7853982  ;;  %v769_v17 = vsel %vm684_vm6, %v768_v1, %v7194_v51  ;;  %4589 = vcosq.f32 %v770_v5  ;;  %v664_v7 = vsub.s32 4, %v7198_v20 }
 0x166   :  { %v558_v26 = vxor.u32 2147483648, %v5508_v25  ;;  %v246_v14 = vxor.u32 2147483648, %v245_v10  ;;  %v334_v19 = vclz %v4481_v54  ;;  %1285 = vmatprep.subr.mxu0 %v5590_v24  ;;  %vm882_vm9 = vcmp.eq.s32.totalorder %v880_v11, 0 }
 0x167   :  { %v884_v31 = vsel %vm882_vm9, %v5305_v32, %v883_v40  ;;  %vm885_vm14 = vcmp.eq.s32.totalorder %v880_v11, 2  ;;  %v771_v63 = vsel %vm5564_vm11, 0, %v769_v17  ;;  %4591 = vsinq.f32 %v770_v5 }
 0x168   :  { %v4482_v16 = vadd.s32 4294967294, %v334_v19  ;;  %vm878_vm6 = vweird.f32 %v4813_v42  ;;  %vm881_vm10 = vcmp.lt.s32.totalorder %v880_v11, 2  ;;  %v887_v21 = vsel %vm885_vm14, %v886_v30, %v5411_v33 }
 0x169   :  { %v888_v38 = vsel %vm881_vm10, %v884_v31, %v887_v21  ;;  %v775_v55 = vadd.s32 3, %v771_v63  ;;  %v7199_v13 = vand.u32 2147483647, %v5051_v8  ;;  %v665_v32 = vsel %vm580_vm4, %v664_v7, %v7198_v20 }
 0x16a   :  { %v247_v29 = vsel %vm164_vm5, %v246_v14, %v245_v10  ;;  %vm4483_vm2 = vcmp.lt.s32.totalorder %v4482_v16, 0  ;;  %v5615_v42 = vsel %vm878_vm6, nan, %v888_v38  ;;  %v455_v4 = vsel %vm372_vm8, %v454_v56, %v5500_v43 }
 0x16b   :  { %vm5606_vm12 = vcmp.le.f32.partialorder %v7199_v13, 0.7853982  ;;  %v337_v60 = vsel %vm4483_vm2, 0, %v4482_v16  ;;  %v5625_v15 = vand.u32 4294901760, %v5615_v42  ;;  %v559_v62 = vsel %vm476_vm13, %v558_v26, %v5508_v25 }
 0x16c   :  { %v666_v33 = vsel %vm5606_vm12, %v5051_v8, %v5381_v52  ;;  %v667_v9 = vsel %vm5606_vm12, 0, %v665_v32  ;;  %v322_v40 = vadd.s32 %v5480_v48, %v5492_v45  ;;  %v338_v53 = vsub.s32 32, %v337_v60 }
 0x16d   :  { %v342_v52 = vsub.s32 4294967266, %v337_v60  ;;  %v250_v43 = vsel %vm5584_vm15, %v5284_v6, %v247_v29  ;;  %v339_v49 = vshll.u32 %v5554_v2, %v337_v60  ;;  %1287 = vmatpush1.msra.mxu0 %v5625_v15  ;;  %v776_v61 = vand.u32 3, %v775_v55  ;;  %v7213_v29 = vld [vmem:[#allocation8_spill] sm:$0xff] }
 0x16e   :  { %4593 = vcosq.f32 %v666_v33  ;;  %v340_v59 = vshrl.u32 %v322_v40, %v338_v53  ;;  %v671_v46 = vadd.s32 3, %v667_v9  ;;  %v5641_v25 = vsub.f32 %v5511_v35, %v5515_v57 }
 0x16f   :  { %v343_v27 = vadd.s32 127, %v342_v52  ;;  %4595 = vsinq.f32 %v666_v33  ;;  %v5645_v48 = vsub.f32 %v5548_v44, %v5551_v3  ;;  %v7202_v45 = vand.u32 2147483647, %v5199_v23 }
 0x170   :  { %v560_v37 = vsub.s32 4, %v7205_v34  ;;  %4597 = vcosq.f32 %v250_v43  ;;  %v341_v18 = vor.u32 %v340_v59, %v339_v49  ;;  %vm774_vm3 = vweird.f32 %v5056_v58 }
 0x171   :  { %vm5649_vm4 = vcmp.le.f32.partialorder %v7202_v45, 0.7853982  ;;  %v344_v47 = vshll.u32 %v343_v27, 23  ;;  %vm268_vm0 = vcmp.lt.s32.totalorder %v7206_v41, 0  ;;  %v1489_v44 = vand.u32 4294901760, %v5641_v25 }
 0x172   :  { %v562_v35 = vsel %vm5649_vm4, %v5199_v23, %v559_v62  ;;  %v1495_v30 = vand.u32 4294901760, %v5645_v48  ;;  %v561_v51 = vsel %vm476_vm13, %v560_v37, %v7205_v34  ;;  %v4590_v1 = vpop.eup %4589  ;;  %v7207_v5 = vand.u32 2147483647, %v7206_v41 }
 0x173   :  { %4599 = vcosq.f32 %v562_v35  ;;  %v345_v10 = vor.u32 4788187, %v344_v47  ;;  %vm777_vm7 = vcmp.lt.s32.totalorder %v776_v61, 2  ;;  %vm781_vm11 = vcmp.eq.s32.totalorder %v776_v61, 2 }
 0x174   :  { %4601 = vsinq.f32 %v250_v43  ;;  %vm5666_vm1 = vcmp.le.f32.partialorder %v7207_v5, 0.7853982  ;;  %v782_v54 = vxor.u32 2147483648, %v4590_v1  ;;  %v672_v11 = vand.u32 3, %v671_v46  ;;  %v4592_v20 = vpop.eup %4591 }
 0x175   :  { %v1490_v56 = vsub.f32 %v5641_v25, %v1489_v44  ;;  %v1496_v17 = vsub.f32 %v5645_v48, %v1495_v30  ;;  %v346_v7 = vand.u32 2147483647, %v345_v10  ;;  %v348_v26 = vcvt.s32.f32 %v341_v18 }
 0x176   :  { %v563_v14 = vsel %vm5649_vm4, 0, %v561_v51  ;;  %4603 = vsinq.f32 %v562_v35  ;;  %v779_v19 = vxor.u32 2147483648, %v4592_v20  ;;  %v783_v31 = vsel %vm781_vm11, %v782_v54, %v4592_v20 }
 0x177   :  { %v1491_v63 = vand.u32 4294901760, %v1490_v56  ;;  %v1497_v16 = vand.u32 4294901760, %v1496_v17  ;;  %v349_v21 = vmul.f32 %v348_v26, %v346_v7  ;;  %vm778_vm13 = vcmp.eq.s32.totalorder %v776_v61, 0 }
 0x178   :  { %v5680_v38 = vsub.f32 %v5574_v36, %v5590_v24  ;;  %v7210_v55 = vand.u32 2147483647, %v5165_v12  ;;  %v780_v0 = vsel %vm778_vm13, %v4590_v1, %v779_v19  ;;  %vm670_vm14 = vweird.f32 %v5051_v8 }
 0x179   :  { %1492 = vmatprep.subr.mxu1 %v1491_v63  ;;  %v567_v32 = vadd.s32 3, %v563_v14  ;;  %v456_v33 = vsub.s32 4, %v7213_v29  ;;  %v350_v9 = vxor.u32 2147483648, %v349_v21  ;;  %v784_v36 = vsel %vm777_vm7, %v780_v0, %v783_v31 }
 0x17a   :  { %vm5684_vm9 = vcmp.le.f32.partialorder %v7210_v55, 0.7853982  ;;  %vm673_vm6 = vcmp.lt.s32.totalorder %v672_v11, 2  ;;  %1498 = vmatpush1.msra.mxu1 %v1497_v16  ;;  %v1501_v62 = vand.u32 4294901760, %v5680_v38  ;;  %v785_v40 = vsel %vm774_vm3, nan, %v784_v36  ;;  %v1202_v36 = vld [vmem:[%s7105_s3] sm:$0xff] }
 0x17b   :  { %v458_v60 = vsel %vm5684_vm9, %v5165_v12, %v455_v4  ;;  %v457_v53 = vsel %vm372_vm8, %v456_v33, %v7213_v29  ;;  %v5702_v52 = vsub.f32 %v5615_v42, %v5625_v15  ;;  %v4594_v4 = vpop.eup %4593  ;;  %v351_v43 = vsel %vm268_vm0, %v350_v9, %v349_v21 }
 0x17c   :  { %4605 = vcosq.f32 %v458_v60  ;;  %v5706_v49 = vand.u32 4294901760, %v785_v40  ;;  %vm674_vm10 = vcmp.eq.s32.totalorder %v672_v11, 0  ;;  %vm677_vm12 = vcmp.eq.s32.totalorder %v672_v11, 2  ;;  %v4596_v61 = vpop.eup %4595 }
 0x17d   :  { %v354_v58 = vsel %vm5666_vm1, %v7206_v41, %v351_v43  ;;  %v678_v59 = vxor.u32 2147483648, %v4594_v4  ;;  %v568_v27 = vand.u32 3, %v567_v32  ;;  %v1502_v42 = vsub.f32 %v5680_v38, %v1501_v62  ;;  %v5718_v34 = vpop.eup %4597  ;;  %v1203_v43 = vld [vmem:[%s7105_s3 + $0x8] sm:$0xff] }
 0x17e   :  { %4607 = vcosq.f32 %v354_v58  ;;  %1289 = vmatprep.subr.mxu0 %v5706_v49  ;;  %v675_v46 = vxor.u32 2147483648, %v4596_v61  ;;  %v459_v45 = vsel %vm5684_vm9, 0, %v457_v53  ;;  %v1507_v2 = vand.u32 4294901760, %v5702_v52 }
 0x17f   :  { %4609 = vsinq.f32 %v354_v58  ;;  %v679_v37 = vsel %vm677_vm12, %v678_v59, %v4596_v61  ;;  %v1503_v18 = vand.u32 4294901760, %v1502_v42  ;;  %v463_v47 = vadd.s32 3, %v459_v45  ;;  %v1204_v61 = vld [vmem:[%s7105_s3 + $0x10] sm:$0xff] }
 0x180   :  { %v4600_v35 = vpop.eup %4599  ;;  %v676_v51 = vsel %vm674_vm10, %v4594_v4, %v675_v46  ;;  %4611 = vsinq.f32 %v458_v60  ;;  %v1508_v1 = vsub.f32 %v5702_v52, %v1507_v2  ;;  %v352_v5 = vsub.s32 4, %v5538_v39 }
 0x181   :  { %v5725_v10 = vpop.eup %4601  ;;  %v680_v54 = vsel %vm673_vm6, %v676_v51, %v679_v37  ;;  %vm566_vm8 = vweird.f32 %v5199_v23  ;;  %v574_v56 = vxor.u32 2147483648, %v4600_v35  ;;  %1504 = vmatprep.subr.mxu1 %v1503_v18  ;;  %v5729_v17 = vand.u32 3, %v463_v47 }
 0x182   :  { %v681_v20 = vsel %vm670_vm14, nan, %v680_v54  ;;  %v1509_v7 = vand.u32 4294901760, %v1508_v1  ;;  %v353_v26 = vsel %vm268_vm0, %v352_v5, %v5538_v39  ;;  %v5737_v14 = vsub.f32 %v785_v40, %v5706_v49 }
 0x183   :  { %v4604_v19 = vpop.eup %4603  ;;  %v5739_v11 = vand.u32 4294901760, %v681_v20  ;;  %vm569_vm2 = vcmp.lt.s32.totalorder %v568_v27, 2  ;;  %vm570_vm4 = vcmp.eq.s32.totalorder %v568_v27, 0  ;;  %vm573_vm3 = vcmp.eq.s32.totalorder %v568_v27, 2 }
 0x184   :  { %v571_v31 = vxor.u32 2147483648, %v4604_v19  ;;  %v575_v63 = vsel %vm573_vm3, %v574_v56, %v4604_v19  ;;  %1510 = vmatpush1.msra.mxu1 %v1509_v7  ;;  %v355_v8 = vsel %vm5666_vm1, 0, %v353_v26  ;;  %v1513_v16 = vand.u32 4294901760, %v5737_v14 }
 0x185   :  { %1291 = vmatpush1.msra.mxu0 %v5739_v11  ;;  %vm469_vm0 = vcmp.eq.s32.totalorder %v5729_v17, 2  ;;  %v359_v39 = vadd.s32 3, %v355_v8  ;;  %v248_v21 = vsub.s32 4, %v5467_v22  ;;  %v259_v55 = vxor.u32 2147483648, %v5725_v10 }
 0x186   :  { %v572_v13 = vsel %vm570_vm4, %v4600_v35, %v571_v31  ;;  %v1514_v0 = vsub.f32 %v5737_v14, %v1513_v16  ;;  %v262_v32 = vxor.u32 2147483648, %v5718_v34  ;;  %vm466_vm1 = vcmp.eq.s32.totalorder %v5729_v17, 0 }
 0x187   :  { %v576_v50 = vsel %vm569_vm2, %v572_v13, %v575_v63  ;;  %v360_v29 = vand.u32 3, %v359_v39  ;;  %v249_v33 = vsel %vm164_vm5, %v248_v21, %v5467_v22  ;;  %v7143_v60 = vmov 0.0  }
 0x188   :  { %1332 = vmatprep.mubr.f32.mxu0 %v7143_v60  ;;  %v5759_v9 = vsub.f32 %v681_v20, %v5739_v11  ;;  %1579 = vmatprep.mubr.f32.mxu1 %v7143_v60  ;;  %v577_v53 = vsel %vm566_vm8, nan, %v576_v50  ;;  %vm465_vm7 = vcmp.lt.s32.totalorder %v5729_v17, 2  ;;  %vm358_vm5 = vweird.f32 %v7206_v41 }
 0x189   :  { %v4606_v40 = vpop.eup %4605  ;;  %v1515_v22 = vand.u32 4294901760, %v1514_v0  ;;  %v251_v4 = vsel %vm5584_vm15, 0, %v249_v33  ;;  %vm1214_vm11 = vcmask 269312   ;;  %v5777_v58 = vand.u32 4294901760, %v577_v53 }
 0x18a   :  { %vm462_vm13 = vweird.f32 %v5165_v12  ;;  %v470_v23 = vxor.u32 2147483648, %v4606_v40  ;;  %vm361_vm9 = vcmp.lt.s32.totalorder %v360_v29, 2  ;;  %vm362_vm14 = vcmp.eq.s32.totalorder %v360_v29, 0 }
 0x18b   :  { %vm254_vm6 = vweird.f32 %v5284_v6  ;;  %vm365_vm10 = vcmp.eq.s32.totalorder %v360_v29, 2  ;;  %1516 = vmatprep.subr.mxu1 %v1515_v22  ;;  %v255_v28 = vadd.s32 3, %v251_v4  ;;  %v1519_v59 = vand.u32 4294901760, %v5759_v9  ;;  %v4608_v42 = vpop.eup %4607  ;;  %1293 = vmatprep.subr.mxu0 %v5777_v58  ;;  %v1206_v6 = vld [vmem:[%s7105_s3 + $0x20] sm:$0xff] }
 0x18c   :  { %v1216_v27 = vsel %vm1214_vm11, %v1202_v36, 0  ;;  %v5787_v45 = vsub.f32 %v577_v53, %v5777_v58  ;;  %v1219_v37 = vsel %vm1214_vm11, %v1203_v43, 0  ;;  %v1222_v18 = vsel %vm1214_vm11, %v1204_v61, 0  ;;  %v4610_v47 = vpop.eup %4609 }
 0x18d   :  { %v5784_v46 = vand.u32 4294901760, %v1216_v27  ;;  %v366_v35 = vxor.u32 2147483648, %v4608_v42  ;;  %v256_v51 = vand.u32 3, %v255_v28  ;;  %v1520_v1 = vsub.f32 %v5759_v9, %v1519_v59  ;;  %v4612_v54 = vpop.eup %4611 }
 0x18e   :  { %v5794_v5 = vand.u32 4294901760, %v1219_v37  ;;  %v363_v56 = vxor.u32 2147483648, %v4610_v47  ;;  %v1525_v7 = vand.u32 4294901760, %v5787_v45  ;;  %v5800_v26 = vand.u32 4294901760, %v1222_v18 }
 0x18f   :  { %v5797_v20 = vsub.f32 %v1216_v27, %v5784_v46  ;;  %v467_v19 = vxor.u32 2147483648, %v4612_v54  ;;  %v471_v31 = vsel %vm469_vm0, %v470_v23, %v4612_v54  ;;  %v367_v63 = vsel %vm365_vm10, %v366_v35, %v4610_v47  ;;  %v1207_v47 = vld [vmem:[%s7105_s3 + $0x28] sm:$0xff] }
 0x190   :  { %vm257_vm15 = vcmp.lt.s32.totalorder %v256_v51, 2  ;;  %v364_v8 = vsel %vm362_vm14, %v4608_v42, %v363_v56  ;;  %vm258_vm12 = vcmp.eq.s32.totalorder %v256_v51, 0  ;;  %vm261_vm8 = vcmp.eq.s32.totalorder %v256_v51, 2 }
 0x191   :  { %v1521_v39 = vand.u32 4294901760, %v1520_v1  ;;  %v468_v21 = vsel %vm466_vm1, %v4606_v40, %v467_v19  ;;  %v368_v13 = vsel %vm361_vm9, %v364_v8, %v367_v63  ;;  %v260_v0 = vsel %vm258_vm12, %v5718_v34, %v259_v55  ;;  %v1205_v40 = vld [vmem:[%s7105_s3 + $0x18] sm:$0xff] }
 0x192   :  { %v263_v50 = vsel %vm261_vm8, %v262_v32, %v5725_v10  ;;  %v472_v33 = vsel %vm465_vm7, %v468_v21, %v471_v31  ;;  %v369_v36 = vsel %vm358_vm5, nan, %v368_v13  ;;  %v1335_v22 = vand.u32 4294901760, %v5797_v20  ;;  %v1208_v13 = vld [vmem:[%s7105_s3 + $0x30] sm:$0xff] }
 0x193   :  { %v264_v53 = vsel %vm257_vm15, %v260_v0, %v263_v50  ;;  %1522 = vmatpush1.msra.mxu1 %v1521_v39  ;;  %v473_v29 = vsel %vm462_vm13, nan, %v472_v33  ;;  %v5821_v34 = vand.u32 4294901760, %v369_v36  ;;  %v1526_v41 = vsub.f32 %v5787_v45, %v1525_v7 }
 0x194   :  { %v265_v10 = vsel %vm254_vm6, nan, %v264_v53  ;;  %v5828_v17 = vand.u32 4294901760, %v473_v29  ;;  %v1336_v32 = vsub.f32 %v5797_v20, %v1335_v22  ;;  %v5836_v12 = vsub.f32 %v1219_v37, %v5794_v5 }
 0x195   :  { %v5830_v55 = vand.u32 4294901760, %v265_v10  ;;  %v1527_v4 = vand.u32 4294901760, %v1526_v41  ;;  %v5842_v43 = vsub.f32 %v369_v36, %v5821_v34  ;;  %v5845_v61 = vsub.f32 %v1222_v18, %v5800_v26 }
 0x196   :  { %v1225_v23 = vsel %vm1214_vm11, %v1205_v40, 0  ;;  %1295 = vmatpush1.msra.mxu0 %v5828_v17  ;;  %v1337_v28 = vand.u32 4294901760, %v1336_v32  ;;  %v5850_v27 = vsub.f32 %v473_v29, %v5828_v17  ;;  %v1346_v42 = vand.u32 4294901760, %v5836_v12 }
 0x197   :  { %v5854_v37 = vsub.f32 %v265_v10, %v5830_v55  ;;  %1297 = vmatprep.subr.mxu0 %v5821_v34  ;;  %1528 = vmatprep.subr.mxu1 %v1527_v4  ;;  %v1537_v18 = vand.u32 4294901760, %v5842_v43  ;;  %v1357_v35 = vand.u32 4294901760, %v5845_v61  ;;  %v5862_v51 = vand.u32 4294901760, %v1225_v23 }
 0x198   :  { %v1228_v1 = vsel %vm1214_vm11, %v1206_v6, 0  ;;  %1299 = vmatpush1.msra.mxu0 %v5830_v55  ;;  %v1531_v54 = vand.u32 4294901760, %v5850_v27  ;;  %v1347_v56 = vsub.f32 %v5836_v12, %v1346_v42  ;;  %v1231_v21 = vsel %vm1214_vm11, %v1207_v47, 0  ;;  %v1209_v6 = vld [vmem:[%s7105_s3 + $0x38] sm:$0xff] }
 0x199   :  { %v1543_v19 = vand.u32 4294901760, %v5854_v37  ;;  %v5871_v31 = vand.u32 4294901760, %v1228_v1  ;;  %1338 = vmatmul.mubr.f32.vlgmr.msra.gmra.mxu0 %v1337_v28  ;;  %1688 = vmatprep.subr.mxu0 %v5641_v25  ;;  %v1538_v63 = vsub.f32 %v5842_v43, %v1537_v18  ;;  %v1358_v8 = vsub.f32 %v5845_v61, %v1357_v35 }
 0x19a   :  { %v5881_v39 = vsub.f32 %v1225_v23, %v5862_v51  ;;  %1691 = vmatpush1.msra.mxu0 %v5645_v48  ;;  %1343 = vmatprep.mubr.f32.mxu0 %v7143_v60  ;;  %v1532_v0 = vsub.f32 %v5850_v27, %v1531_v54  ;;  %v1348_v50 = vand.u32 4294901760, %v1347_v56  ;;  %v5900_v29 = vand.u32 4294901760, %v1231_v21 }
 0x19b   :  { %v1544_v33 = vsub.f32 %v5854_v37, %v1543_v19  ;;  %v5896_v36 = vsub.f32 %v1228_v1, %v5871_v31  ;;  %1694 = vmatprep.subr.mxu0 %v5680_v38  ;;  %v1539_v53 = vand.u32 4294901760, %v1538_v63  ;;  %v1234_v32 = vsel %vm1214_vm11, %v1208_v13, 0  ;;  %v1210_v63 = vld [vmem:[%s7105_s3 + $0x40] sm:$0xff] }
 0x19c   :  { %v1368_v40 = vand.u32 4294901760, %v5881_v39  ;;  %v1533_v10 = vand.u32 4294901760, %v1532_v0  ;;  %1697 = vmatpush1.msra.mxu0 %v5702_v52  ;;  %v1359_v4 = vand.u32 4294901760, %v1358_v8  ;;  %v5915_v47 = vsub.f32 %v1231_v21, %v5900_v29 }
 0x19d   :  { %v1545_v41 = vand.u32 4294901760, %v1544_v33  ;;  %1349 = vmatmul.mubr.f32.gmra.mxu0 %v1348_v50  ;;  %1700 = vmatprep.subr.mxu0 %v5737_v14  ;;  %v7140_v23 = vand.u32 4294901760, %v5896_v36  ;;  %v5917_v1 = vand.u32 4294901760, %v1234_v32  ;;  %v1237_v56 = vsel %vm1214_vm11, %v1209_v6, 0 }
 0x19e   :  { %1534 = vmatpush1.msra.mxu1 %v1533_v10  ;;  %1703 = vmatpush1.msra.mxu0 %v5759_v9  ;;  %v1369_v28 = vsub.f32 %v5881_v39, %v1368_v40  ;;  %v5930_v21 = vand.u32 4294901760, %v1237_v56  ;;  %v7138_v0 = vand.u32 4294901760, %v5915_v47  ;;  %v1240_v33 = vsel %vm1214_vm11, %v1210_v63, 0 }
 0x19f   :  { %1540 = vmatprep.subr.mxu1 %v1539_v53  ;;  %1706 = vmatprep.subr.mxu0 %v5787_v45  ;;  %v1380_v8 = vsub.f32 %v5896_v36, %v7140_v23  ;;  %v5936_v50 = vsub.f32 %v1234_v32, %v5917_v1  ;;  %v1211_v53 = vld [vmem:[%s7105_s3 + $0x48] sm:$0xff]  ;;  %v5949_v10 = vand.u32 4294901760, %v1240_v33  ;;  %vm2426_vm2 = vcmask 261120  }
 0x1a0   :  { %1354 = vmatprep.mubr.f32.mxu0 %v7143_v60  ;;  %1546 = vmatpush1.msra.mxu1 %v1545_v41  ;;  %v1370_v13 = vand.u32 4294901760, %v1369_v28  ;;  %v1243_v41 = vsel %vm1214_vm11, %v1211_v53, 0  ;;  %v1391_v25 = vsub.f32 %v5915_v47, %v7138_v0  ;;  %v5958_v6 = vsub.f32 %v1237_v56, %v5930_v21 }
 0x1a1   :  { %1709 = vmatpush1.msra.mxu0 %v5850_v27  ;;  %1581 = vmatmul.mubr.f32.vlgmr.msra.gmra.mxu1 %v5784_v46  ;;  %v1381_v32 = vand.u32 4294901760, %v1380_v8  ;;  %v5968_v28 = vand.u32 4294901760, %v1243_v41  ;;  %v5977_v53 = vsub.f32 %v1240_v33, %v5949_v10 }
 0x1a2   :  { %1360 = vmatmul.mubr.f32.gmra.mxu0 %v1359_v4  ;;  %1712 = vmatprep.subr.mxu0 %v5842_v43  ;;  %v1212_v4 = vld [vmem:[%s7105_s3 + $0x50] sm:$0xff]  ;;  %v1392_v56 = vand.u32 4294901760, %v1391_v25  ;;  %v7217_v48 = vand.u32 4294901760, %v5958_v6 }
 0x1a3   :  { %1868 = vmatprep.subr.mxu1 %v5515_v57  ;;  %1715 = vmatpush1.msra.mxu0 %v5854_v37  ;;  %v1246_v63 = vsel %vm1214_vm11, %v1212_v4, 0  ;;  %v5995_v0 = vsub.f32 %v1243_v41, %v5968_v28 }
 0x1a4   :  { %1870 = vmatpush1.msra.mxu1 %v5551_v3  ;;  %2053 = vmatprep.subr.mxu0 %v1489_v44  ;;  %v7137_v44 = vand.u32 4294901760, %v5936_v50  ;;  %v5988_v25 = vand.u32 4294901760, %v1246_v63 }
 0x1a5   :  { %1872 = vmatprep.subr.mxu1 %v5590_v24  ;;  %1365 = vmatprep.mubr.f32.mxu0 %v7143_v60  ;;  %v7142_v41 = vand.u32 4294901760, %v5995_v0  ;;  %v7219_v38 = vand.u32 4294901760, %v5995_v0 }
 0x1a6   :  { %1586 = vmatprep.mubr.f32.mxu1 %v7143_v60  ;;  %1874 = vmatpush1.msra.mxu1 %v5625_v15  ;;  %v1402_v8 = vsub.f32 %v5936_v50, %v7137_v44  ;;  %v7141_v44 = vand.u32 4294901760, %v5977_v53 }
 0x1a7   :  { %1371 = vmatmul.mubr.f32.gmra.mxu0 %v1370_v13  ;;  %1588 = vmatmul.mubr.f32.gmra.mxu1 %v5794_v5  ;;  %v7139_v13 = vand.u32 4294901760, %v5958_v6 }
 0x1a8   :  { %1876 = vmatprep.subr.mxu1 %v5706_v49  ;;  %1376 = vmatprep.mubr.f32.mxu0 %v7143_v60  ;;  %v1403_v33 = vand.u32 4294901760, %v1402_v8 }
 0x1a9   :  { %1878 = vmatpush1.msra.mxu1 %v5739_v11  ;;  %1593 = vmatprep.mubr.f32.mxu1 %v7143_v60  ;;  %v1413_v4 = vsub.f32 %v5958_v6, %v7139_v13  ;;  %v1424_v13 = vsub.f32 %v5977_v53, %v7141_v44 }
 0x1aa   :  { %1880 = vmatprep.subr.mxu1 %v5777_v58 }
 0x1ab   :  { %1882 = vmatpush1.msra.mxu1 %v5828_v17  ;;  %1382 = vmatmul.mubr.f32.gmra.mxu0 %v1381_v32  ;;  %v1213_v32 = vld [vmem:[%s7105_s3 + $0x58] sm:$0xff]  ;;  %v1414_v8 = vand.u32 4294901760, %v1413_v4 }
 0x1ac   :  { %1595 = vmatmul.mubr.f32.gmra.mxu1 %v5800_v26  ;;  %1884 = vmatprep.subr.mxu1 %v5821_v34 }
 0x1ad   :  { %1886 = vmatpush1.msra.mxu1 %v5830_v55  ;;  %1387 = vmatprep.mubr.f32.mxu0 %v7143_v60 }
 0x1ae   :  { %2230 = vmatprep.subr.mxu1 %v5515_v57  ;;  %1600 = vmatprep.mubr.f32.mxu1 %v7143_v60  ;;  %v1249_v57 = vsel %vm1214_vm11, %v1213_v32, 0  ;;  %v1425_v32 = vand.u32 4294901760, %v1424_v13 }
 0x1af   :  { %1393 = vmatmul.mubr.f32.gmra.mxu0 %v1392_v56  ;;  %v6002_v56 = vsub.f32 %v1246_v63, %v5988_v25  ;;  %v6008_v23 = vand.u32 4294901760, %v1249_v57  ;;  %v1435_v63 = vsub.f32 %v5995_v0, %v7142_v41 }
 0x1b0   :  { %1602 = vmatmul.mubr.f32.gmra.mxu1 %v5862_v51  ;;  %1398 = vmatprep.mubr.f32.mxu0 %v7143_v60 }
 0x1b1   :  { %1607 = vmatprep.mubr.f32.mxu1 %v7143_v60  ;;  %v6018_v4 = vsub.f32 %v1249_v57, %v6008_v23  ;;  %v1436_v44 = vand.u32 4294901760, %v1435_v63 }
 0x1b3   :  { %1404 = vmatmul.mubr.f32.gmra.mxu0 %v1403_v33  ;;  %v1445_v33 = vand.u32 4294901760, %v6002_v56 }
 0x1b4   :  { %1609 = vmatmul.mubr.f32.gmra.mxu1 %v5871_v31  ;;  %1409 = vmatprep.mubr.f32.mxu0 %v7143_v60 }
 0x1b5   :  { %1614 = vmatprep.mubr.f32.mxu1 %v7143_v60  ;;  %v1446_v13 = vsub.f32 %v6002_v56, %v1445_v33 }
 0x1b7   :  { %1415 = vmatmul.mubr.f32.gmra.mxu0 %v1414_v8  ;;  %v1456_v8 = vand.u32 4294901760, %v6018_v4  ;;  %v1447_v57 = vand.u32 4294901760, %v1446_v13 }
 0x1b8   :  { %1616 = vmatmul.mubr.f32.gmra.mxu1 %v5900_v29  ;;  %1420 = vmatprep.mubr.f32.mxu0 %v7143_v60 }
 0x1b9   :  { %1621 = vmatprep.mubr.f32.mxu1 %v7143_v60  ;;  %v1457_v41 = vsub.f32 %v6018_v4, %v1456_v8 }
 0x1bb   :  { %1426 = vmatmul.mubr.f32.gmra.mxu0 %v1425_v32  ;;  %v1458_v32 = vand.u32 4294901760, %v1457_v41 }
 0x1bc   :  { %1623 = vmatmul.mubr.f32.gmra.mxu1 %v5917_v1  ;;  %1431 = vmatprep.mubr.f32.mxu0 %v7143_v60 }
 0x1bd   :  { %1628 = vmatprep.mubr.f32.mxu1 %v7143_v60 }
 0x1bf   :  { %1437 = vmatmul.mubr.f32.gmra.mxu0 %v1436_v44 }
 0x1c0   :  { %1630 = vmatmul.mubr.f32.gmra.mxu1 %v5930_v21  ;;  %1442 = vmatprep.mubr.f32.mxu0 %v7143_v60 }
 0x1c1   :  { %1635 = vmatprep.mubr.f32.mxu1 %v7143_v60 }
 0x1c3   :  { %1448 = vmatmul.mubr.f32.gmra.mxu0 %v1447_v57 }
 0x1c4   :  { %1637 = vmatmul.mubr.f32.gmra.mxu1 %v5949_v10  ;;  %1453 = vmatprep.mubr.f32.mxu0 %v7143_v60 }
 0x1c5   :  { %1642 = vmatprep.mubr.f32.mxu1 %v7143_v60 }
 0x1c7   :  { %1459 = vmatmul.mubr.f32.gmra.mxu0 %v1458_v32 }
 0x1c8   :  { %1644 = vmatmul.mubr.f32.gmra.mxu1 %v5968_v28  ;;  %1748 = vmatprep.mubr.f32.mxu0 %v7143_v60 }
 0x1c9   :  { %1649 = vmatprep.mubr.f32.mxu1 %v7143_v60 }
 0x1cb   :  { %1751 = vmatmul.mubr.f32.vlgmr.msra.gmra.mxu0 %v5797_v20 }
 0x1cc   :  { %1651 = vmatmul.mubr.f32.gmra.mxu1 %v5988_v25  ;;  %2057 = vmatpush1.msra.mxu0 %v1495_v30  ;;  %v7218_v30 = vand.u32 4294901760, %v5977_v53 }
 0x1cd   :  { %2061 = vmatprep.subr.mxu0 %v1501_v62  ;;  %1656 = vmatprep.mubr.f32.mxu1 %v7143_v60 }
 0x1ce   :  { %2065 = vmatpush1.msra.mxu0 %v1507_v2  ;;  %1756 = vmatprep.mubr.f32.mxu0 %v7143_v60 }
 0x1cf   :  { %2069 = vmatprep.subr.mxu0 %v1513_v16  ;;  %1759 = vmatmul.mubr.f32.gmra.mxu0 %v5836_v12 }
 0x1d0   :  { %1658 = vmatmul.mubr.f32.gmra.mxu1 %v6008_v23  ;;  %2073 = vmatpush1.msra.mxu0 %v1519_v59 }
 0x1d1   :  { %2077 = vmatprep.subr.mxu0 %v1525_v7  ;;  %1764 = vmatprep.mubr.f32.mxu0 %v7143_v60 }
 0x1d2   :  { %2081 = vmatpush1.msra.mxu0 %v1531_v54  ;;  %1919 = vmatprep.mubr.f32.mxu1 %v7143_v60 }
 0x1d3   :  { %2085 = vmatprep.subr.mxu0 %v1537_v18  ;;  %1767 = vmatmul.mubr.f32.gmra.mxu0 %v5845_v61 }
 0x1d4   :  { %1923 = vmatmul.mubr.f32.vlgmr.msra.gmra.mxu1 %v1335_v22  ;;  %2089 = vmatpush1.msra.mxu0 %v1543_v19 }
 0x1d5   :  { %2232 = vmatpush1.msra.mxu1 %v5551_v3  ;;  %1772 = vmatprep.mubr.f32.mxu0 %v7143_v60  ;;  %v7214_v3 = vand.u32 4294901760, %v5896_v36 }
 0x1d6   :  { %2234 = vmatprep.subr.mxu1 %v5590_v24  ;;  %1928 = vmatprep.mubr.f32.mxu1 %v7143_v60  ;;  %v7215_v24 = vand.u32 4294901760, %v5915_v47 }
 0x1d7   :  { %2236 = vmatpush1.msra.mxu1 %v5625_v15  ;;  %1775 = vmatmul.mubr.f32.gmra.mxu0 %v5881_v39  ;;  %v7216_v15 = vand.u32 4294901760, %v5936_v50 }
 0x1d8   :  { %2238 = vmatprep.subr.mxu1 %v5706_v49  ;;  %1932 = vmatmul.mubr.f32.gmra.mxu1 %v1346_v42 }
 0x1d9   :  { %2240 = vmatpush1.msra.mxu1 %v5739_v11  ;;  %1780 = vmatprep.mubr.f32.mxu0 %v7143_v60 }
 0x1da   :  { %2242 = vmatprep.subr.mxu1 %v5777_v58  ;;  %1937 = vmatprep.mubr.f32.mxu1 %v7143_v60 }
 0x1db   :  { %2244 = vmatpush1.msra.mxu1 %v5828_v17  ;;  %1783 = vmatmul.mubr.f32.gmra.mxu0 %v5896_v36 }
 0x1dc   :  { %2246 = vmatprep.subr.mxu1 %v5821_v34  ;;  %1941 = vmatmul.mubr.f32.gmra.mxu1 %v1357_v35 }
 0x1dd   :  { %2248 = vmatpush1.msra.mxu1 %v5830_v55  ;;  %1788 = vmatprep.mubr.f32.mxu0 %v7143_v60 }
 0x1de   :  { %1946 = vmatprep.mubr.f32.mxu1 %v7143_v60 }
 0x1df   :  { %1791 = vmatmul.mubr.f32.gmra.mxu0 %v5915_v47 }
 0x1e0   :  { %1950 = vmatmul.mubr.f32.gmra.mxu1 %v1368_v40  ;;  %1796 = vmatprep.mubr.f32.mxu0 %v7143_v60 }
 0x1e1   :  { %1955 = vmatprep.mubr.f32.mxu1 %v7143_v60 }
 0x1e3   :  { %1799 = vmatmul.mubr.f32.gmra.mxu0 %v5936_v50 }
 0x1e4   :  { %1959 = vmatmul.mubr.f32.gmra.mxu1 %v7214_v3  ;;  %1804 = vmatprep.mubr.f32.mxu0 %v7143_v60 }
 0x1e5   :  { %1964 = vmatprep.mubr.f32.mxu1 %v7143_v60 }
 0x1e7   :  { %1807 = vmatmul.mubr.f32.gmra.mxu0 %v5958_v6 }
 0x1e8   :  { %1968 = vmatmul.mubr.f32.gmra.mxu1 %v7215_v24  ;;  %1812 = vmatprep.mubr.f32.mxu0 %v7143_v60 }
 0x1e9   :  { %1973 = vmatprep.mubr.f32.mxu1 %v7143_v60 }
 0x1eb   :  { %1815 = vmatmul.mubr.f32.gmra.mxu0 %v5977_v53 }
 0x1ec   :  { %1977 = vmatmul.mubr.f32.gmra.mxu1 %v7216_v15  ;;  %1820 = vmatprep.mubr.f32.mxu0 %v7143_v60 }
 0x1ed   :  { %1982 = vmatprep.mubr.f32.mxu1 %v7143_v60 }
 0x1ef   :  { %1823 = vmatmul.mubr.f32.gmra.mxu0 %v5995_v0 }
 0x1f0   :  { %1986 = vmatmul.mubr.f32.gmra.mxu1 %v7217_v48  ;;  %1828 = vmatprep.mubr.f32.mxu0 %v7143_v60 }
 0x1f1   :  { %1991 = vmatprep.mubr.f32.mxu1 %v7143_v60 }
 0x1f3   :  { %1831 = vmatmul.mubr.f32.gmra.mxu0 %v6002_v56 }
 0x1f4   :  { %1995 = vmatmul.mubr.f32.gmra.mxu1 %v7218_v30  ;;  %1836 = vmatprep.mubr.f32.mxu0 %v7143_v60 }
 0x1f5   :  { %2000 = vmatprep.mubr.f32.mxu1 %v7143_v60 }
 0x1f7   :  { %1839 = vmatmul.mubr.f32.gmra.mxu0 %v6018_v4 }
 0x1f8   :  { %2004 = vmatmul.mubr.f32.gmra.mxu1 %v7219_v38  ;;  %2122 = vmatprep.mubr.f32.mxu0 %v7143_v60 }
 0x1f9   :  { %2009 = vmatprep.mubr.f32.mxu1 %v7143_v60 }
 0x1fb   :  { %2124 = vmatmul.mubr.f32.vlgmr.msra.gmra.mxu0 %v5784_v46 }
 0x1fc   :  { %2013 = vmatmul.mubr.f32.gmra.mxu1 %v1445_v33  ;;  %2129 = vmatprep.mubr.f32.mxu0 %v7143_v60 }
 0x1fd   :  { %2018 = vmatprep.mubr.f32.mxu1 %v7143_v60 }
 0x1ff   :  { %2131 = vmatmul.mubr.f32.gmra.mxu0 %v5794_v5 }
 0x200   :  { %2022 = vmatmul.mubr.f32.gmra.mxu1 %v1456_v8  ;;  %2136 = vmatprep.mubr.f32.mxu0 %v7143_v60 }
 0x201   :  { %2281 = vmatprep.mubr.f32.mxu1 %v7143_v60 }
 0x203   :  { %2138 = vmatmul.mubr.f32.gmra.mxu0 %v5800_v26 }
 0x204   :  { %2283 = vmatmul.mubr.f32.vlgmr.msra.gmra.mxu1 %v5784_v46  ;;  %2143 = vmatprep.mubr.f32.mxu0 %v7143_v60 }
 0x205   :  { %2288 = vmatprep.mubr.f32.mxu1 %v7143_v60 }
 0x207   :  { %2145 = vmatmul.mubr.f32.gmra.mxu0 %v5862_v51 }
 0x208   :  { %2290 = vmatmul.mubr.f32.gmra.mxu1 %v5794_v5  ;;  %2150 = vmatprep.mubr.f32.mxu0 %v7143_v60 }
 0x209   :  { %2295 = vmatprep.mubr.f32.mxu1 %v7143_v60 }
 0x20b   :  { %2152 = vmatmul.mubr.f32.gmra.mxu0 %v5871_v31 }
 0x20c   :  { %2297 = vmatmul.mubr.f32.gmra.mxu1 %v5800_v26  ;;  %2157 = vmatprep.mubr.f32.mxu0 %v7143_v60 }
 0x20d   :  { %2302 = vmatprep.mubr.f32.mxu1 %v7143_v60 }
 0x20f   :  { %2159 = vmatmul.mubr.f32.gmra.mxu0 %v5900_v29 }
 0x210   :  { %2304 = vmatmul.mubr.f32.gmra.mxu1 %v5862_v51  ;;  %2164 = vmatprep.mubr.f32.mxu0 %v7143_v60 }
 0x211   :  { %2309 = vmatprep.mubr.f32.mxu1 %v7143_v60 }
 0x213   :  { %2166 = vmatmul.mubr.f32.gmra.mxu0 %v5917_v1 }
 0x214   :  { %2311 = vmatmul.mubr.f32.gmra.mxu1 %v5871_v31  ;;  %2171 = vmatprep.mubr.f32.mxu0 %v7143_v60 }
 0x215   :  { %2316 = vmatprep.mubr.f32.mxu1 %v7143_v60 }
 0x217   :  { %2173 = vmatmul.mubr.f32.gmra.mxu0 %v5930_v21 }
 0x218   :  { %2318 = vmatmul.mubr.f32.gmra.mxu1 %v5900_v29  ;;  %2178 = vmatprep.mubr.f32.mxu0 %v7143_v60 }
 0x219   :  { %2323 = vmatprep.mubr.f32.mxu1 %v7143_v60 }
 0x21b   :  { %2180 = vmatmul.mubr.f32.gmra.mxu0 %v5949_v10 }
 0x21c   :  { %2325 = vmatmul.mubr.f32.gmra.mxu1 %v5917_v1  ;;  %2185 = vmatprep.mubr.f32.mxu0 %v7143_v60 }
 0x21d   :  { %2330 = vmatprep.mubr.f32.mxu1 %v7143_v60 }
 0x21f   :  { %2187 = vmatmul.mubr.f32.gmra.mxu0 %v5968_v28 }
 0x220   :  { %2332 = vmatmul.mubr.f32.gmra.mxu1 %v5930_v21  ;;  %2192 = vmatprep.mubr.f32.mxu0 %v7143_v60 }
 0x221   :  { %2337 = vmatprep.mubr.f32.mxu1 %v7143_v60 }
 0x223   :  { %2194 = vmatmul.mubr.f32.gmra.mxu0 %v5988_v25 }
 0x224   :  { %2339 = vmatmul.mubr.f32.gmra.mxu1 %v5949_v10  ;;  %2199 = vmatprep.mubr.f32.mxu0 %v7143_v60 }
 0x225   :  { %2344 = vmatprep.mubr.f32.mxu1 %v7143_v60 }
 0x227   :  { %2201 = vmatmul.mubr.f32.gmra.mxu0 %v6008_v23 }
 0x228   :  { %2346 = vmatmul.mubr.f32.gmra.mxu1 %v5968_v28  ;;  %2511 = vmatprep.mubr.f32.mxu0 %v7143_v60 }
 0x229   :  { %2351 = vmatprep.mubr.f32.mxu1 %v7143_v60 }
 0x22c   :  { %2353 = vmatmul.mubr.f32.gmra.mxu1 %v5988_v25 }
 0x22d   :  { %2358 = vmatprep.mubr.f32.mxu1 %v7143_v60 }
 0x230   :  { %2360 = vmatmul.mubr.f32.gmra.mxu1 %v6008_v23 }
 0x231   :  { %2660 = vmatprep.mubr.f32.mxu1 %v7143_v60 }
 0x259   :  { %v1339_v62 = vpop.f32.mrf.mxu0 }
 0x25b   :  { %v6181_v52 = vpop.f32.mrf.mxu0 }
 0x25d   :  { %v1350_v49 = vpop.f32.mrf.mxu0 }
 0x25f   :  { %v6183_v2 = vpop.f32.mrf.mxu0 }
 0x261   :  { %v1582_v14 = vpop.f32.mrf.mxu1 }
 0x262   :  { %v1361_v11 = vpop.f32.mrf.mxu0  ;;  %v1583_v16 = vadd.f32 %v1582_v14, %v1339_v62 }
 0x263   :  { %v6185_v9 = vpop.f32.mrf.mxu1 }
 0x264   :  { %v6187_v58 = vpop.f32.mrf.mxu0 }
 0x267   :  { %v1372_v59 = vpop.f32.mrf.mxu0  ;;  %v1589_v46 = vpop.f32.mrf.mxu1 }
 0x268   :  { %v1590_v45 = vadd.f32 %v1589_v46, %v1350_v49 }
 0x269   :  { %v6189_v5 = vpop.f32.mrf.mxu0  ;;  %v6191_v20 = vpop.f32.mrf.mxu1 }
 0x26b   :  { %v1383_v7 = vpop.f32.mrf.mxu0 }
 0x26c   :  { %v1596_v26 = vpop.f32.mrf.mxu1 }
 0x26d   :  { %v1597_v22 = vadd.f32 %v1596_v26, %v1361_v11  ;;  %v6193_v34 = vpop.f32.mrf.mxu0  ;;  %v1585_v26 = vadd.f32 %v6185_v9, %v6181_v52 }
 0x26e   :  { %v6195_v17 = vpop.f32.mrf.mxu1 }
 0x26f   :  { %v1394_v55 = vpop.f32.mrf.mxu0 }
 0x270   :  { %v1603_v12 = vpop.f32.mrf.mxu1 }
 0x271   :  { %v1604_v43 = vadd.f32 %v1603_v12, %v1372_v59  ;;  %v6197_v61 = vpop.f32.mrf.mxu0 }
 0x272   :  { %v6199_v27 = vpop.f32.mrf.mxu1 }
 0x273   :  { %v1405_v42 = vpop.f32.mrf.mxu0 }
 0x274   :  { %v1610_v37 = vpop.f32.mrf.mxu1 }
 0x275   :  { %v6201_v18 = vadd.f32 %v1610_v37, %v1383_v7  ;;  %v6203_v35 = vpop.f32.mrf.mxu0 }
 0x276   :  { %v6205_v51 = vpop.f32.mrf.mxu1 }
 0x277   :  { %v1416_v54 = vpop.f32.mrf.mxu0 }
 0x278   :  { %v1617_v19 = vpop.f32.mrf.mxu1 }
 0x279   :  { %v6207_v31 = vadd.f32 %v1617_v19, %v1394_v55  ;;  %v1418_v39 = vpop.f32.mrf.mxu0 }
 0x27a   :  { %v6209_v36 = vpop.f32.mrf.mxu1 }
 0x27b   :  { %v1427_v40 = vpop.f32.mrf.mxu0 }
 0x27c   :  { %v1624_v29 = vpop.f32.mrf.mxu1 }
 0x27d   :  { %v6211_v23 = vadd.f32 %v1624_v29, %v1405_v42  ;;  %v1429_v47 = vpop.f32.mrf.mxu0 }
 0x27e   :  { %v6213_v1 = vpop.f32.mrf.mxu1 }
 0x27f   :  { %v1438_v21 = vpop.f32.mrf.mxu0 }
 0x280   :  { %v1631_v0 = vpop.f32.mrf.mxu1 }
 0x281   :  { %v6215_v50 = vadd.f32 %v1631_v0, %v1416_v54  ;;  %v1440_v10 = vpop.f32.mrf.mxu0 }
 0x282   :  { %v1633_v44 = vpop.f32.mrf.mxu1 }
 0x283   :  { %v6217_v6 = vadd.f32 %v1633_v44, %v1418_v39  ;;  %v1449_v28 = vpop.f32.mrf.mxu0 }
 0x284   :  { %v1638_v53 = vpop.f32.mrf.mxu1 }
 0x285   :  { %v6219_v25 = vadd.f32 %v1638_v53, %v1427_v40  ;;  %v1451_v56 = vpop.f32.mrf.mxu0 }
 0x286   :  { %v1640_v41 = vpop.f32.mrf.mxu1 }
 0x287   :  { %v6221_v63 = vadd.f32 %v1640_v41, %v1429_v47  ;;  %v1460_v33 = vpop.f32.mrf.mxu0 }
 0x288   :  { %v1645_v4 = vpop.f32.mrf.mxu1 }
 0x289   :  { %v6223_v13 = vadd.f32 %v1645_v4, %v1438_v21  ;;  %v1462_v8 = vpop.f32.mrf.mxu0 }
 0x28a   :  { %v1647_v57 = vpop.f32.mrf.mxu1 }
 0x28b   :  { %v6225_v32 = vadd.f32 %v1647_v57, %v1440_v10  ;;  %v1752_v3 = vpop.f32.mrf.mxu0 }
 0x28c   :  { %v1652_v24 = vpop.f32.mrf.mxu1  ;;  %v1753_v15 = vadd.f32 %v1752_v3, %v1583_v16 }
 0x28d   :  { %v6227_v48 = vadd.f32 %v1652_v24, %v1449_v28  ;;  %v1754_v30 = vpop.f32.mrf.mxu0 }
 0x28e   :  { %v1654_v38 = vpop.f32.mrf.mxu1  ;;  %v1755_v37 = vadd.f32 %v1754_v30, %v1585_v26 }
 0x28f   :  { %v6229_v62 = vadd.f32 %v1654_v38, %v1451_v56  ;;  %v1760_v49 = vpop.f32.mrf.mxu0 }
 0x290   :  { %v1659_v14 = vpop.f32.mrf.mxu1  ;;  %v1761_v11 = vadd.f32 %v1760_v49, %v1590_v45  ;;  %v1592_v45 = vadd.f32 %v6191_v20, %v6183_v2 }
 0x291   :  { %7220 = vst [vmem:[#allocation6_spill] sm:$0xff] %v6229_v62  ;;  %v6231_v59 = vadd.f32 %v1659_v14, %v1460_v33  ;;  %v1762_v46 = vpop.f32.mrf.mxu0  ;;  %v1606_v33 = vadd.f32 %v6199_v27, %v6189_v5 }
 0x292   :  { %v1661_v7 = vpop.f32.mrf.mxu1  ;;  %v1763_v0 = vadd.f32 %v1762_v46, %v1592_v45  ;;  %v1620_v46 = vadd.f32 %v6209_v36, %v6197_v61 }
 0x293   :  { %7221 = vst [vmem:[#allocation5_spill] sm:$0xff] %v6231_v59  ;;  %v6235_v55 = vadd.f32 %v1661_v7, %v1462_v8  ;;  %v1768_v12 = vpop.f32.mrf.mxu0 }
 0x294   :  { %v1769_v16 = vadd.f32 %v1768_v12, %v1597_v22  ;;  %v1924_v42 = vpop.f32.mrf.mxu1  ;;  %v1599_v22 = vadd.f32 %v6195_v17, %v6187_v58 }
 0x295   :  { %7222 = vst [vmem:[#allocation9_spill] sm:$0xff] %v6235_v55  ;;  %v6237_v54 = vadd.f32 %v1924_v42, %v1753_v15  ;;  %v1770_v19 = vpop.f32.mrf.mxu0  ;;  %v1613_v15 = vadd.f32 %v6205_v51, %v6193_v34  ;;  %v1627_v42 = vadd.f32 %v6213_v1, %v6203_v35 }
 0x296   :  { %v1926_v39 = vpop.f32.mrf.mxu1  ;;  %v1771_v2 = vadd.f32 %v1770_v19, %v1599_v22 }
 0x297   :  { %v6241_v40 = vadd.f32 %v1926_v39, %v1755_v37  ;;  %v1776_v29 = vpop.f32.mrf.mxu0 }
 0x298   :  { %v1777_v47 = vadd.f32 %v1776_v29, %v1604_v43  ;;  %v1933_v21 = vpop.f32.mrf.mxu1 }
 0x299   :  { %v6243_v52 = vadd.f32 %v1933_v21, %v1761_v11  ;;  %v1778_v9 = vpop.f32.mrf.mxu0 }
 0x29a   :  { %v1935_v10 = vpop.f32.mrf.mxu1  ;;  %v1779_v17 = vadd.f32 %v1778_v9, %v1606_v33 }
 0x29b   :  { %v6247_v44 = vadd.f32 %v1935_v10, %v1763_v0  ;;  %v1784_v28 = vpop.f32.mrf.mxu0 }
 0x29c   :  { %v1785_v53 = vadd.f32 %v1784_v28, %v6201_v18  ;;  %v1942_v56 = vpop.f32.mrf.mxu1 }
 0x29d   :  { %v6250_v20 = vadd.f32 %v1942_v56, %v1769_v16  ;;  %v1786_v41 = vpop.f32.mrf.mxu0 }
 0x29e   :  { %v1944_v43 = vpop.f32.mrf.mxu1  ;;  %v1787_v27 = vadd.f32 %v1786_v41, %v1613_v15 }
 0x29f   :  { %v6254_v4 = vadd.f32 %v1944_v43, %v1771_v2  ;;  %v1792_v8 = vpop.f32.mrf.mxu0 }
 0x2a0   :  { %v1793_v57 = vadd.f32 %v1792_v8, %v6207_v31  ;;  %v1951_v58 = vpop.f32.mrf.mxu1 }
 0x2a1   :  { %v6257_v3 = vadd.f32 %v1951_v58, %v1777_v47  ;;  %v1794_v24 = vpop.f32.mrf.mxu0 }
 0x2a2   :  { %v1953_v18 = vpop.f32.mrf.mxu1  ;;  %v1795_v34 = vadd.f32 %v1794_v24, %v1620_v46 }
 0x2a3   :  { %v6261_v30 = vadd.f32 %v1953_v18, %v1779_v17  ;;  %v1800_v38 = vpop.f32.mrf.mxu0 }
 0x2a4   :  { %v1801_v49 = vadd.f32 %v1800_v38, %v6211_v23  ;;  %v1960_v5 = vpop.f32.mrf.mxu1 }
 0x2a5   :  { %7223 = vst [vmem:[#allocation7_spill] sm:$0xff] %v6261_v30  ;;  %v6264_v14 = vadd.f32 %v1960_v5, %v1785_v53  ;;  %v1802_v11 = vpop.f32.mrf.mxu0 }
 0x2a6   :  { %v1962_v31 = vpop.f32.mrf.mxu1  ;;  %v1803_v36 = vadd.f32 %v1802_v11, %v1627_v42 }
 0x2a7   :  { %v6268_v7 = vadd.f32 %v1962_v31, %v1787_v27  ;;  %v6270_v26 = vpop.f32.mrf.mxu0 }
 0x2a8   :  { %v1969_v12 = vpop.f32.mrf.mxu1 }
 0x2a9   :  { %v6272_v51 = vadd.f32 %v1969_v12, %v1793_v57  ;;  %v6274_v16 = vpop.f32.mrf.mxu0 }
 0x2aa   :  { %v1971_v23 = vpop.f32.mrf.mxu1 }
 0x2ab   :  { %v6278_v37 = vadd.f32 %v1971_v23, %v1795_v34  ;;  %v1816_v19 = vpop.f32.mrf.mxu0 }
 0x2ac   :  { %v1817_v39 = vadd.f32 %v1816_v19, %v6219_v25  ;;  %v1978_v61 = vpop.f32.mrf.mxu1 }
 0x2ad   :  { %v6281_v45 = vadd.f32 %v1978_v61, %v1801_v49  ;;  %v6283_v29 = vpop.f32.mrf.mxu0 }
 0x2ae   :  { %v1980_v47 = vpop.f32.mrf.mxu1 }
 0x2af   :  { %v6285_v21 = vadd.f32 %v1980_v47, %v1803_v36  ;;  %v6287_v0 = vpop.f32.mrf.mxu0 }
 0x2b0   :  { %v6289_v9 = vpop.f32.mrf.mxu1 }
 0x2b1   :  { %v6291_v10 = vpop.f32.mrf.mxu0 }
 0x2b2   :  { %v6293_v35 = vpop.f32.mrf.mxu1 }
 0x2b3   :  { %v6295_v1 = vpop.f32.mrf.mxu0 }
 0x2b4   :  { %v1996_v25 = vpop.f32.mrf.mxu1 }
 0x2b5   :  { %v6297_v22 = vadd.f32 %v1996_v25, %v1817_v39  ;;  %v6299_v28 = vpop.f32.mrf.mxu0 }
 0x2b6   :  { %7225 = vst [vmem:[#allocation10_spill] sm:$0xff] %v6299_v28  ;;  %v6301_v53 = vpop.f32.mrf.mxu1 }
 0x2b7   :  { %7224 = vst [vmem:[#allocation8_spill] sm:$0xff] %v6297_v22  ;;  %7226 = vst [vmem:[#allocation11_spill] sm:$0xff] %v6301_v53  ;;  %v6303_v56 = vpop.f32.mrf.mxu0 }
 0x2b8   :  { %7227 = vst [vmem:[#allocation12_spill] sm:$0xff] %v6303_v56  ;;  %v6305_v2 = vpop.f32.mrf.mxu1 }
 0x2b9   :  { %v6307_v41 = vpop.f32.mrf.mxu0 }
 0x2ba   :  { %7228 = vst [vmem:[#allocation13_spill] sm:$0xff] %v6307_v41  ;;  %v6309_v43 = vpop.f32.mrf.mxu1 }
 0x2bb   :  { %7229 = vst [vmem:[#allocation14_spill] sm:$0xff] %v6309_v43  ;;  %v2125_v33 = vpop.f32.mrf.mxu0 }
 0x2bc   :  { %v6311_v8 = vpop.f32.mrf.mxu1  ;;  %v2126_v30 = vadd.f32 %v2125_v33, %v6237_v54 }
 0x2bd   :  { %7230 = vst [vmem:[#allocation15_spill] sm:$0xff] %v6311_v8  ;;  %v2127_v57 = vpop.f32.mrf.mxu0 }
 0x2be   :  { %v6313_v58 = vpop.f32.mrf.mxu1  ;;  %v2128_v55 = vadd.f32 %v2127_v57, %v6241_v40 }
 0x2bf   :  { %7231 = vst [vmem:[#allocation16_spill] sm:$0xff] %v6313_v58  ;;  %v2132_v17 = vpop.f32.mrf.mxu0 }
 0x2c0   :  { %v6315_v24 = vpop.f32.mrf.mxu1  ;;  %v2133_v58 = vadd.f32 %v2132_v17, %v6243_v52 }
 0x2c1   :  { %7232 = vst [vmem:[#allocation17_spill] sm:$0xff] %v6315_v24  ;;  %v2134_v18 = vpop.f32.mrf.mxu0 }
 0x2c2   :  { %v6317_v15 = vpop.f32.mrf.mxu1  ;;  %v2135_v59 = vadd.f32 %v2134_v18, %v6247_v44 }
 0x2c3   :  { %7233 = vst [vmem:[#allocation18_spill] sm:$0xff] %v6317_v15  ;;  %v2139_v38 = vpop.f32.mrf.mxu0 }
 0x2c4   :  { %v2284_v49 = vpop.f32.mrf.mxu1 }
 0x2c5   :  { %v2141_v5 = vpop.f32.mrf.mxu0  ;;  %v2285_v22 = vadd.f32 %v2284_v49, %v2126_v30  ;;  %v1809_v30 = vadd.f32 %v6270_v26, %v6215_v50  ;;  %v7236_v49 = vld [vmem:[#allocation11_spill] sm:$0xff] }
 0x2c6   :  { %v2286_v27 = vpop.f32.mrf.mxu1  ;;  %v2142_v53 = vadd.f32 %v2141_v5, %v6254_v4 }
 0x2c7   :  { %v2146_v11 = vpop.f32.mrf.mxu0  ;;  %v2287_v8 = vadd.f32 %v2286_v27, %v2128_v55  ;;  %4613 = vtanh.f32 %v2285_v22  ;;  %v7237_v27 = vld [vmem:[#allocation14_spill] sm:$0xff] }
 0x2c8   :  { %v2291_v31 = vpop.f32.mrf.mxu1  ;;  %v2147_v40 = vadd.f32 %v2146_v11, %v6257_v3  ;;  %v1819_v3 = vadd.f32 %v6283_v29, %v6221_v63  ;;  %v7238_v11 = vld [vmem:[#allocation6_spill] sm:$0xff] }
 0x2c9   :  { %v6319_v46 = vpop.f32.mrf.mxu0  ;;  %v2292_v62 = vadd.f32 %v2291_v31, %v2133_v58  ;;  %4615 = vtanh.f32 %v2287_v8  ;;  %v1811_v58 = vadd.f32 %v6274_v16, %v6217_v6  ;;  %v7239_v31 = vld [vmem:[#allocation10_spill] sm:$0xff] }
 0x2ca   :  { %7234 = vst [vmem:[#allocation19_spill] sm:$0xff] %v6319_v46  ;;  %v2293_v12 = vpop.f32.mrf.mxu1  ;;  %v1999_v5 = vadd.f32 %v7236_v49, %v1819_v3 }
 0x2cb   :  { %v2153_v34 = vpop.f32.mrf.mxu0  ;;  %v2294_v54 = vadd.f32 %v2293_v12, %v2135_v59  ;;  %4617 = vtanh.f32 %v2292_v62  ;;  %v1990_v29 = vadd.f32 %v6293_v35, %v1811_v58  ;;  %v1833_v35 = vadd.f32 %v6295_v1, %v6227_v48  ;;  %v7240_v12 = vld [vmem:[#allocation15_spill] sm:$0xff] }
 0x2cc   :  { %v2298_v23 = vpop.f32.mrf.mxu1  ;;  %v2154_v55 = vadd.f32 %v2153_v34, %v6264_v14  ;;  %v1825_v14 = vadd.f32 %v6287_v0, %v6223_v13  ;;  %v1827_v13 = vadd.f32 %v6291_v10, %v6225_v32 }
 0x2cd   :  { %v2155_v42 = vpop.f32.mrf.mxu0  ;;  %4619 = vtanh.f32 %v2294_v54  ;;  %v2015_v34 = vadd.f32 %v7240_v12, %v1833_v35 }
 0x2ce   :  { %v2300_v19 = vpop.f32.mrf.mxu1  ;;  %v2156_v59 = vadd.f32 %v2155_v42, %v6268_v7  ;;  %v1988_v7 = vadd.f32 %v6289_v9, %v1809_v30  ;;  %v2006_v9 = vadd.f32 %v6305_v2, %v1825_v14  ;;  %v2008_v32 = vadd.f32 %v7237_v27, %v1827_v13  ;;  %v7241_v42 = vld [vmem:[#allocation5_spill] sm:$0xff] }
 0x2cf   :  { %v2160_v39 = vpop.f32.mrf.mxu0  ;;  %v2301_v44 = vadd.f32 %v2300_v19, %v2142_v53  ;;  %v1835_v2 = vadd.f32 %v7239_v31, %v7238_v11  ;;  %v7242_v19 = vld [vmem:[#allocation12_spill] sm:$0xff] }
 0x2d0   :  { %v2305_v61 = vpop.f32.mrf.mxu1  ;;  %v2161_v17 = vadd.f32 %v2160_v39, %v6272_v51  ;;  %v1841_v39 = vadd.f32 %v7242_v19, %v7241_v42  ;;  %v2415_v42 = vld [vmem:[%s7106_s4 + $0x8] sm:$0xff] }
 0x2d1   :  { %v2162_v36 = vpop.f32.mrf.mxu0  ;;  %v2306_v4 = vadd.f32 %v2305_v61, %v2147_v40  ;;  %v7243_v61 = vld [vmem:[#allocation8_spill] sm:$0xff] }
 0x2d2   :  { %v6321_v47 = vpop.f32.mrf.mxu1  ;;  %v2163_v53 = vadd.f32 %v2162_v36, %v6278_v37  ;;  %v7244_v40 = vld [vmem:[#allocation16_spill] sm:$0xff] }
 0x2d3   :  { %7235 = vst [vmem:[#allocation20_spill] sm:$0xff] %v6321_v47  ;;  %v2167_v25 = vpop.f32.mrf.mxu0  ;;  %v2140_v47 = vadd.f32 %v2139_v38, %v6250_v20 }
 0x2d4   :  { %v2312_v60 = vpop.f32.mrf.mxu1  ;;  %v2168_v16 = vadd.f32 %v2167_v25, %v6281_v45 }
 0x2d5   :  { %v2169_v15 = vpop.f32.mrf.mxu0  ;;  %v2299_v57 = vadd.f32 %v2298_v23, %v2140_v47  ;;  %v2313_v50 = vadd.f32 %v2312_v60, %v2154_v55  ;;  %v6358_v23 = vpop.eup %4613 }
 0x2d6   :  { %v2314_v24 = vpop.f32.mrf.mxu1  ;;  %v2170_v60 = vadd.f32 %v2169_v15, %v6285_v21 }
 0x2d7   :  { %v2174_v41 = vpop.f32.mrf.mxu0  ;;  %4621 = vtanh.f32 %v2299_v57  ;;  %v2315_v6 = vadd.f32 %v2314_v24, %v2156_v59  ;;  %v2017_v57 = vadd.f32 %v7244_v40, %v1835_v2  ;;  %v7247_v59 = vld [vmem:[#allocation7_spill] sm:$0xff] }
 0x2d8   :  { %v2319_v46 = vpop.f32.mrf.mxu1  ;;  %4623 = vtanh.f32 %v2301_v44  ;;  %v2175_v37 = vadd.f32 %v2174_v41, %v1988_v7  ;;  %v7245_v44 = vld [vmem:[#allocation9_spill] sm:$0xff] }
 0x2d9   :  { %v2176_v56 = vpop.f32.mrf.mxu0  ;;  %v2320_v8 = vadd.f32 %v2319_v46, %v2161_v17  ;;  %4625 = vtanh.f32 %v2306_v4  ;;  %v7248_v4 = vld [vmem:[#allocation19_spill] sm:$0xff] }
 0x2da   :  { %v2321_v28 = vpop.f32.mrf.mxu1  ;;  %4627 = vtanh.f32 %v2313_v50  ;;  %v2177_v45 = vadd.f32 %v2176_v56, %v1990_v29  ;;  %v7249_v50 = vld [vmem:[#allocation17_spill] sm:$0xff]  ;;  %v7251_v29 = vld [vmem:[#allocation18_spill] sm:$0xff] }
 0x2db   :  { %v6328_v43 = vpop.f32.mrf.mxu0  ;;  %v2322_v51 = vadd.f32 %v2321_v28, %v2163_v53  ;;  %4629 = vtanh.f32 %v2315_v6 }
 0x2dc   :  { %v2326_v33 = vpop.f32.mrf.mxu1  ;;  %4631 = vtanh.f32 %v2320_v8  ;;  %v2182_v36 = vadd.f32 %v6328_v43, %v7243_v61 }
 0x2dd   :  { %v2183_v52 = vpop.f32.mrf.mxu0  ;;  %v2327_v0 = vadd.f32 %v2326_v33, %v2168_v16  ;;  %4633 = vtanh.f32 %v2322_v51  ;;  %v4616_v33 = vpop.eup %4615 }
 0x2de   :  { %v2328_v20 = vpop.f32.mrf.mxu1  ;;  %v2184_v56 = vadd.f32 %v2183_v52, %v1999_v5  ;;  %v4618_v55 = vpop.eup %4617 }
 0x2df   :  { %v2188_v22 = vpop.f32.mrf.mxu0  ;;  %v2329_v38 = vadd.f32 %v2328_v20, %v2170_v60  ;;  %4635 = vtanh.f32 %v2327_v0  ;;  %v7246_v20 = vld [vmem:[#allocation13_spill] sm:$0xff]  ;;  %v4620_v17 = vpop.eup %4619 }
 0x2e0   :  { %v2333_v26 = vpop.f32.mrf.mxu1  ;;  %v2189_v10 = vadd.f32 %v2188_v22, %v2006_v9  ;;  %v1843_v58 = vadd.f32 %v7246_v20, %v7245_v44  ;;  %v2149_v22 = vadd.f32 %v7248_v4, %v7247_v59 }
 0x2e1   :  { %v2190_v62 = vpop.f32.mrf.mxu0  ;;  %v2334_v21 = vadd.f32 %v2333_v26, %v2175_v37  ;;  %4637 = vtanh.f32 %v2329_v38  ;;  %v2024_v26 = vadd.f32 %v7249_v50, %v1841_v39 }
 0x2e2   :  { %v2335_v63 = vpop.f32.mrf.mxu1  ;;  %v2191_v48 = vadd.f32 %v2190_v62, %v2008_v32  ;;  %v7250_v62 = vld [vmem:[#allocation20_spill] sm:$0xff]  ;;  %v2026_v60 = vadd.f32 %v7251_v29, %v1843_v58 }
 0x2e3   :  { %v2195_v18 = vpop.f32.mrf.mxu0  ;;  %v2336_v41 = vadd.f32 %v2335_v63, %v2177_v45  ;;  %4639 = vtanh.f32 %v2334_v21  ;;  %v2308_v7 = vadd.f32 %v7250_v62, %v2149_v22 }
 0x2e4   :  { %v2340_v24 = vpop.f32.mrf.mxu1  ;;  %v2196_v52 = vadd.f32 %v2195_v18, %v2015_v34  ;;  %v4622_v6 = vpop.eup %4621 }
 0x2e5   :  { %v2197_v28 = vpop.f32.mrf.mxu0  ;;  %4641 = vtanh.f32 %v2336_v41  ;;  %v2341_v3 = vadd.f32 %v2340_v24, %v2182_v36  ;;  %v4624_v63 = vpop.eup %4623 }
 0x2e6   :  { %v2342_v15 = vpop.f32.mrf.mxu1  ;;  %v2198_v14 = vadd.f32 %v2197_v28, %v2017_v57  ;;  %v4626_v13 = vpop.eup %4625 }
 0x2e7   :  { %v2343_v47 = vadd.f32 %v2342_v15, %v2184_v56  ;;  %v2202_v25 = vpop.f32.mrf.mxu0  ;;  %v6372_v0 = vpop.eup %4627  ;;  %v2414_v15 = vld [vmem:[%s7106_s4] sm:$0xff] }
 0x2e8   :  { %v2347_v46 = vpop.f32.mrf.mxu1  ;;  %v2203_v51 = vadd.f32 %v2202_v25, %v2024_v26  ;;  %7252 = vst [vmem:[#allocation11_spill] sm:$0xff] %v6372_v0  ;;  %v6374_v45 = vpop.eup %4629  ;;  %v2428_v41 = vsel %vm2426_vm2, %v2414_v15, 0 }
 0x2e9   :  { %v2348_v1 = vadd.f32 %v2347_v46, %v2189_v10  ;;  %v2204_v16 = vpop.f32.mrf.mxu0  ;;  %7253 = vst [vmem:[#allocation14_spill] sm:$0xff] %v6374_v45  ;;  %v6376_v35 = vpop.eup %4631 }
 0x2ea   :  { %v2349_v54 = vpop.f32.mrf.mxu1  ;;  %v2205_v24 = vadd.f32 %v2204_v16, %v2026_v60  ;;  %7254 = vst [vmem:[#allocation6_spill] sm:$0xff] %v6376_v35  ;;  %v6378_v5 = vpop.eup %4633  ;;  %v6399_v46 = vsub.f32 %v4618_v55, %v6376_v35 }
 0x2eb   :  { %v2350_v30 = vadd.f32 %v2349_v54, %v2191_v48  ;;  %4643 = vtanh.f32 %v2348_v1  ;;  %v6393_v31 = vsub.f32 %v4620_v17, %v6378_v5  ;;  %v6403_v48 = vsub.f32 %v4616_v33, %v6374_v45 }
 0x2ec   :  { %v2354_v43 = vpop.f32.mrf.mxu1  ;;  %v6380_v21 = vpop.eup %4635  ;;  %v6405_v1 = vand.u32 4294901760, %v2428_v41  ;;  %v6418_v54 = vsub.f32 %v6358_v23, %v6372_v0 }
 0x2ed   :  { %4645 = vtanh.f32 %v2350_v30  ;;  %v2355_v53 = vadd.f32 %v2354_v43, %v2196_v52  ;;  %v6396_v56 = vsub.f32 %v4622_v6, %v6380_v21  ;;  %v2431_v30 = vsel %vm2426_vm2, %v2415_v42, 0 }
 0x2ee   :  { %4647 = vtanh.f32 %v2343_v47  ;;  %v2356_v8 = vpop.f32.mrf.mxu1  ;;  %v6382_v28 = vpop.eup %4637  ;;  %v6433_v23 = vsub.f32 %v2428_v41, %v6405_v1  ;;  %v6451_v50 = vand.u32 4294901760, %v2431_v30 }
 0x2ef   :  { %4649 = vtanh.f32 %v2355_v53  ;;  %v2357_v18 = vadd.f32 %v2356_v8, %v2198_v14  ;;  %7255 = vst [vmem:[#allocation10_spill] sm:$0xff] %v6382_v28  ;;  %v6411_v39 = vsub.f32 %v4624_v63, %v6382_v28 }
 0x2f0   :  { %4651 = vtanh.f32 %v2341_v3  ;;  %v2361_v37 = vpop.f32.mrf.mxu1  ;;  %v6387_v27 = vpop.eup %4639  ;;  %v2416_v3 = vld [vmem:[%s7106_s4 + $0x10] sm:$0xff]  ;;  %v7145_v16 = vand.u32 4294901760, %v6433_v23 }
 0x2f1   :  { %4653 = vtanh.f32 %v2357_v18  ;;  %v2362_v9 = vadd.f32 %v2361_v37, %v2203_v51  ;;  %7256 = vst [vmem:[#allocation15_spill] sm:$0xff] %v6387_v27  ;;  %v6421_v40 = vsub.f32 %v4626_v13, %v6387_v27  ;;  %v2434_v8 = vsel %vm2426_vm2, %v2416_v3, 0  ;;  %v2417_v18 = vld [vmem:[%s7106_s4 + $0x18] sm:$0xff] }
 0x2f2   :  { %4655 = vtanh.f32 %v2308_v7  ;;  %v2363_v38 = vpop.f32.mrf.mxu1  ;;  %v6389_v32 = vpop.eup %4641  ;;  %v6491_v37 = vsub.f32 %v2431_v30, %v6451_v50 }
 0x2f3   :  { %4657 = vtanh.f32 %v2362_v9  ;;  %v2364_v49 = vadd.f32 %v2363_v38, %v2205_v24  ;;  %7257 = vst [vmem:[#allocation5_spill] sm:$0xff] %v6389_v32  ;;  %7258 = vst [vmem:[#allocation12_spill] sm:$0xff] %v6421_v40 }
 0x2f5   :  { %4659 = vtanh.f32 %v2364_v49  ;;  %v6504_v49 = vand.u32 4294901760, %v2434_v8 }
 0x2f8   :  { %v4644_v10 = vpop.eup %4643 }
 0x2f9   :  { %v2400_v36 = vmul.f32 %v4644_v10, %v6399_v46  ;;  %v2515_v10 = vsub.f32 %v6433_v23, %v7145_v16 }
 0x2fa   :  { %v4646_v11 = vpop.eup %4645 }
 0x2fb   :  { %v4648_v2 = vpop.eup %4647  ;;  %v2401_v34 = vmul.f32 %v4646_v11, %v6393_v31  ;;  %v6443_v22 = vadd.f32 %v6376_v35, %v2400_v36  ;;  %v2437_v11 = vsel %vm2426_vm2, %v2417_v18, 0 }
 0x2fc   :  { %v4650_v12 = vpop.eup %4649  ;;  %v2399_v25 = vmul.f32 %v4648_v2, %v6403_v48 }
 0x2fd   :  { %v4652_v19 = vpop.eup %4651  ;;  %v2402_v61 = vmul.f32 %v4650_v12, %v6396_v56  ;;  %v6429_v44 = vadd.f32 %v6378_v5, %v2401_v34  ;;  %v6478_v60 = vand.u32 4294901760, %v6443_v22 }
 0x2fe   :  { %v4654_v47 = vpop.eup %4653  ;;  %v2398_v20 = vmul.f32 %v4652_v19, %v6418_v54  ;;  %v6449_v17 = vadd.f32 %v6374_v45, %v2399_v25  ;;  %v7148_v19 = vand.u32 4294901760, %v6491_v37  ;;  %v6538_v25 = vsub.f32 %v2434_v8, %v6504_v49 }
 0x2ff   :  { %v4656_v33 = vpop.eup %4655  ;;  %v2403_v57 = vmul.f32 %v4654_v47, %v6411_v39  ;;  %v6425_v52 = vadd.f32 %v6380_v21, %v2402_v61  ;;  %v6464_v62 = vand.u32 4294901760, %v6429_v44  ;;  %v6526_v42 = vsub.f32 %v6443_v22, %v6478_v60 }
 0x300   :  { %v4658_v55 = vpop.eup %4657  ;;  %v6436_v58 = vsub.f32 %v4656_v33, %v6389_v32  ;;  %v6467_v7 = vadd.f32 %v6372_v0, %v2398_v20  ;;  %v6488_v13 = vand.u32 4294901760, %v6449_v17  ;;  %v6540_v33 = vand.u32 4294901760, %v2437_v11 }
 0x301   :  { %v2404_v59 = vmul.f32 %v4658_v55, %v6421_v40  ;;  %v6440_v4 = vadd.f32 %v6382_v28, %v2403_v57  ;;  %v6461_v6 = vand.u32 4294901760, %v6425_v52  ;;  %v6514_v41 = vsub.f32 %v6429_v44, %v6464_v62 }
 0x302   :  { %7259 = vst [vmem:[#allocation8_spill] sm:$0xff] %v6436_v58  ;;  %v4660_v43 = vpop.eup %4659  ;;  %v6507_v15 = vand.u32 4294901760, %v6467_v7  ;;  %v6532_v61 = vsub.f32 %v6449_v17, %v6488_v13  ;;  %v2516_v20 = vand.u32 4294901760, %v2515_v10 }
 0x303   :  { %v2405_v26 = vmul.f32 %v4660_v43, %v6436_v58  ;;  %v6455_v14 = vadd.f32 %v6387_v27, %v2404_v59  ;;  %v6458_v53 = vand.u32 4294901760, %v6440_v4  ;;  %v6502_v38 = vsub.f32 %v6425_v52, %v6461_v6 }
 0x304   :  { %v7150_v30 = vand.u32 4294901760, %v6514_v41  ;;  %v6549_v55 = vsub.f32 %v6467_v7, %v6507_v15  ;;  %v7151_v43 = vand.u32 4294901760, %v6526_v42  ;;  %v7261_v16 = vand.u32 4294901760, %v6532_v61 }
 0x305   :  { %v6472_v63 = vadd.f32 %v6389_v32, %v2405_v26  ;;  %v6475_v29 = vand.u32 4294901760, %v6455_v14  ;;  %v6482_v51 = vsub.f32 %v6440_v4, %v6458_v53  ;;  %v7149_v47 = vand.u32 4294901760, %v6502_v38 }
 0x306   :  { %v2526_v26 = vsub.f32 %v6491_v37, %v7148_v19  ;;  %v2607_v19 = vsub.f32 %v6514_v41, %v7150_v30  ;;  %v2624_v8 = vand.u32 4294901760, %v6549_v55 }
 0x307   :  { %7260 = vst [vmem:[#allocation16_spill] sm:$0xff] %v6472_v63  ;;  %v6494_v24 = vand.u32 4294901760, %v6472_v63  ;;  %v6498_v9 = vsub.f32 %v6455_v14, %v6475_v29  ;;  %v7146_v34 = vand.u32 4294901760, %v6482_v51  ;;  %v2601_v10 = vsub.f32 %v6502_v38, %v7149_v47 }
 0x308   :  { %v2613_v47 = vsub.f32 %v6526_v42, %v7151_v43  ;;  %v7263_v43 = vmov 0.0  }
 0x309   :  { %2464 = vmatprep.subr.mxu0 %v6494_v24  ;;  %v6520_v2 = vsub.f32 %v6472_v63, %v6494_v24  ;;  %v7147_v12 = vand.u32 4294901760, %v6498_v9  ;;  %v2595_v3 = vsub.f32 %v6482_v51, %v7146_v34  ;;  %v6568_v34 = vsub.f32 %v2437_v11, %v6540_v33 }
 0x30a   :  { %2466 = vmatpush1.msra.mxu0 %v6475_v29  ;;  %v2527_v11 = vand.u32 4294901760, %v2526_v26  ;;  %v2602_v30 = vand.u32 4294901760, %v2601_v10 }
 0x30b   :  { %2468 = vmatprep.subr.mxu0 %v6458_v53  ;;  %v2582_v36 = vand.u32 4294901760, %v6520_v2  ;;  %v2589_v57 = vsub.f32 %v6498_v9, %v7147_v12 }
 0x30c   :  { %2470 = vmatpush1.msra.mxu0 %v6461_v6 }
 0x30d   :  { %2472 = vmatprep.subr.mxu0 %v6464_v62  ;;  %v2583_v59 = vsub.f32 %v6520_v2, %v2582_v36  ;;  %v2590_v12 = vand.u32 4294901760, %v2589_v57  ;;  %v2619_v57 = vsub.f32 %v6532_v61, %v7261_v16  ;;  %v2614_v16 = vand.u32 4294901760, %v2613_v47 }
 0x30e   :  { %2474 = vmatpush1.msra.mxu0 %v6478_v60 }
 0x30f   :  { %2476 = vmatprep.subr.mxu0 %v6488_v13  ;;  %v2584_v18 = vand.u32 4294901760, %v2583_v59  ;;  %v2596_v59 = vand.u32 4294901760, %v2595_v3  ;;  %v2620_v26 = vand.u32 4294901760, %v2619_v57  ;;  %v7267_v57 = vand.u32 4294901760, %v6514_v41 }
 0x310   :  { %2478 = vmatpush1.msra.mxu0 %v6507_v15 }
 0x311   :  { %2517 = vmatmul.mubr.f32.vlgmr.msra.gmra.mxu0 %v2516_v20  ;;  %2585 = vmatprep.subr.mxu1 %v2584_v18  ;;  %v7262_v20 = vand.u32 4294901760, %v6538_v25  ;;  %v2547_v18 = vand.u32 4294901760, %v6568_v34 }
 0x312   :  { %2715 = vmatprep.subr.mxu0 %v6520_v2  ;;  %2591 = vmatpush1.msra.mxu1 %v2590_v12  ;;  %v2608_v2 = vand.u32 4294901760, %v2607_v19  ;;  %v2625_v12 = vsub.f32 %v6549_v55, %v2624_v8 }
 0x313   :  { %2718 = vmatpush1.msra.mxu0 %v6498_v9  ;;  %2597 = vmatprep.subr.mxu1 %v2596_v59  ;;  %v2537_v3 = vsub.f32 %v6538_v25, %v7262_v20  ;;  %v2548_v59 = vsub.f32 %v6568_v34, %v2547_v18 }
 0x314   :  { %2721 = vmatprep.subr.mxu0 %v6482_v51  ;;  %2522 = vmatprep.mubr.f32.mxu0 %v7263_v43  ;;  %v2626_v19 = vand.u32 4294901760, %v2625_v12 }
 0x315   :  { %2603 = vmatpush1.msra.mxu1 %v2602_v30  ;;  %2724 = vmatpush1.msra.mxu0 %v6502_v38  ;;  %v2538_v10 = vand.u32 4294901760, %v2537_v3  ;;  %v2549_v47 = vand.u32 4294901760, %v2548_v59  ;;  %v7265_v30 = vand.u32 4294901760, %v6482_v51  ;;  %v7270_v51 = vand.u32 4294901760, %v6433_v23  ;;  %v2418_v59 = vld [vmem:[%s7107_s5] sm:$0xff] }
 0x316   :  { %2528 = vmatmul.mubr.f32.gmra.mxu0 %v2527_v11  ;;  %2609 = vmatprep.subr.mxu1 %v2608_v2  ;;  %v7266_v11 = vand.u32 4294901760, %v6502_v38  ;;  %v7271_v38 = vand.u32 4294901760, %v6491_v37 }
 0x317   :  { %2727 = vmatprep.subr.mxu0 %v6514_v41  ;;  %2615 = vmatpush1.msra.mxu1 %v2614_v16 }
 0x318   :  { %2730 = vmatpush1.msra.mxu0 %v6526_v42  ;;  %2621 = vmatprep.subr.mxu1 %v2620_v26  ;;  %v2420_v26 = vld [vmem:[%s7107_s5 + $0x10] sm:$0xff] }
 0x319   :  { %2733 = vmatprep.subr.mxu0 %v6532_v61  ;;  %2533 = vmatprep.mubr.f32.mxu0 %v7263_v43 }
 0x31a   :  { %2627 = vmatpush1.msra.mxu1 %v2626_v19  ;;  %2736 = vmatpush1.msra.mxu0 %v6549_v55  ;;  %v2419_v19 = vld [vmem:[%s7107_s5 + $0x8] sm:$0xff] }
 0x31b   :  { %2539 = vmatmul.mubr.f32.gmra.mxu0 %v2538_v10  ;;  %2662 = vmatmul.mubr.f32.vlgmr.msra.gmra.mxu1 %v6405_v1 }
 0x31c   :  { %2827 = vmatprep.subr.mxu1 %v6494_v24  ;;  %2938 = vmatprep.subr.mxu0 %v2582_v36  ;;  %v7264_v36 = vand.u32 4294901760, %v6498_v9  ;;  %v7268_v9 = vand.u32 4294901760, %v6526_v42 }
 0x31d   :  { %2829 = vmatpush1.msra.mxu1 %v6475_v29  ;;  %2544 = vmatprep.mubr.f32.mxu0 %v7263_v43 }
 0x31e   :  { %2831 = vmatprep.subr.mxu1 %v6458_v53  ;;  %2667 = vmatprep.mubr.f32.mxu1 %v7263_v43 }
 0x31f   :  { %2833 = vmatpush1.msra.mxu1 %v6461_v6  ;;  %2550 = vmatmul.mubr.f32.gmra.mxu0 %v2549_v47 }
 0x320   :  { %2669 = vmatmul.mubr.f32.gmra.mxu1 %v6451_v50  ;;  %2835 = vmatprep.subr.mxu1 %v6464_v62 }
 0x321   :  { %2837 = vmatpush1.msra.mxu1 %v6478_v60  ;;  %2674 = vmatprep.mubr.f32.mxu1 %v7263_v43 }
 0x322   :  { %2839 = vmatprep.subr.mxu1 %v6488_v13  ;;  %2769 = vmatprep.mubr.f32.mxu0 %v7263_v43 }
 0x323   :  { %2841 = vmatpush1.msra.mxu1 %v6507_v15  ;;  %2772 = vmatmul.mubr.f32.vlgmr.msra.gmra.mxu0 %v6433_v23  ;;  %v7272_v23 = vmov %v7262_v20 }
 0x324   :  { %2676 = vmatmul.mubr.f32.gmra.mxu1 %v6504_v49  ;;  %2942 = vmatpush1.msra.mxu0 %v7264_v36 }
 0x325   :  { %3053 = vmatprep.subr.mxu1 %v6494_v24  ;;  %2946 = vmatprep.subr.mxu0 %v7265_v30  ;;  %v7269_v24 = vand.u32 4294901760, %v6532_v61 }
 0x326   :  { %2950 = vmatpush1.msra.mxu0 %v7266_v11  ;;  %2681 = vmatprep.mubr.f32.mxu1 %v7263_v43 }
 0x327   :  { %2954 = vmatprep.subr.mxu0 %v7267_v57  ;;  %2777 = vmatprep.mubr.f32.mxu0 %v7263_v43 }
 0x328   :  { %2683 = vmatmul.mubr.f32.gmra.mxu1 %v6540_v33  ;;  %2958 = vmatpush1.msra.mxu0 %v7268_v9 }
 0x329   :  { %2962 = vmatprep.subr.mxu0 %v7269_v24  ;;  %2874 = vmatprep.mubr.f32.mxu1 %v7263_v43  ;;  %v2421_v24 = vld [vmem:[%s7107_s5 + $0x18] sm:$0xff] }
 0x32a   :  { %2966 = vmatpush1.msra.mxu0 %v2624_v8 }
 0x32b   :  { %2780 = vmatmul.mubr.f32.gmra.mxu0 %v6491_v37 }
 0x32c   :  { %2878 = vmatmul.mubr.f32.vlgmr.msra.gmra.mxu1 %v7270_v51  ;;  %2785 = vmatprep.mubr.f32.mxu0 %v7263_v43  ;;  %v2422_v51 = vld [vmem:[%s7107_s5 + $0x20] sm:$0xff] }
 0x32d   :  { %3055 = vmatpush1.msra.mxu1 %v6475_v29  ;;  %2883 = vmatprep.mubr.f32.mxu1 %v7263_v43 }
 0x32e   :  { %3057 = vmatprep.subr.mxu1 %v6458_v53 }
 0x32f   :  { %3059 = vmatpush1.msra.mxu1 %v6461_v6  ;;  %2788 = vmatmul.mubr.f32.gmra.mxu0 %v6538_v25 }
 0x330   :  { %3061 = vmatprep.subr.mxu1 %v6464_v62  ;;  %2887 = vmatmul.mubr.f32.gmra.mxu1 %v7271_v38 }
 0x331   :  { %3063 = vmatpush1.msra.mxu1 %v6478_v60  ;;  %2892 = vmatprep.mubr.f32.mxu1 %v7263_v43 }
 0x332   :  { %3065 = vmatprep.subr.mxu1 %v6488_v13  ;;  %2793 = vmatprep.mubr.f32.mxu0 %v7263_v43 }
 0x333   :  { %3067 = vmatpush1.msra.mxu1 %v6507_v15  ;;  %2796 = vmatmul.mubr.f32.gmra.mxu0 %v6568_v34 }
 0x334   :  { %2896 = vmatmul.mubr.f32.gmra.mxu1 %v7272_v23  ;;  %2999 = vmatprep.mubr.f32.mxu0 %v7263_v43 }
 0x335   :  { %2901 = vmatprep.mubr.f32.mxu1 %v7263_v43 }
 0x337   :  { %3001 = vmatmul.mubr.f32.vlgmr.msra.gmra.mxu0 %v6405_v1 }
 0x338   :  { %2905 = vmatmul.mubr.f32.gmra.mxu1 %v2547_v18  ;;  %3006 = vmatprep.mubr.f32.mxu0 %v7263_v43 }
 0x339   :  { %3100 = vmatprep.mubr.f32.mxu1 %v7263_v43 }
 0x33b   :  { %3008 = vmatmul.mubr.f32.gmra.mxu0 %v6451_v50 }
 0x33c   :  { %3102 = vmatmul.mubr.f32.vlgmr.msra.gmra.mxu1 %v6405_v1  ;;  %3013 = vmatprep.mubr.f32.mxu0 %v7263_v43 }
 0x33d   :  { %3107 = vmatprep.mubr.f32.mxu1 %v7263_v43 }
 0x33f   :  { %3015 = vmatmul.mubr.f32.gmra.mxu0 %v6504_v49 }
 0x340   :  { %3109 = vmatmul.mubr.f32.gmra.mxu1 %v6451_v50  ;;  %3020 = vmatprep.mubr.f32.mxu0 %v7263_v43 }
 0x341   :  { %3114 = vmatprep.mubr.f32.mxu1 %v7263_v43 }
 0x343   :  { %3022 = vmatmul.mubr.f32.gmra.mxu0 %v6540_v33 }
 0x344   :  { %3116 = vmatmul.mubr.f32.gmra.mxu1 %v6504_v49  ;;  %3257 = vmatprep.mubr.f32.mxu0 %v7263_v43 }
 0x345   :  { %3121 = vmatprep.mubr.f32.mxu1 %v7263_v43 }
 0x348   :  { %3123 = vmatmul.mubr.f32.gmra.mxu1 %v6540_v33 }
 0x349   :  { %3406 = vmatprep.mubr.f32.mxu1 %v7263_v43 }
 0x3d1   :  { %v2518_v1 = vpop.f32.mrf.mxu0 }
 0x3d2   :  { %v2519_v57 = vadd.f32 %v2518_v1, %v2418_v59  ;;  %v2424_v1 = vld [vmem:[%s7107_s5 + $0x30] sm:$0xff] }
 0x3d3   :  { %v2520_v53 = vpop.f32.mrf.mxu0 }
 0x3d4   :  { %v2521_v9 = vadd.f32 %v2520_v53, %v2419_v19 }
 0x3d6   :  { %v2529_v6 = vpop.f32.mrf.mxu0 }
 0x3d7   :  { %v2530_v30 = vadd.f32 %v2529_v6, %v2420_v26  ;;  %v2423_v26 = vld [vmem:[%s7107_s5 + $0x28] sm:$0xff] }
 0x3d8   :  { %v2531_v50 = vpop.f32.mrf.mxu0 }
 0x3d9   :  { %v2532_v0 = vadd.f32 %v2531_v50, %v2421_v24  ;;  %v2425_v24 = vld [vmem:[%s7107_s5 + $0x38] sm:$0xff] }
 0x3db   :  { %v2663_v62 = vpop.f32.mrf.mxu1  ;;  %v2540_v29 = vpop.f32.mrf.mxu0 }
 0x3dc   :  { %v2541_v58 = vadd.f32 %v2540_v29, %v2422_v51  ;;  %v2664_v6 = vadd.f32 %v2663_v62, %v2519_v57 }
 0x3dd   :  { %v2665_v60 = vpop.f32.mrf.mxu1  ;;  %v2542_v13 = vpop.f32.mrf.mxu0 }
 0x3de   :  { %v2666_v43 = vadd.f32 %v2665_v60, %v2521_v9  ;;  %v2543_v29 = vadd.f32 %v2542_v13, %v2423_v26 }
 0x3df   :  { %v2551_v37 = vpop.f32.mrf.mxu0 }
 0x3e0   :  { %v2670_v15 = vpop.f32.mrf.mxu1  ;;  %v2552_v60 = vadd.f32 %v2551_v37, %v2424_v1 }
 0x3e1   :  { %v2553_v41 = vpop.f32.mrf.mxu0  ;;  %v2671_v27 = vadd.f32 %v2670_v15, %v2530_v30 }
 0x3e2   :  { %v2672_v49 = vpop.f32.mrf.mxu1 }
 0x3e3   :  { %v2773_v34 = vpop.f32.mrf.mxu0  ;;  %v2673_v45 = vadd.f32 %v2672_v49, %v2532_v0 }
 0x3e4   :  { %v2677_v42 = vpop.f32.mrf.mxu1  ;;  %v2774_v9 = vadd.f32 %v2773_v34, %v2664_v6  ;;  %v2554_v34 = vadd.f32 %v2553_v41, %v2425_v24 }
 0x3e5   :  { %v2775_v25 = vpop.f32.mrf.mxu0  ;;  %v2678_v30 = vadd.f32 %v2677_v42, %v2541_v58 }
 0x3e6   :  { %v2679_v61 = vpop.f32.mrf.mxu1  ;;  %v2776_v59 = vadd.f32 %v2775_v25, %v2666_v43 }
 0x3e7   :  { %v2680_v25 = vadd.f32 %v2679_v61, %v2543_v29 }
 0x3e8   :  { %v2684_v55 = vpop.f32.mrf.mxu1 }
 0x3ea   :  { %v6677_v33 = vpop.f32.mrf.mxu1 }
 0x3eb   :  { %v2781_v8 = vpop.f32.mrf.mxu0 }
 0x3ec   :  { %v2879_v20 = vpop.f32.mrf.mxu1  ;;  %v2782_v35 = vadd.f32 %v2781_v8, %v2671_v27  ;;  %v2685_v8 = vadd.f32 %v2684_v55, %v2552_v60 }
 0x3ed   :  { %v2783_v3 = vpop.f32.mrf.mxu0  ;;  %v2880_v40 = vadd.f32 %v2879_v20, %v2774_v9 }
 0x3ee   :  { %v2881_v18 = vpop.f32.mrf.mxu1  ;;  %v2784_v62 = vadd.f32 %v2783_v3, %v2673_v45 }
 0x3ef   :  { %v2789_v2 = vpop.f32.mrf.mxu0  ;;  %v2882_v50 = vadd.f32 %v2881_v18, %v2776_v59 }
 0x3f0   :  { %v2888_v12 = vpop.f32.mrf.mxu1  ;;  %v2790_v0 = vadd.f32 %v2789_v2, %v2678_v30 }
 0x3f1   :  { %v2791_v16 = vpop.f32.mrf.mxu0  ;;  %v2889_v57 = vadd.f32 %v2888_v12, %v2782_v35  ;;  %v2687_v35 = vadd.f32 %v6677_v33, %v2554_v34 }
 0x3f2   :  { %v2890_v10 = vpop.f32.mrf.mxu1  ;;  %v2792_v42 = vadd.f32 %v2791_v16, %v2680_v25 }
 0x3f3   :  { %v2797_v47 = vpop.f32.mrf.mxu0  ;;  %v2891_v27 = vadd.f32 %v2890_v10, %v2784_v62 }
 0x3f4   :  { %v2897_v36 = vpop.f32.mrf.mxu1  ;;  %v2798_v20 = vadd.f32 %v2797_v47, %v2685_v8 }
 0x3f5   :  { %v2799_v11 = vpop.f32.mrf.mxu0  ;;  %v2898_v1 = vadd.f32 %v2897_v36, %v2790_v0 }
 0x3f6   :  { %v2899_v38 = vpop.f32.mrf.mxu1  ;;  %v2800_v41 = vadd.f32 %v2799_v11, %v2687_v35 }
 0x3f7   :  { %v3002_v23 = vpop.f32.mrf.mxu0  ;;  %v2900_v61 = vadd.f32 %v2899_v38, %v2792_v42 }
 0x3f8   :  { %v2906_v32 = vpop.f32.mrf.mxu1  ;;  %v3003_v18 = vadd.f32 %v3002_v23, %v2880_v40 }
 0x3f9   :  { %v3004_v53 = vpop.f32.mrf.mxu0 }
 0x3fa   :  { %v2908_v19 = vpop.f32.mrf.mxu1  ;;  %v3005_v63 = vadd.f32 %v3004_v53, %v2882_v50 }
 0x3fb   :  { %v3009_v28 = vpop.f32.mrf.mxu0  ;;  %v2909_v53 = vadd.f32 %v2908_v19, %v2800_v41  ;;  %v7278_v41 = vld [vmem:[#allocation8_spill] sm:$0xff] }
 0x3fc   :  { %v3103_v15 = vpop.f32.mrf.mxu1  ;;  %v3010_v49 = vadd.f32 %v3009_v28, %v2889_v57 }
 0x3fd   :  { %v3011_v51 = vpop.f32.mrf.mxu0  ;;  %v3104_v3 = vadd.f32 %v3103_v15, %v3003_v18 }
 0x3fe   :  { %v3105_v43 = vpop.f32.mrf.mxu1  ;;  %v3012_v6 = vadd.f32 %v3011_v51, %v2891_v27 }
 0x3ff   :  { %v3016_v37 = vpop.f32.mrf.mxu0  ;;  %v3106_v13 = vadd.f32 %v3105_v43, %v3005_v63  ;;  %v2907_v63 = vadd.f32 %v2906_v32, %v2798_v20  ;;  %v3161_v32 = vld [vmem:[%s7106_s4 + $0x20] sm:$0xff]  ;;  %v7275_v20 = vld [vmem:[#allocation10_spill] sm:$0xff] }
 0x400   :  { %v3110_v58 = vpop.f32.mrf.mxu1  ;;  %v3017_v2 = vadd.f32 %v3016_v37, %v2898_v1  ;;  %v3174_v62 = vsel %vm2426_vm2, %v3161_v32, 0  ;;  %v3164_v32 = vld [vmem:[%s7106_s4 + $0x38] sm:$0xff] }
 0x401   :  { %v3111_v26 = vadd.f32 %v3110_v58, %v3010_v49  ;;  %v3018_v45 = vpop.f32.mrf.mxu0  ;;  %v6714_v49 = vand.u32 4294901760, %v3174_v62 }
 0x402   :  { %v3112_v12 = vpop.f32.mrf.mxu1  ;;  %v3019_v55 = vadd.f32 %v3018_v45, %v2900_v61  ;;  %v7274_v45 = vld [vmem:[#allocation12_spill] sm:$0xff]  ;;  %v3163_v61 = vld [vmem:[%s7106_s4 + $0x30] sm:$0xff] }
 0x403   :  { %4661 = vtanh.f32 %v3111_v26  ;;  %v3113_v28 = vadd.f32 %v3112_v12, %v3012_v6  ;;  %v3023_v10 = vpop.f32.mrf.mxu0  ;;  %v6730_v1 = vsub.f32 %v3174_v62, %v6714_v49  ;;  %v7273_v6 = vld [vmem:[#allocation16_spill] sm:$0xff] }
 0x404   :  { %4663 = vtanh.f32 %v3106_v13  ;;  %v3117_v40 = vpop.f32.mrf.mxu1  ;;  %v3024_v33 = vadd.f32 %v3023_v10, %v2907_v63  ;;  %v7279_v63 = vld [vmem:[#allocation15_spill] sm:$0xff] }
 0x405   :  { %4665 = vtanh.f32 %v3113_v28  ;;  %v3118_v16 = vadd.f32 %v3117_v40, %v3017_v2  ;;  %v3025_v23 = vpop.f32.mrf.mxu0  ;;  %v7277_v2 = vld [vmem:[#allocation14_spill] sm:$0xff] }
 0x406   :  { %4667 = vtanh.f32 %v3104_v3  ;;  %v3119_v36 = vpop.f32.mrf.mxu1  ;;  %v3026_v38 = vadd.f32 %v3025_v23, %v2909_v53  ;;  %v7276_v3 = vld [vmem:[#allocation6_spill] sm:$0xff]  ;;  %v7280_v53 = vld [vmem:[#allocation11_spill] sm:$0xff] }
 0x407   :  { %4669 = vtanh.f32 %v3118_v16  ;;  %v3120_v47 = vadd.f32 %v3119_v36, %v3019_v55 }
 0x408   :  { %v3124_v59 = vpop.f32.mrf.mxu1 }
 0x409   :  { %4671 = vtanh.f32 %v3120_v47  ;;  %v3125_v60 = vadd.f32 %v3124_v59, %v3024_v33  ;;  %v3260_v47 = vand.u32 4294901760, %v6730_v1  ;;  %v3180_v59 = vsel %vm2426_vm2, %v3163_v61, 0 }
 0x40a   :  { %v3126_v9 = vpop.f32.mrf.mxu1  ;;  %v6777_v62 = vand.u32 4294901760, %v3180_v59 }
 0x40b   :  { %4673 = vtanh.f32 %v3125_v60  ;;  %v3127_v11 = vadd.f32 %v3126_v9, %v3026_v38  ;;  %v7281_v38 = vld [vmem:[#allocation5_spill] sm:$0xff] }
 0x40d   :  { %4675 = vtanh.f32 %v3127_v11 }
 0x410   :  { %v4662_v50 = vpop.eup %4661 }
 0x411   :  { %v4664_v15 = vpop.eup %4663  ;;  %v3139_v24 = vadd.f32 %v4662_v50, %v6443_v22 }
 0x412   :  { %v4666_v29 = vpop.eup %4665  ;;  %v3138_v51 = vadd.f32 %v4664_v15, %v6449_v17 }
 0x413   :  { %v4668_v30 = vpop.eup %4667  ;;  %v3140_v19 = vadd.f32 %v4666_v29, %v6429_v44  ;;  %v3162_v44 = vld [vmem:[%s7106_s4 + $0x28] sm:$0xff]  ;;  %v3147_v34 = vmul.f32 %v3139_v24, %v6399_v46 }
 0x414   :  { %v4670_v57 = vpop.eup %4669  ;;  %v3137_v27 = vadd.f32 %v4668_v30, %v6467_v7  ;;  %v3177_v13 = vsel %vm2426_vm2, %v3162_v44, 0 }
 0x415   :  { %v3141_v43 = vadd.f32 %v4670_v57, %v6425_v52  ;;  %v3148_v0 = vmul.f32 %v3140_v19, %v6393_v31  ;;  %v3146_v52 = vmul.f32 %v3138_v51, %v6403_v48  ;;  %v3155_v12 = vadd.f32 %v7276_v3, %v3147_v34 }
 0x416   :  { %v4672_v25 = vpop.eup %4671  ;;  %v6740_v10 = vand.u32 4294901760, %v3177_v13  ;;  %v3261_v51 = vsub.f32 %v6730_v1, %v3260_v47 }
 0x417   :  { %v3142_v22 = vadd.f32 %v4672_v25, %v6440_v4  ;;  %v3149_v37 = vmul.f32 %v3141_v43, %v6396_v56  ;;  %v3156_v42 = vadd.f32 %v6378_v5, %v3148_v0  ;;  %v3145_v4 = vmul.f32 %v3137_v27, %v6418_v54 }
 0x418   :  { %v4674_v17 = vpop.eup %4673  ;;  %v3154_v28 = vadd.f32 %v7277_v2, %v3146_v52  ;;  %v6756_v11 = vand.u32 4294901760, %v3155_v12  ;;  %v6767_v29 = vsub.f32 %v3177_v13, %v6740_v10  ;;  %v3183_v25 = vsel %vm2426_vm2, %v3164_v32, 0 }
 0x419   :  { %v3143_v8 = vadd.f32 %v4674_v17, %v6455_v14  ;;  %v3150_v18 = vmul.f32 %v3142_v22, %v6411_v39  ;;  %v3157_v7 = vadd.f32 %v6380_v21, %v3149_v37  ;;  %v6748_v23 = vand.u32 4294901760, %v3156_v42 }
 0x41a   :  { %v4676_v58 = vpop.eup %4675  ;;  %v3153_v33 = vadd.f32 %v7280_v53, %v3145_v4  ;;  %v6764_v15 = vand.u32 4294901760, %v3154_v28  ;;  %v6790_v0 = vsub.f32 %v3155_v12, %v6756_v11  ;;  %v3271_v37 = vand.u32 4294901760, %v6767_v29 }
 0x41b   :  { %v3144_v26 = vadd.f32 %v4676_v58, %v7273_v6  ;;  %v3151_v35 = vmul.f32 %v3143_v8, %v7274_v45  ;;  %v3158_v14 = vadd.f32 %v7275_v20, %v3150_v18  ;;  %v6746_v36 = vand.u32 4294901760, %v3157_v7 }
 0x41c   :  { %v6779_v57 = vand.u32 4294901760, %v3153_v33  ;;  %v6785_v43 = vsub.f32 %v3156_v42, %v6748_v23  ;;  %v6800_v34 = vsub.f32 %v3154_v28, %v6764_v15  ;;  %v6806_v8 = vsub.f32 %v3180_v59, %v6777_v62 }
 0x41d   :  { %v3152_v40 = vmul.f32 %v3144_v26, %v7278_v41  ;;  %v3159_v55 = vadd.f32 %v7279_v63, %v3151_v35  ;;  %v6744_v16 = vand.u32 4294901760, %v3158_v14  ;;  %v6775_v24 = vsub.f32 %v3157_v7, %v6746_v36 }
 0x41e   :  { %v6808_v18 = vand.u32 4294901760, %v3183_v25  ;;  %v6812_v7 = vsub.f32 %v3153_v33, %v6779_v57  ;;  %v3352_v58 = vand.u32 4294901760, %v6785_v43  ;;  %v3262_v42 = vand.u32 4294901760, %v3261_v51 }
 0x41f   :  { %v3160_v60 = vadd.f32 %v7281_v38, %v3152_v40  ;;  %v6754_v9 = vand.u32 4294901760, %v3159_v55  ;;  %v6759_v50 = vsub.f32 %v3158_v14, %v6744_v16  ;;  %v3346_v52 = vand.u32 4294901760, %v6775_v24 }
 0x420   :  { %v3358_v26 = vand.u32 4294901760, %v6790_v0  ;;  %v3272_v35 = vsub.f32 %v6767_v29, %v3271_v37  ;;  %v3364_v14 = vand.u32 4294901760, %v6800_v34  ;;  %v3282_v28 = vand.u32 4294901760, %v6806_v8 }
 0x421   :  { %v6769_v30 = vand.u32 4294901760, %v3160_v60  ;;  %v6772_v19 = vsub.f32 %v3159_v55, %v6754_v9  ;;  %v3340_v22 = vand.u32 4294901760, %v6759_v50  ;;  %v3347_v61 = vsub.f32 %v6775_v24, %v3346_v52 }
 0x422   :  { %v6835_v40 = vsub.f32 %v3183_v25, %v6808_v18  ;;  %v3353_v33 = vsub.f32 %v6785_v43, %v3352_v58  ;;  %v3370_v59 = vand.u32 4294901760, %v6812_v7  ;;  %v3359_v32 = vsub.f32 %v6790_v0, %v3358_v26 }
 0x423   :  { %3210 = vmatprep.subr.mxu0 %v6769_v30  ;;  %v6793_v27 = vsub.f32 %v3160_v60, %v6769_v30  ;;  %v3334_v44 = vand.u32 4294901760, %v6772_v19  ;;  %v3341_v6 = vsub.f32 %v6759_v50, %v3340_v22  ;;  %v3273_v51 = vand.u32 4294901760, %v3272_v35 }
 0x424   :  { %3212 = vmatpush1.msra.mxu0 %v6754_v9  ;;  %v3365_v25 = vsub.f32 %v6800_v34, %v3364_v14  ;;  %v3371_v35 = vsub.f32 %v6812_v7, %v3370_v59 }
 0x425   :  { %3214 = vmatprep.subr.mxu0 %v6744_v16  ;;  %v3328_v17 = vand.u32 4294901760, %v6793_v27  ;;  %v3335_v13 = vsub.f32 %v6772_v19, %v3334_v44  ;;  %v3342_v60 = vand.u32 4294901760, %v3341_v6  ;;  %v7282_v6 = vmov 0.0  }
 0x426   :  { %3216 = vmatpush1.msra.mxu0 %v6746_v36 }
 0x427   :  { %3218 = vmatprep.subr.mxu0 %v6748_v23  ;;  %v3329_v4 = vsub.f32 %v6793_v27, %v3328_v17  ;;  %v3336_v55 = vand.u32 4294901760, %v3335_v13  ;;  %v3348_v13 = vand.u32 4294901760, %v3347_v61  ;;  %v3366_v61 = vand.u32 4294901760, %v3365_v25  ;;  %v3168_v25 = vld [vmem:[%s7107_s5 + $0x58] sm:$0xff] }
 0x428   :  { %3220 = vmatpush1.msra.mxu0 %v6756_v11 }
 0x429   :  { %3222 = vmatprep.subr.mxu0 %v6764_v15  ;;  %v3330_v12 = vand.u32 4294901760, %v3329_v4  ;;  %v3293_v4 = vand.u32 4294901760, %v6835_v40 }
 0x42a   :  { %3224 = vmatpush1.msra.mxu0 %v6779_v57 }
 0x42b   :  { %3263 = vmatmul.mubr.f32.vlgmr.msra.gmra.mxu0 %v3262_v42  ;;  %3331 = vmatprep.subr.mxu1 %v3330_v12  ;;  %v3283_v42 = vsub.f32 %v6806_v8, %v3282_v28  ;;  %v3360_v12 = vand.u32 4294901760, %v3359_v32 }
 0x42c   :  { %3461 = vmatprep.subr.mxu0 %v6793_v27  ;;  %3337 = vmatpush1.msra.mxu1 %v3336_v55  ;;  %v3354_v27 = vand.u32 4294901760, %v3353_v33  ;;  %v3372_v33 = vand.u32 4294901760, %v3371_v35 }
 0x42d   :  { %3464 = vmatpush1.msra.mxu0 %v6772_v19  ;;  %3343 = vmatprep.subr.mxu1 %v3342_v60  ;;  %v3284_v55 = vand.u32 4294901760, %v3283_v42  ;;  %v3294_v60 = vsub.f32 %v6835_v40, %v3293_v4 }
 0x42e   :  { %3467 = vmatprep.subr.mxu0 %v6759_v50  ;;  %3268 = vmatprep.mubr.f32.mxu0 %v7282_v6 }
 0x42f   :  { %3349 = vmatpush1.msra.mxu1 %v3348_v13  ;;  %3470 = vmatpush1.msra.mxu0 %v6775_v24  ;;  %v3295_v32 = vand.u32 4294901760, %v3294_v60  ;;  %v3169_v13 = vld [vmem:[%s7107_s5 + $0x60] sm:$0xff]  ;;  %v3170_v60 = vld [vmem:[%s7107_s5 + $0x68] sm:$0xff] }
 0x430   :  { %3274 = vmatmul.mubr.f32.gmra.mxu0 %v3273_v51  ;;  %3355 = vmatprep.subr.mxu1 %v3354_v27 }
 0x431   :  { %3473 = vmatprep.subr.mxu0 %v6785_v43  ;;  %3361 = vmatpush1.msra.mxu1 %v3360_v12 }
 0x432   :  { %3476 = vmatpush1.msra.mxu0 %v6790_v0  ;;  %3367 = vmatprep.subr.mxu1 %v3366_v61 }
 0x433   :  { %3479 = vmatprep.subr.mxu0 %v6800_v34  ;;  %3279 = vmatprep.mubr.f32.mxu0 %v7282_v6 }
 0x434   :  { %3373 = vmatpush1.msra.mxu1 %v3372_v33  ;;  %3482 = vmatpush1.msra.mxu0 %v6812_v7  ;;  %v3171_v33 = vld [vmem:[%s7107_s5 + $0x70] sm:$0xff] }
 0x435   :  { %3285 = vmatmul.mubr.f32.gmra.mxu0 %v3284_v55  ;;  %3408 = vmatmul.mubr.f32.vlgmr.msra.gmra.mxu1 %v6714_v49 }
 0x436   :  { %3573 = vmatprep.subr.mxu1 %v6769_v30  ;;  %3684 = vmatprep.subr.mxu0 %v3328_v17 }
 0x437   :  { %3575 = vmatpush1.msra.mxu1 %v6754_v9  ;;  %3290 = vmatprep.mubr.f32.mxu0 %v7282_v6 }
 0x438   :  { %3577 = vmatprep.subr.mxu1 %v6744_v16  ;;  %3413 = vmatprep.mubr.f32.mxu1 %v7282_v6 }
 0x439   :  { %3579 = vmatpush1.msra.mxu1 %v6746_v36  ;;  %3296 = vmatmul.mubr.f32.gmra.mxu0 %v3295_v32 }
 0x43a   :  { %3415 = vmatmul.mubr.f32.gmra.mxu1 %v6740_v10  ;;  %3581 = vmatprep.subr.mxu1 %v6748_v23 }
 0x43b   :  { %3583 = vmatpush1.msra.mxu1 %v6756_v11  ;;  %3420 = vmatprep.mubr.f32.mxu1 %v7282_v6 }
 0x43c   :  { %3585 = vmatprep.subr.mxu1 %v6764_v15  ;;  %3515 = vmatprep.mubr.f32.mxu0 %v7282_v6 }
 0x43d   :  { %3587 = vmatpush1.msra.mxu1 %v6779_v57  ;;  %3518 = vmatmul.mubr.f32.vlgmr.msra.gmra.mxu0 %v6730_v1 }
 0x43e   :  { %3422 = vmatmul.mubr.f32.gmra.mxu1 %v6777_v62  ;;  %3688 = vmatpush1.msra.mxu0 %v3334_v44 }
 0x43f   :  { %3799 = vmatprep.subr.mxu1 %v6769_v30  ;;  %3692 = vmatprep.subr.mxu0 %v3340_v22 }
 0x440   :  { %3696 = vmatpush1.msra.mxu0 %v3346_v52  ;;  %3427 = vmatprep.mubr.f32.mxu1 %v7282_v6 }
 0x441   :  { %3700 = vmatprep.subr.mxu0 %v3352_v58  ;;  %3523 = vmatprep.mubr.f32.mxu0 %v7282_v6  ;;  %v3165_v58 = vld [vmem:[%s7107_s5 + $0x40] sm:$0xff] }
 0x442   :  { %3429 = vmatmul.mubr.f32.gmra.mxu1 %v6808_v18  ;;  %3704 = vmatpush1.msra.mxu0 %v3358_v26 }
 0x443   :  { %3708 = vmatprep.subr.mxu0 %v3364_v14  ;;  %3620 = vmatprep.mubr.f32.mxu1 %v7282_v6 }
 0x444   :  { %3712 = vmatpush1.msra.mxu0 %v3370_v59 }
 0x445   :  { %3526 = vmatmul.mubr.f32.gmra.mxu0 %v6767_v29 }
 0x446   :  { %3624 = vmatmul.mubr.f32.vlgmr.msra.gmra.mxu1 %v3260_v47  ;;  %3531 = vmatprep.mubr.f32.mxu0 %v7282_v6 }
 0x447   :  { %3801 = vmatpush1.msra.mxu1 %v6754_v9  ;;  %3629 = vmatprep.mubr.f32.mxu1 %v7282_v6 }
 0x448   :  { %3803 = vmatprep.subr.mxu1 %v6744_v16 }
 0x449   :  { %3805 = vmatpush1.msra.mxu1 %v6746_v36  ;;  %3534 = vmatmul.mubr.f32.gmra.mxu0 %v6806_v8  ;;  %v3166_v8 = vld [vmem:[%s7107_s5 + $0x48] sm:$0xff] }
 0x44a   :  { %3807 = vmatprep.subr.mxu1 %v6748_v23  ;;  %3633 = vmatmul.mubr.f32.gmra.mxu1 %v3271_v37 }
 0x44b   :  { %3809 = vmatpush1.msra.mxu1 %v6756_v11  ;;  %3638 = vmatprep.mubr.f32.mxu1 %v7282_v6 }
 0x44c   :  { %3811 = vmatprep.subr.mxu1 %v6764_v15  ;;  %3539 = vmatprep.mubr.f32.mxu0 %v7282_v6 }
 0x44d   :  { %3813 = vmatpush1.msra.mxu1 %v6779_v57  ;;  %3542 = vmatmul.mubr.f32.gmra.mxu0 %v6835_v40 }
 0x44e   :  { %3642 = vmatmul.mubr.f32.gmra.mxu1 %v3282_v28  ;;  %3745 = vmatprep.mubr.f32.mxu0 %v7282_v6 }
 0x44f   :  { %3647 = vmatprep.mubr.f32.mxu1 %v7282_v6 }
 0x451   :  { %3747 = vmatmul.mubr.f32.vlgmr.msra.gmra.mxu0 %v6714_v49 }
 0x452   :  { %3651 = vmatmul.mubr.f32.gmra.mxu1 %v3293_v4  ;;  %3752 = vmatprep.mubr.f32.mxu0 %v7282_v6 }
 0x453   :  { %3846 = vmatprep.mubr.f32.mxu1 %v7282_v6 }
 0x455   :  { %3754 = vmatmul.mubr.f32.gmra.mxu0 %v6740_v10 }
 0x456   :  { %3848 = vmatmul.mubr.f32.vlgmr.msra.gmra.mxu1 %v6714_v49  ;;  %3759 = vmatprep.mubr.f32.mxu0 %v7282_v6 }
 0x457   :  { %3853 = vmatprep.mubr.f32.mxu1 %v7282_v6 }
 0x459   :  { %3761 = vmatmul.mubr.f32.gmra.mxu0 %v6777_v62 }
 0x45a   :  { %3855 = vmatmul.mubr.f32.gmra.mxu1 %v6740_v10  ;;  %3766 = vmatprep.mubr.f32.mxu0 %v7282_v6 }
 0x45b   :  { %3860 = vmatprep.mubr.f32.mxu1 %v7282_v6 }
 0x45d   :  { %3768 = vmatmul.mubr.f32.gmra.mxu0 %v6808_v18 }
 0x45e   :  { %3862 = vmatmul.mubr.f32.gmra.mxu1 %v6777_v62  ;;  %3977 = vmatprep.mubr.f32.mxu0 %v7282_v6 }
 0x45f   :  { %3867 = vmatprep.mubr.f32.mxu1 %v7282_v6 }
 0x462   :  { %3869 = vmatmul.mubr.f32.gmra.mxu1 %v6808_v18  ;;  %v3167_v18 = vld [vmem:[%s7107_s5 + $0x50] sm:$0xff] }
 0x463   :  { %4093 = vmatprep.mubr.f32.mxu1 %v7282_v6 }
 0x4eb   :  { %v3264_v49 = vpop.f32.mrf.mxu0 }
 0x4ec   :  { %v3265_v51 = vadd.f32 %v3264_v49, %v3165_v58 }
 0x4ed   :  { %v3266_v1 = vpop.f32.mrf.mxu0 }
 0x4ee   :  { %v3267_v28 = vadd.f32 %v3266_v1, %v3166_v8 }
 0x4f0   :  { %v3275_v16 = vpop.f32.mrf.mxu0 }
 0x4f1   :  { %v3276_v40 = vadd.f32 %v3275_v16, %v3167_v18 }
 0x4f2   :  { %v3277_v10 = vpop.f32.mrf.mxu0 }
 0x4f3   :  { %v3278_v12 = vadd.f32 %v3277_v10, %v3168_v25  ;;  %v3172_v25 = vld [vmem:[%s7107_s5 + $0x78] sm:$0xff] }
 0x4f5   :  { %v3409_v36 = vpop.f32.mrf.mxu1  ;;  %v3286_v23 = vpop.f32.mrf.mxu0 }
 0x4f6   :  { %v3287_v55 = vadd.f32 %v3286_v23, %v3169_v13  ;;  %v3410_v1 = vadd.f32 %v3409_v36, %v3265_v51 }
 0x4f7   :  { %v3411_v47 = vpop.f32.mrf.mxu1  ;;  %v3288_v9 = vpop.f32.mrf.mxu0 }
 0x4f8   :  { %v3412_v4 = vadd.f32 %v3411_v47, %v3267_v28  ;;  %v3289_v28 = vadd.f32 %v3288_v9, %v3170_v60 }
 0x4f9   :  { %v3297_v11 = vpop.f32.mrf.mxu0 }
 0x4fa   :  { %v3416_v50 = vpop.f32.mrf.mxu1  ;;  %v3298_v10 = vadd.f32 %v3297_v11, %v3171_v33 }
 0x4fb   :  { %v3299_v15 = vpop.f32.mrf.mxu0  ;;  %v3417_v61 = vadd.f32 %v3416_v50, %v3276_v40 }
 0x4fc   :  { %v3418_v29 = vpop.f32.mrf.mxu1  ;;  %v3300_v11 = vadd.f32 %v3299_v15, %v3172_v25 }
 0x4fd   :  { %v3519_v30 = vpop.f32.mrf.mxu0  ;;  %v3419_v8 = vadd.f32 %v3418_v29, %v3278_v12 }
 0x4fe   :  { %v3423_v19 = vpop.f32.mrf.mxu1  ;;  %v3520_v50 = vadd.f32 %v3519_v30, %v3410_v1 }
 0x4ff   :  { %v3521_v62 = vpop.f32.mrf.mxu0  ;;  %v3424_v40 = vadd.f32 %v3423_v19, %v3287_v55 }
 0x500   :  { %v3425_v24 = vpop.f32.mrf.mxu1  ;;  %v3522_v32 = vadd.f32 %v3521_v62, %v3412_v4 }
 0x501   :  { %v3426_v4 = vadd.f32 %v3425_v24, %v3289_v28 }
 0x502   :  { %v3430_v57 = vpop.f32.mrf.mxu1 }
 0x503   :  { %v3431_v30 = vadd.f32 %v3430_v57, %v3298_v10 }
 0x504   :  { %v6944_v43 = vpop.f32.mrf.mxu1 }
 0x505   :  { %v3527_v0 = vpop.f32.mrf.mxu0 }
 0x506   :  { %v3625_v44 = vpop.f32.mrf.mxu1  ;;  %v3528_v18 = vadd.f32 %v3527_v0, %v3417_v61 }
 0x507   :  { %v3529_v22 = vpop.f32.mrf.mxu0  ;;  %v3626_v36 = vadd.f32 %v3625_v44, %v3520_v50 }
 0x508   :  { %v3627_v37 = vpop.f32.mrf.mxu1  ;;  %v3530_v13 = vadd.f32 %v3529_v22, %v3419_v8 }
 0x509   :  { %v3535_v34 = vpop.f32.mrf.mxu0  ;;  %v3628_v47 = vadd.f32 %v3627_v37, %v3522_v32 }
 0x50a   :  { %v3634_v17 = vpop.f32.mrf.mxu1  ;;  %v3536_v29 = vadd.f32 %v3535_v34, %v3424_v40 }
 0x50b   :  { %v3537_v52 = vpop.f32.mrf.mxu0  ;;  %v3635_v6 = vadd.f32 %v3634_v17, %v3528_v18  ;;  %v3433_v17 = vadd.f32 %v6944_v43, %v3300_v11 }
 0x50c   :  { %v3636_v7 = vpop.f32.mrf.mxu1  ;;  %v3538_v55 = vadd.f32 %v3537_v52, %v3426_v4 }
 0x50d   :  { %v3543_v26 = vpop.f32.mrf.mxu0  ;;  %v3637_v0 = vadd.f32 %v3636_v7, %v3530_v13 }
 0x50e   :  { %v3643_v14 = vpop.f32.mrf.mxu1 }
 0x50f   :  { %v3545_v59 = vpop.f32.mrf.mxu0  ;;  %v3644_v60 = vadd.f32 %v3643_v14, %v3536_v29 }
 0x510   :  { %v3645_v42 = vpop.f32.mrf.mxu1  ;;  %v3546_v7 = vadd.f32 %v3545_v59, %v3433_v17 }
 0x511   :  { %v3748_v27 = vpop.f32.mrf.mxu0  ;;  %v3646_v1 = vadd.f32 %v3645_v42, %v3538_v55 }
 0x512   :  { %v3652_v35 = vpop.f32.mrf.mxu1  ;;  %v3749_v61 = vadd.f32 %v3748_v27, %v3626_v36 }
 0x513   :  { %v3750_v49 = vpop.f32.mrf.mxu0 }
 0x514   :  { %v3654_v16 = vpop.f32.mrf.mxu1  ;;  %v3751_v38 = vadd.f32 %v3750_v49, %v3628_v47  ;;  %v3544_v49 = vadd.f32 %v3543_v26, %v3431_v30 }
 0x515   :  { %v3755_v58 = vpop.f32.mrf.mxu0  ;;  %v3655_v18 = vadd.f32 %v3654_v16, %v3546_v7 }
 0x516   :  { %v3849_v23 = vpop.f32.mrf.mxu1  ;;  %v3756_v37 = vadd.f32 %v3755_v58, %v3635_v6  ;;  %v3653_v57 = vadd.f32 %v3652_v35, %v3544_v49  ;;  %v3899_v35 = vld [vmem:[%s7106_s4 + $0x40] sm:$0x3] }
 0x517   :  { %v3757_v62 = vpop.f32.mrf.mxu0  ;;  %v3850_v24 = vadd.f32 %v3849_v23, %v3749_v61  ;;  %v3903_v25 = vsel %vm2426_vm2, %v3899_v35, 0 }
 0x518   :  { %v3851_v51 = vpop.f32.mrf.mxu1  ;;  %v3758_v33 = vadd.f32 %v3757_v62, %v3637_v0  ;;  %v6980_v0 = vand.u32 4294901760, %v3903_v25 }
 0x519   :  { %v3852_v12 = vadd.f32 %v3851_v51, %v3751_v38  ;;  %v3762_v9 = vpop.f32.mrf.mxu0 }
 0x51a   :  { %v3856_v19 = vpop.f32.mrf.mxu1  ;;  %v3763_v34 = vadd.f32 %v3762_v9, %v3644_v60 }
 0x51b   :  { %v3857_v32 = vadd.f32 %v3856_v19, %v3756_v37  ;;  %v3764_v22 = vpop.f32.mrf.mxu0  ;;  %4677 = vtanh.f32 %v3852_v12 }
 0x51c   :  { %v3858_v44 = vpop.f32.mrf.mxu1  ;;  %v3765_v52 = vadd.f32 %v3764_v22, %v3646_v1 }
 0x51d   :  { %v3859_v6 = vadd.f32 %v3858_v44, %v3758_v33  ;;  %v3769_v38 = vpop.f32.mrf.mxu0  ;;  %4679 = vtanh.f32 %v3857_v32 }
 0x51e   :  { %v3863_v15 = vpop.f32.mrf.mxu1  ;;  %v3770_v43 = vadd.f32 %v3769_v38, %v3653_v57 }
 0x51f   :  { %4681 = vtanh.f32 %v3859_v6  ;;  %v3864_v14 = vadd.f32 %v3863_v15, %v3763_v34  ;;  %v3771_v8 = vpop.f32.mrf.mxu0 }
 0x520   :  { %4683 = vtanh.f32 %v3850_v24  ;;  %v3865_v27 = vpop.f32.mrf.mxu1  ;;  %v3772_v42 = vadd.f32 %v3771_v8, %v3655_v18 }
 0x521   :  { %4685 = vtanh.f32 %v3864_v14  ;;  %v3866_v26 = vadd.f32 %v3865_v27, %v3765_v52 }
 0x522   :  { %v3870_v47 = vpop.f32.mrf.mxu1 }
 0x523   :  { %4687 = vtanh.f32 %v3866_v26  ;;  %v3871_v58 = vadd.f32 %v3870_v47, %v3770_v43 }
 0x524   :  { %v3872_v28 = vpop.f32.mrf.mxu1 }
 0x525   :  { %4689 = vtanh.f32 %v3871_v58  ;;  %v3873_v59 = vadd.f32 %v3872_v28, %v3772_v42 }
 0x527   :  { %4691 = vtanh.f32 %v3873_v59 }
 0x528   :  { %v4678_v10 = vpop.eup %4677 }
 0x529   :  { %v3884_v36 = vmul.f32 %v4678_v10, %v6403_v48 }
 0x52a   :  { %v4680_v50 = vpop.eup %4679 }
 0x52b   :  { %v3885_v62 = vmul.f32 %v4680_v50, %v6399_v46  ;;  %v3892_v48 = vadd.f32 %v7277_v2, %v3884_v36  ;;  %v3900_v36 = vld [vmem:[%s7107_s5 + $0x80] sm:$0x3] }
 0x52c   :  { %v4682_v23 = vpop.eup %4681 }
 0x52d   :  { %v4684_v40 = vpop.eup %4683  ;;  %v3886_v16 = vmul.f32 %v4682_v23, %v6393_v31  ;;  %v3893_v11 = vadd.f32 %v7276_v3, %v3885_v62  ;;  %v7006_v60 = vand.u32 4294901760, %v3892_v48  ;;  %v7284_v62 = vmov 0.0  }
 0x52e   :  { %v4686_v13 = vpop.eup %4685  ;;  %v3883_v29 = vmul.f32 %v4684_v40, %v6418_v54 }
 0x52f   :  { %v3887_v4 = vmul.f32 %v4686_v13, %v6396_v56  ;;  %v3894_v31 = vadd.f32 %v6378_v5, %v3886_v16  ;;  %v7033_v34 = vsub.f32 %v3892_v48, %v7006_v60 }
 0x530   :  { %v4688_v51 = vpop.eup %4687  ;;  %v3891_v54 = vadd.f32 %v7280_v53, %v3883_v29 }
 0x531   :  { %v3888_v37 = vmul.f32 %v4688_v51, %v6411_v39  ;;  %v3895_v12 = vadd.f32 %v6380_v21, %v3887_v4  ;;  %v6993_v39 = vsub.f32 %v3903_v25, %v6980_v0  ;;  %v6999_v3 = vand.u32 4294901760, %v3894_v31  ;;  %v3901_v51 = vld [vmem:[%s7107_s5 + $0x88] sm:$0x3]  ;;  %s4728_s5 = smov [#allocation2]  }
 0x532   :  { %v4690_v9 = vpop.eup %4689  ;;  %v4051_v18 = vand.u32 4294901760, %v7033_v34  ;;  %s4468_s21 = sshll.u32 %s4728_s5, 4  ;;  %s4469_s21 = int_to_ptr.vmem [resolvable:$true] %s4468_s21 }
 0x533   :  { %v3889_v46 = vmul.f32 %v4690_v9, %v7274_v45  ;;  %v3896_v56 = vadd.f32 %v7275_v20, %v3888_v37  ;;  %v6989_v61 = vand.u32 4294901760, %v3895_v12  ;;  %v7001_v45 = vand.u32 4294901760, %v3893_v11  ;;  %v7283_v20 = vld [vmem:[#allocation5_spill] sm:$0xff]  ;;  %s4697_s22 = scalar_lea.vmem %s4469_s21, 64  ;;  %p4702_p1 = scmp.lt.s32.totalorder %s4469_s21, %s4469_s21 }
 0x534   :  { %v4692_v30 = vpop.eup %4691  ;;  %v7023_v17 = vsub.f32 %v3894_v31, %v6999_v3  ;;  %v4052_v35 = vsub.f32 %v7033_v34, %v4051_v18  ;;  %p4698_p0 = scmp.ne.s32.totalorder %s4469_s21, %s4697_s22  ;;  %p4703_p2 = scmp.lt.s32.totalorder %s4697_s22, %s4697_s22 }
 0x535   :  { %v3890_v21 = vmul.f32 %v4692_v30, %v7278_v41  ;;  %v3897_v5 = vadd.f32 %v7279_v63, %v3889_v46  ;;  %v6997_v19 = vand.u32 4294901760, %v3896_v56  ;;  %v7012_v33 = vsub.f32 %v3895_v12, %v6989_v61 }
 0x536   :  { %v7014_v41 = vand.u32 4294901760, %v3891_v54  ;;  %v3980_v63 = vand.u32 4294901760, %v6993_v39  ;;  %v7026_v49 = vsub.f32 %v3893_v11, %v7001_v45  ;;  %v4039_v57 = vand.u32 4294901760, %v7023_v17  ;;  %p4704_p3 = por %p4703_p2, %p4702_p1 }
 0x537   :  { %v3898_v2 = vadd.f32 %v7283_v20, %v3890_v21  ;;  %v7004_v55 = vand.u32 4294901760, %v3897_v5  ;;  %v7009_v53 = vsub.f32 %v3896_v56, %v6997_v19  ;;  %v4033_v7 = vand.u32 4294901760, %v7012_v33 }
 0x538   :  { %v7037_v6 = vsub.f32 %v3891_v54, %v7014_v41  ;;  %v3981_v38 = vsub.f32 %v6993_v39, %v3980_v63  ;;  %v4045_v14 = vand.u32 4294901760, %v7026_v49  ;;  %v4040_v58 = vsub.f32 %v7023_v17, %v4039_v57  ;;  %p4705_p4 = pnand %p4704_p3, %p4698_p0 }
 0x539   :  { %v7017_v32 = vand.u32 4294901760, %v3898_v2  ;;  %v7020_v22 = vsub.f32 %v3897_v5, %v7004_v55  ;;  %v4027_v1 = vand.u32 4294901760, %v7009_v53  ;;  %v4034_v26 = vsub.f32 %v7012_v33, %v4033_v7 }
 0x53a   :  { %v3982_v43 = vand.u32 4294901760, %v3981_v38  ;;  %v4057_v47 = vand.u32 4294901760, %v7037_v6  ;;  %v4046_v59 = vsub.f32 %v7026_v49, %v4045_v14  ;;  %v4041_v40 = vand.u32 4294901760, %v4040_v58 }
 0x53b   :  { %3930 = vmatprep.subr.mxu0 %v7017_v32  ;;  %v4014_v24 = vsub.f32 %v3898_v2, %v7017_v32  ;;  %v4021_v44 = vand.u32 4294901760, %v7020_v22  ;;  %v4028_v8 = vsub.f32 %v7009_v53, %v4027_v1  ;;  %v4035_v50 = vand.u32 4294901760, %v4034_v26 }
 0x53c   :  { %3932 = vmatpush1.msra.mxu0 %v7004_v55  ;;  %v4058_v23 = vsub.f32 %v7037_v6, %v4057_v47  ;;  %v4047_v16 = vand.u32 4294901760, %v4046_v59  ;;  %v4053_v25 = vand.u32 4294901760, %v4052_v35 }
 0x53d   :  { %3934 = vmatprep.subr.mxu0 %v6997_v19  ;;  %v4015_v15 = vand.u32 4294901760, %v4014_v24  ;;  %v4022_v52 = vsub.f32 %v7020_v22, %v4021_v44  ;;  %v4029_v10 = vand.u32 4294901760, %v4028_v8 }
 0x53e   :  { %3936 = vmatpush1.msra.mxu0 %v6989_v61  ;;  %v4059_v13 = vand.u32 4294901760, %v4058_v23 }
 0x53f   :  { %3938 = vmatprep.subr.mxu0 %v6999_v3  ;;  %v4016_v27 = vsub.f32 %v4014_v24, %v4015_v15  ;;  %v4023_v28 = vand.u32 4294901760, %v4022_v52 }
 0x540   :  { %3940 = vmatpush1.msra.mxu0 %v7001_v45 }
 0x541   :  { %3942 = vmatprep.subr.mxu0 %v7006_v60  ;;  %v4017_v42 = vand.u32 4294901760, %v4016_v27 }
 0x542   :  { %3944 = vmatpush1.msra.mxu0 %v7014_v41 }
 0x543   :  { %4018 = vmatprep.subr.mxu1 %v4017_v42  ;;  %4127 = vmatprep.subr.mxu0 %v4014_v24 }
 0x544   :  { %3983 = vmatmul.mubr.f32.vlgmr.msra.gmra.mxu0 %v3982_v43  ;;  %4024 = vmatpush1.msra.mxu1 %v4023_v28 }
 0x545   :  { %4130 = vmatpush1.msra.mxu0 %v7020_v22  ;;  %4030 = vmatprep.subr.mxu1 %v4029_v10 }
 0x546   :  { %4133 = vmatprep.subr.mxu0 %v7009_v53  ;;  %4036 = vmatpush1.msra.mxu1 %v4035_v50 }
 0x547   :  { %4136 = vmatpush1.msra.mxu0 %v7012_v33  ;;  %4042 = vmatprep.subr.mxu1 %v4041_v40 }
 0x548   :  { %4139 = vmatprep.subr.mxu0 %v7023_v17  ;;  %4048 = vmatpush1.msra.mxu1 %v4047_v16 }
 0x549   :  { %4142 = vmatpush1.msra.mxu0 %v7026_v49  ;;  %4054 = vmatprep.subr.mxu1 %v4053_v25 }
 0x54a   :  { %4145 = vmatprep.subr.mxu0 %v7033_v34  ;;  %4060 = vmatpush1.msra.mxu1 %v4059_v13 }
 0x54b   :  { %4148 = vmatpush1.msra.mxu0 %v7037_v6  ;;  %4181 = vmatprep.mubr.f32.mxu0 %v7284_v62 }
 0x54c   :  { %4215 = vmatprep.subr.mxu1 %v7017_v32  ;;  %4299 = vmatprep.subr.mxu0 %v4015_v15 }
 0x54d   :  { %4095 = vmatmul.mubr.f32.vlgmr.msra.gmra.mxu1 %v6980_v0  ;;  %4184 = vmatmul.mubr.f32.vlgmr.msra.gmra.mxu0 %v6993_v39 }
 0x54e   :  { %4217 = vmatpush1.msra.mxu1 %v7004_v55  ;;  %4303 = vmatpush1.msra.mxu0 %v4021_v44 }
 0x54f   :  { %4219 = vmatprep.subr.mxu1 %v6997_v19  ;;  %4307 = vmatprep.subr.mxu0 %v4027_v1 }
 0x550   :  { %4221 = vmatpush1.msra.mxu1 %v6989_v61  ;;  %4311 = vmatpush1.msra.mxu0 %v4033_v7 }
 0x551   :  { %4223 = vmatprep.subr.mxu1 %v6999_v3  ;;  %4315 = vmatprep.subr.mxu0 %v4039_v57 }
 0x552   :  { %4225 = vmatpush1.msra.mxu1 %v7001_v45  ;;  %4319 = vmatpush1.msra.mxu0 %v4045_v14 }
 0x553   :  { %4227 = vmatprep.subr.mxu1 %v7006_v60  ;;  %4323 = vmatprep.subr.mxu0 %v4051_v18 }
 0x554   :  { %4229 = vmatpush1.msra.mxu1 %v7014_v41  ;;  %4327 = vmatpush1.msra.mxu0 %v4057_v47 }
 0x555   :  { %4262 = vmatprep.mubr.f32.mxu1 %v7284_v62  ;;  %4393 = vmatprep.subr.mxu1 %v7017_v32 }
 0x556   :  { %4266 = vmatmul.mubr.f32.vlgmr.msra.gmra.mxu1 %v3980_v63  ;;  %4360 = vmatprep.mubr.f32.mxu0 %v7284_v62 }
 0x557   :  { %4395 = vmatpush1.msra.mxu1 %v7004_v55  ;;  %4362 = vmatmul.mubr.f32.vlgmr.msra.gmra.mxu0 %v6980_v0 }
 0x558   :  { %4397 = vmatprep.subr.mxu1 %v6997_v19  ;;  %4440 = vmatprep.mubr.f32.mxu1 %v7284_v62 }
 0x559   :  { %4399 = vmatpush1.msra.mxu1 %v6989_v61 }
 0x55a   :  { %4401 = vmatprep.subr.mxu1 %v6999_v3 }
 0x55b   :  { %4403 = vmatpush1.msra.mxu1 %v7001_v45 }
 0x55c   :  { %4405 = vmatprep.subr.mxu1 %v7006_v60 }
 0x55d   :  { %4407 = vmatpush1.msra.mxu1 %v7014_v41 }
 0x55e   :  { %4442 = vmatmul.mubr.f32.vlgmr.msra.gmra.mxu1 %v6980_v0 }
 0x604   :  { %v3984_v4 = vpop.f32.mrf.mxu0 }
 0x605   :  { %v3985_v12 = vadd.f32 %v3984_v4, %v3900_v36 }
 0x606   :  { %v3986_v29 = vpop.f32.mrf.mxu0 }
 0x607   :  { %v3987_v31 = vadd.f32 %v3986_v29, %v3901_v51 }
 0x60d   :  { %v4096_v37 = vpop.f32.mrf.mxu1  ;;  %v4185_v11 = vpop.f32.mrf.mxu0 }
 0x60e   :  { %v4097_v46 = vadd.f32 %v4096_v37, %v3985_v12 }
 0x60f   :  { %v4098_v9 = vpop.f32.mrf.mxu1  ;;  %v4187_v48 = vpop.f32.mrf.mxu0 }
 0x610   :  { %v4099_v56 = vadd.f32 %v4098_v9, %v3987_v31  ;;  %v4186_v0 = vadd.f32 %v4185_v11, %v4097_v46 }
 0x612   :  { %v4188_v39 = vadd.f32 %v4187_v48, %v4099_v56 }
 0x616   :  { %v4267_v30 = vpop.f32.mrf.mxu1 }
 0x617   :  { %v4363_v54 = vpop.f32.mrf.mxu0  ;;  %v4268_v21 = vadd.f32 %v4267_v30, %v4186_v0 }
 0x618   :  { %v4269_v61 = vpop.f32.mrf.mxu1 }
 0x619   :  { %v4270_v5 = vadd.f32 %v4269_v61, %v4188_v39  ;;  %v4365_v19 = vpop.f32.mrf.mxu0  ;;  %v4364_v3 = vadd.f32 %v4363_v54, %v4268_v21 }
 0x61b   :  { %v4366_v20 = vadd.f32 %v4365_v19, %v4270_v5 }
 0x61e   :  { %v4443_v45 = vpop.f32.mrf.mxu1 }
 0x61f   :  { %v4444_v2 = vadd.f32 %v4443_v45, %v4364_v3 }
 0x620   :  { %v4445_v55 = vpop.f32.mrf.mxu1 }
 0x621   :  { %v4446_v60 = vadd.f32 %v4445_v55, %v4366_v20  ;;  %4693 = vtanh.f32 %v4444_v2 }
 0x623   :  { %4695 = vtanh.f32 %v4446_v60 }
 0x62e   :  { %v4694_v53 = vpop.eup %4693 }
 0x630   :  { %v4696_v33 = vpop.eup %4695 }
 0x631   :  { %v4452_v41 = vcombine.low %v4694_v53, %v4696_v33 }
 0x633   :  { %4516 = vst.sshfl [vmem:[#allocation2] sm:$0x33 pattern:$0x76325410] %v4452_v41 }
 0x634   :  { %4708 = shalt.err (!%p4705_p4)
}
 0x635   :  { %4471 = dma.vmem_to_hbm [thread:$0]  %s4469_s21, 64, %s7108_s6, [#allocation3]  }
 0x636   :  { %4717 = dma.done.wait [#allocation3], 64  }
 0x637   :  { %4718 = vsyncadd [#allocation3], 4294967232 }
 0x638   :  { %4475 = vsyncpa [#allocation3], 1 }

</bundles_post_ra>
